<compile_context>
chip_gen: v7x
topology: tpu7x:2x2x1
jax: 0.10.0
libtpu: 0.0.40
codegen_flags: <defaults>
</compile_context>

<pallas_src>
import jax
import jax.numpy as jnp
from jax import lax
from jax.experimental import pallas as pl
from jax.experimental.pallas import tpu as pltpu

KH = KW = 3        # conv kernel size
C_MID = 3          # hidden channels of the attention head
EPS = 1e-5         # BatchNorm eps


def _make_kernel(N, Cin, H, W):
    HW = H * W
    n_taps = KH * KW

    def kernel(x_ref, w1_ref, g_ref, be_ref, w2_ref, b2_ref, o_ref):
        # x_ref : (N, Cin, H*W)        VMEM, lane-dense flattened NCHW input
        # w1_ref: (C_MID*Cin*KH*KW,)   SMEM, conv1 weights, PyTorch OIHW flat
        # g_ref : (C_MID,)             SMEM, BN gamma
        # be_ref: (C_MID,)             SMEM, BN beta
        # w2_ref: (C_MID*KH*KW,)       SMEM, conv2 weights, OIHW flat
        # b2_ref: (1,)                 SMEM, conv2 bias
        # o_ref : (N, H*W)             VMEM, lane-dense sigmoid output
        x = x_ref[...]                                     # (N, Cin, HW)

        # ---- boundary (halo) masks, computed once ---------------------------
        lane = lax.broadcasted_iota(jnp.int32, (N, HW), 1)
        if W & (W - 1) == 0:
            col = jnp.bitwise_and(lane, W - 1)             # lane % W (pow2 path)
        else:
            col = lane % W
        row_ok = (lane >= W, None, lane < (H - 1) * W)     # kh = 0, 1, 2
        col_ok = (col >= 1, None, col <= W - 2)            # kw = 0, 1, 2

        taps = []                                          # (flat shift, mask)
        for kh in range(KH):
            for kw in range(KW):
                r, c = row_ok[kh], col_ok[kw]
                if r is None:
                    m = c
                elif c is None:
                    m = r
                else:
                    m = jnp.logical_and(r, c)
                taps.append(((kh - 1) * W + (kw - 1), m))

        def tap(plane, k):
            """out[p] = plane[p + shift_k], with out-of-image taps zeroed."""
            s, m = taps[k]
            v = plane if s == 0 else pltpu.roll(plane, shift=(-s) % HW, axis=1)
            return v if m is None else jnp.where(m, v, 0.0)

        # ---- Conv2d(Cin -> 3, 3x3, pad=1) + BatchNorm2d (batch stats) -------
        # Build every shifted/masked input tap exactly once; reuse for all co.
        planes = [x[:, ci, :] for ci in range(Cin)]            # Cin x (N, HW)
        taps1 = [[tap(planes[ci], k) for ci in range(Cin)]
                 for k in range(n_taps)]                       # 9 x Cin

        inv_cnt = 1.0 / float(N * HW)
        mids = []
        for co in range(C_MID):
            acc = jnp.zeros((N, HW), jnp.float32)
            for k in range(n_taps):
                for ci in range(Cin):
                    w = w1_ref[(co * Cin + ci) * n_taps + k]
                    acc = acc + taps1[k][ci] * w
            # conv1 bias intentionally omitted: BN mean-subtraction cancels it.
            s1 = jnp.sum(acc)                        # fused one-pass statistics
            s2 = jnp.sum(acc * acc)
            mu = s1 * inv_cnt
            var = s2 * inv_cnt - mu * mu             # biased (training-mode) var
            scale = lax.rsqrt(var + EPS) * g_ref[co]
            mids.append((acc - mu) * scale + be_ref[co])

        # ---- Conv2d(3 -> 1, 3x3, pad=1) + sigmoid ----------------------------
        out = jnp.zeros((N, HW), jnp.float32)
        for cm in range(C_MID):
            for k in range(n_taps):
                out = out + tap(mids[cm], k) * w2_ref[cm * n_taps + k]
        out = out + b2_ref[0]
        o_ref[...] = jax.nn.sigmoid(out)

    return kernel


def attention_gate(x_nchw, params):
    """Forward of Attention_Gate with former_map=None. Input/output NCHW."""
    # TODO(synk): the `former_map is not None` branch constructs a *fresh,
    # randomly initialized* nn.Conv2d inside forward(); that has no clean
    # deterministic equivalent, so only the former_map=None path is implemented.
    w1, b1, gamma, beta, w2, b2 = params
    del b1   # conv1 bias is exactly cancelled by BatchNorm's mean subtraction
    N, Cin, H, W = x_nchw.shape
    HW = H * W

    # Free (metadata-only) reshape: NCHW -> (N, Cin, H*W).  No jnp.pad and no
    # transpose, so no extra HBM round-trip before the kernel reads x.
    x_flat = x_nchw.reshape(N, Cin, HW)

    smem = pl.BlockSpec(memory_space=pltpu.MemorySpace.SMEM)
    out_flat = pl.pallas_call(
        _make_kernel(N, Cin, H, W),
        out_shape=jax.ShapeDtypeStruct((N, HW), jnp.float32),
        grid=(1,),
        in_specs=[
            pl.BlockSpec((N, Cin, HW), lambda i: (0, 0, 0)),
            smem, smem, smem, smem, smem,
        ],
        out_specs=pl.BlockSpec((N, HW), lambda i: (0, 0)),
        compiler_params=pltpu.CompilerParams(
            dimension_semantics=("arbitrary",)),
    )(x_flat, w1.reshape(-1), gamma, beta, w2.reshape(-1), b2)
    return out_flat.reshape(N, 1, H, W)


def init_params(key, in_channel):
    """Deterministic PyTorch-style (uniform +-1/sqrt(fan_in)) init."""
    k1, k2, k3, k4 = jax.random.split(key, 4)
    bnd1 = 1.0 / float(in_channel * KH * KW) ** 0.5
    w1 = jax.random.uniform(k1, (C_MID, in_channel, KH, KW), jnp.float32, -bnd1, bnd1)
    b1 = jax.random.uniform(k2, (C_MID,), jnp.float32, -bnd1, bnd1)
    gamma = jnp.ones((C_MID,), jnp.float32)
    beta = jnp.zeros((C_MID,), jnp.float32)
    bnd2 = 1.0 / float(C_MID * KH * KW) ** 0.5
    w2 = jax.random.uniform(k3, (1, C_MID, KH, KW), jnp.float32, -bnd2, bnd2)
    b2 = jax.random.uniform(k4, (1,), jnp.float32, -bnd2, bnd2)
    return (w1, b1, gamma, beta, w2, b2)


def reference(x, params):
    """Pure-JAX reference of the same forward pass (NCHW), incl. conv1 bias."""
    w1, b1, gamma, beta, w2, b2 = params
    dn = ('NCHW', 'OIHW', 'NCHW')
    y = lax.conv_general_dilated(x, w1, (1, 1), 'SAME', dimension_numbers=dn)
    y = y + b1.reshape(1, -1, 1, 1)
    mu = jnp.mean(y, axis=(0, 2, 3), keepdims=True)
    var = jnp.mean((y - mu) ** 2, axis=(0, 2, 3), keepdims=True)
    y = (y - mu) * lax.rsqrt(var + EPS) * gamma.reshape(1, -1, 1, 1) \
        + beta.reshape(1, -1, 1, 1)
    z = lax.conv_general_dilated(y, w2, (1, 1), 'SAME', dimension_numbers=dn)
    z = z + b2.reshape(1, -1, 1, 1)
    return jax.nn.sigmoid(z)


if __name__ == "__main__":
    key = jax.random.PRNGKey(0)
    kx, kp = jax.random.split(key)
    x = jax.random.normal(kx, (2, 4, 16, 16), jnp.float32)     # (N, Cin, H, W)
    params = init_params(kp, in_channel=4)

    out = attention_gate(x, params)
    jax.block_until_ready(out)

    ref = reference(x, params)
    assert out.shape == (2, 1, 16, 16), out.shape
    err = float(jnp.max(jnp.abs(out - ref)))
    assert jnp.allclose(out, ref, atol=1e-4, rtol=1e-4), f"max abs err {err}"
    print("KERNEL_OK")
</pallas_src>

<mosaic_0001>
module attributes {stable_mosaic.version = 11 : i64} {
  func.func @kernel(%arg0: i32, %arg1: memref<2x4x256xf32, #tpu.memory_space<vmem>>, %arg2: memref<108xf32, #tpu.memory_space<smem>>, %arg3: memref<3xf32, #tpu.memory_space<smem>>, %arg4: memref<3xf32, #tpu.memory_space<smem>>, %arg5: memref<27xf32, #tpu.memory_space<smem>>, %arg6: memref<1xf32, #tpu.memory_space<smem>>, %arg7: memref<2x256xf32, #tpu.memory_space<vmem>>) attributes {dimension_semantics = [#tpu.dimension_semantics<arbitrary>], iteration_bounds = array<i64: 1>, scalar_prefetch = 0 : i64, scratch_operands = 0 : i64, tpu.core_type = #tpu.core_type<tc>, window_params = [{pipeline_mode = #tpu.pipeline_mode<synchronous>, transform_indices = @transform_0, window_bounds = array<i64: 2, 4, 256>}, {transform_indices = @transform_1, window_bounds = array<i64: 108>}, {transform_indices = @transform_2, window_bounds = array<i64: 3>}, {transform_indices = @transform_3, window_bounds = array<i64: 3>}, {transform_indices = @transform_4, window_bounds = array<i64: 27>}, {transform_indices = @transform_5, window_bounds = array<i64: 1>}, {pipeline_mode = #tpu.pipeline_mode<synchronous>, transform_indices = @transform_6, window_bounds = array<i64: 2, 256>}]} {
    %c0 = arith.constant 0 : index
    %c0_0 = arith.constant 0 : index
    %c0_1 = arith.constant 0 : index
    %0 = vector.load %arg1[%c0, %c0_0, %c0_1] : memref<2x4x256xf32, #tpu.memory_space<vmem>>, vector<2x4x256xf32>
    %1 = tpu.iota {dimensions = array<i32: 1>} : vector<2x256xi32>
    %c15_i32 = arith.constant 15 : i32
    %2 = vector.broadcast %c15_i32 : i32 to vector<2x256xi32>
    %3 = arith.andi %1, %2 : vector<2x256xi32>
    %c16_i32 = arith.constant 16 : i32
    %4 = vector.broadcast %c16_i32 : i32 to vector<2x256xi32>
    %5 = arith.cmpi sge, %1, %4 : vector<2x256xi32>
    %c240_i32 = arith.constant 240 : i32
    %6 = vector.broadcast %c240_i32 : i32 to vector<2x256xi32>
    %7 = arith.cmpi slt, %1, %6 : vector<2x256xi32>
    %c1_i32 = arith.constant 1 : i32
    %8 = vector.broadcast %c1_i32 : i32 to vector<2x256xi32>
    %9 = arith.cmpi sge, %3, %8 : vector<2x256xi32>
    %c14_i32 = arith.constant 14 : i32
    %10 = vector.broadcast %c14_i32 : i32 to vector<2x256xi32>
    %11 = arith.cmpi sle, %3, %10 : vector<2x256xi32>
    %12 = arith.andi %5, %9 : vector<2x256xi1>
    %13 = arith.andi %5, %11 : vector<2x256xi1>
    %14 = arith.andi %7, %9 : vector<2x256xi1>
    %15 = arith.andi %7, %11 : vector<2x256xi1>
    %16 = vector.extract_strided_slice %0 {offsets = [0, 0, 0], sizes = [2, 1, 256], strides = [1, 1, 1]} : vector<2x4x256xf32> to vector<2x1x256xf32>
    %17 = vector.shape_cast %16 : vector<2x1x256xf32> to vector<2x256xf32>
    %18 = vector.extract_strided_slice %0 {offsets = [0, 1, 0], sizes = [2, 1, 256], strides = [1, 1, 1]} : vector<2x4x256xf32> to vector<2x1x256xf32>
    %19 = vector.shape_cast %18 : vector<2x1x256xf32> to vector<2x256xf32>
    %20 = vector.extract_strided_slice %0 {offsets = [0, 2, 0], sizes = [2, 1, 256], strides = [1, 1, 1]} : vector<2x4x256xf32> to vector<2x1x256xf32>
    %21 = vector.shape_cast %20 : vector<2x1x256xf32> to vector<2x256xf32>
    %22 = vector.extract_strided_slice %0 {offsets = [0, 3, 0], sizes = [2, 1, 256], strides = [1, 1, 1]} : vector<2x4x256xf32> to vector<2x1x256xf32>
    %23 = vector.shape_cast %22 : vector<2x1x256xf32> to vector<2x256xf32>
    %c17_i32 = arith.constant 17 : i32
    %24 = tpu.dynamic_rotate %17 by %c17_i32 dim 1 : vector<2x256xf32>, i32 -> vector<2x256xf32>
    %cst = arith.constant 0.000000e+00 : f32
    %25 = vector.broadcast %cst : f32 to vector<2x256xf32>
    %26 = arith.select %12, %24, %25 : vector<2x256xi1>, vector<2x256xf32>
    %c17_i32_2 = arith.constant 17 : i32
    %27 = tpu.dynamic_rotate %19 by %c17_i32_2 dim 1 : vector<2x256xf32>, i32 -> vector<2x256xf32>
    %cst_3 = arith.constant 0.000000e+00 : f32
    %28 = vector.broadcast %cst_3 : f32 to vector<2x256xf32>
    %29 = arith.select %12, %27, %28 : vector<2x256xi1>, vector<2x256xf32>
    %c17_i32_4 = arith.constant 17 : i32
    %30 = tpu.dynamic_rotate %21 by %c17_i32_4 dim 1 : vector<2x256xf32>, i32 -> vector<2x256xf32>
    %cst_5 = arith.constant 0.000000e+00 : f32
    %31 = vector.broadcast %cst_5 : f32 to vector<2x256xf32>
    %32 = arith.select %12, %30, %31 : vector<2x256xi1>, vector<2x256xf32>
    %c17_i32_6 = arith.constant 17 : i32
    %33 = tpu.dynamic_rotate %23 by %c17_i32_6 dim 1 : vector<2x256xf32>, i32 -> vector<2x256xf32>
    %cst_7 = arith.constant 0.000000e+00 : f32
    %34 = vector.broadcast %cst_7 : f32 to vector<2x256xf32>
    %35 = arith.select %12, %33, %34 : vector<2x256xi1>, vector<2x256xf32>
    %c16_i32_8 = arith.constant 16 : i32
    %36 = tpu.dynamic_rotate %17 by %c16_i32_8 dim 1 : vector<2x256xf32>, i32 -> vector<2x256xf32>
    %cst_9 = arith.constant 0.000000e+00 : f32
    %37 = vector.broadcast %cst_9 : f32 to vector<2x256xf32>
    %38 = arith.select %5, %36, %37 : vector<2x256xi1>, vector<2x256xf32>
    %c16_i32_10 = arith.constant 16 : i32
    %39 = tpu.dynamic_rotate %19 by %c16_i32_10 dim 1 : vector<2x256xf32>, i32 -> vector<2x256xf32>
    %cst_11 = arith.constant 0.000000e+00 : f32
    %40 = vector.broadcast %cst_11 : f32 to vector<2x256xf32>
    %41 = arith.select %5, %39, %40 : vector<2x256xi1>, vector<2x256xf32>
    %c16_i32_12 = arith.constant 16 : i32
    %42 = tpu.dynamic_rotate %21 by %c16_i32_12 dim 1 : vector<2x256xf32>, i32 -> vector<2x256xf32>
    %cst_13 = arith.constant 0.000000e+00 : f32
    %43 = vector.broadcast %cst_13 : f32 to vector<2x256xf32>
    %44 = arith.select %5, %42, %43 : vector<2x256xi1>, vector<2x256xf32>
    %c16_i32_14 = arith.constant 16 : i32
    %45 = tpu.dynamic_rotate %23 by %c16_i32_14 dim 1 : vector<2x256xf32>, i32 -> vector<2x256xf32>
    %cst_15 = arith.constant 0.000000e+00 : f32
    %46 = vector.broadcast %cst_15 : f32 to vector<2x256xf32>
    %47 = arith.select %5, %45, %46 : vector<2x256xi1>, vector<2x256xf32>
    %c15_i32_16 = arith.constant 15 : i32
    %48 = tpu.dynamic_rotate %17 by %c15_i32_16 dim 1 : vector<2x256xf32>, i32 -> vector<2x256xf32>
    %cst_17 = arith.constant 0.000000e+00 : f32
    %49 = vector.broadcast %cst_17 : f32 to vector<2x256xf32>
    %50 = arith.select %13, %48, %49 : vector<2x256xi1>, vector<2x256xf32>
    %c15_i32_18 = arith.constant 15 : i32
    %51 = tpu.dynamic_rotate %19 by %c15_i32_18 dim 1 : vector<2x256xf32>, i32 -> vector<2x256xf32>
    %cst_19 = arith.constant 0.000000e+00 : f32
    %52 = vector.broadcast %cst_19 : f32 to vector<2x256xf32>
    %53 = arith.select %13, %51, %52 : vector<2x256xi1>, vector<2x256xf32>
    %c15_i32_20 = arith.constant 15 : i32
    %54 = tpu.dynamic_rotate %21 by %c15_i32_20 dim 1 : vector<2x256xf32>, i32 -> vector<2x256xf32>
    %cst_21 = arith.constant 0.000000e+00 : f32
    %55 = vector.broadcast %cst_21 : f32 to vector<2x256xf32>
    %56 = arith.select %13, %54, %55 : vector<2x256xi1>, vector<2x256xf32>
    %c15_i32_22 = arith.constant 15 : i32
    %57 = tpu.dynamic_rotate %23 by %c15_i32_22 dim 1 : vector<2x256xf32>, i32 -> vector<2x256xf32>
    %cst_23 = arith.constant 0.000000e+00 : f32
    %58 = vector.broadcast %cst_23 : f32 to vector<2x256xf32>
    %59 = arith.select %13, %57, %58 : vector<2x256xi1>, vector<2x256xf32>
    %c1_i32_24 = arith.constant 1 : i32
    %60 = tpu.dynamic_rotate %17 by %c1_i32_24 dim 1 : vector<2x256xf32>, i32 -> vector<2x256xf32>
    %cst_25 = arith.constant 0.000000e+00 : f32
    %61 = vector.broadcast %cst_25 : f32 to vector<2x256xf32>
    %62 = arith.select %9, %60, %61 : vector<2x256xi1>, vector<2x256xf32>
    %c1_i32_26 = arith.constant 1 : i32
    %63 = tpu.dynamic_rotate %19 by %c1_i32_26 dim 1 : vector<2x256xf32>, i32 -> vector<2x256xf32>
    %cst_27 = arith.constant 0.000000e+00 : f32
    %64 = vector.broadcast %cst_27 : f32 to vector<2x256xf32>
    %65 = arith.select %9, %63, %64 : vector<2x256xi1>, vector<2x256xf32>
    %c1_i32_28 = arith.constant 1 : i32
    %66 = tpu.dynamic_rotate %21 by %c1_i32_28 dim 1 : vector<2x256xf32>, i32 -> vector<2x256xf32>
    %cst_29 = arith.constant 0.000000e+00 : f32
    %67 = vector.broadcast %cst_29 : f32 to vector<2x256xf32>
    %68 = arith.select %9, %66, %67 : vector<2x256xi1>, vector<2x256xf32>
    %c1_i32_30 = arith.constant 1 : i32
    %69 = tpu.dynamic_rotate %23 by %c1_i32_30 dim 1 : vector<2x256xf32>, i32 -> vector<2x256xf32>
    %cst_31 = arith.constant 0.000000e+00 : f32
    %70 = vector.broadcast %cst_31 : f32 to vector<2x256xf32>
    %71 = arith.select %9, %69, %70 : vector<2x256xi1>, vector<2x256xf32>
    %c255_i32 = arith.constant 255 : i32
    %72 = tpu.dynamic_rotate %17 by %c255_i32 dim 1 : vector<2x256xf32>, i32 -> vector<2x256xf32>
    %cst_32 = arith.constant 0.000000e+00 : f32
    %73 = vector.broadcast %cst_32 : f32 to vector<2x256xf32>
    %74 = arith.select %11, %72, %73 : vector<2x256xi1>, vector<2x256xf32>
    %c255_i32_33 = arith.constant 255 : i32
    %75 = tpu.dynamic_rotate %19 by %c255_i32_33 dim 1 : vector<2x256xf32>, i32 -> vector<2x256xf32>
    %cst_34 = arith.constant 0.000000e+00 : f32
    %76 = vector.broadcast %cst_34 : f32 to vector<2x256xf32>
    %77 = arith.select %11, %75, %76 : vector<2x256xi1>, vector<2x256xf32>
    %c255_i32_35 = arith.constant 255 : i32
    %78 = tpu.dynamic_rotate %21 by %c255_i32_35 dim 1 : vector<2x256xf32>, i32 -> vector<2x256xf32>
    %cst_36 = arith.constant 0.000000e+00 : f32
    %79 = vector.broadcast %cst_36 : f32 to vector<2x256xf32>
    %80 = arith.select %11, %78, %79 : vector<2x256xi1>, vector<2x256xf32>
    %c255_i32_37 = arith.constant 255 : i32
    %81 = tpu.dynamic_rotate %23 by %c255_i32_37 dim 1 : vector<2x256xf32>, i32 -> vector<2x256xf32>
    %cst_38 = arith.constant 0.000000e+00 : f32
    %82 = vector.broadcast %cst_38 : f32 to vector<2x256xf32>
    %83 = arith.select %11, %81, %82 : vector<2x256xi1>, vector<2x256xf32>
    %c241_i32 = arith.constant 241 : i32
    %84 = tpu.dynamic_rotate %17 by %c241_i32 dim 1 : vector<2x256xf32>, i32 -> vector<2x256xf32>
    %cst_39 = arith.constant 0.000000e+00 : f32
    %85 = vector.broadcast %cst_39 : f32 to vector<2x256xf32>
    %86 = arith.select %14, %84, %85 : vector<2x256xi1>, vector<2x256xf32>
    %c241_i32_40 = arith.constant 241 : i32
    %87 = tpu.dynamic_rotate %19 by %c241_i32_40 dim 1 : vector<2x256xf32>, i32 -> vector<2x256xf32>
    %cst_41 = arith.constant 0.000000e+00 : f32
    %88 = vector.broadcast %cst_41 : f32 to vector<2x256xf32>
    %89 = arith.select %14, %87, %88 : vector<2x256xi1>, vector<2x256xf32>
    %c241_i32_42 = arith.constant 241 : i32
    %90 = tpu.dynamic_rotate %21 by %c241_i32_42 dim 1 : vector<2x256xf32>, i32 -> vector<2x256xf32>
    %cst_43 = arith.constant 0.000000e+00 : f32
    %91 = vector.broadcast %cst_43 : f32 to vector<2x256xf32>
    %92 = arith.select %14, %90, %91 : vector<2x256xi1>, vector<2x256xf32>
    %c241_i32_44 = arith.constant 241 : i32
    %93 = tpu.dynamic_rotate %23 by %c241_i32_44 dim 1 : vector<2x256xf32>, i32 -> vector<2x256xf32>
    %cst_45 = arith.constant 0.000000e+00 : f32
    %94 = vector.broadcast %cst_45 : f32 to vector<2x256xf32>
    %95 = arith.select %14, %93, %94 : vector<2x256xi1>, vector<2x256xf32>
    %c240_i32_46 = arith.constant 240 : i32
    %96 = tpu.dynamic_rotate %17 by %c240_i32_46 dim 1 : vector<2x256xf32>, i32 -> vector<2x256xf32>
    %cst_47 = arith.constant 0.000000e+00 : f32
    %97 = vector.broadcast %cst_47 : f32 to vector<2x256xf32>
    %98 = arith.select %7, %96, %97 : vector<2x256xi1>, vector<2x256xf32>
    %c240_i32_48 = arith.constant 240 : i32
    %99 = tpu.dynamic_rotate %19 by %c240_i32_48 dim 1 : vector<2x256xf32>, i32 -> vector<2x256xf32>
    %cst_49 = arith.constant 0.000000e+00 : f32
    %100 = vector.broadcast %cst_49 : f32 to vector<2x256xf32>
    %101 = arith.select %7, %99, %100 : vector<2x256xi1>, vector<2x256xf32>
    %c240_i32_50 = arith.constant 240 : i32
    %102 = tpu.dynamic_rotate %21 by %c240_i32_50 dim 1 : vector<2x256xf32>, i32 -> vector<2x256xf32>
    %cst_51 = arith.constant 0.000000e+00 : f32
    %103 = vector.broadcast %cst_51 : f32 to vector<2x256xf32>
    %104 = arith.select %7, %102, %103 : vector<2x256xi1>, vector<2x256xf32>
    %c240_i32_52 = arith.constant 240 : i32
    %105 = tpu.dynamic_rotate %23 by %c240_i32_52 dim 1 : vector<2x256xf32>, i32 -> vector<2x256xf32>
    %cst_53 = arith.constant 0.000000e+00 : f32
    %106 = vector.broadcast %cst_53 : f32 to vector<2x256xf32>
    %107 = arith.select %7, %105, %106 : vector<2x256xi1>, vector<2x256xf32>
    %c239_i32 = arith.constant 239 : i32
    %108 = tpu.dynamic_rotate %17 by %c239_i32 dim 1 : vector<2x256xf32>, i32 -> vector<2x256xf32>
    %cst_54 = arith.constant 0.000000e+00 : f32
    %109 = vector.broadcast %cst_54 : f32 to vector<2x256xf32>
    %110 = arith.select %15, %108, %109 : vector<2x256xi1>, vector<2x256xf32>
    %c239_i32_55 = arith.constant 239 : i32
    %111 = tpu.dynamic_rotate %19 by %c239_i32_55 dim 1 : vector<2x256xf32>, i32 -> vector<2x256xf32>
    %cst_56 = arith.constant 0.000000e+00 : f32
    %112 = vector.broadcast %cst_56 : f32 to vector<2x256xf32>
    %113 = arith.select %15, %111, %112 : vector<2x256xi1>, vector<2x256xf32>
    %c239_i32_57 = arith.constant 239 : i32
    %114 = tpu.dynamic_rotate %21 by %c239_i32_57 dim 1 : vector<2x256xf32>, i32 -> vector<2x256xf32>
    %cst_58 = arith.constant 0.000000e+00 : f32
    %115 = vector.broadcast %cst_58 : f32 to vector<2x256xf32>
    %116 = arith.select %15, %114, %115 : vector<2x256xi1>, vector<2x256xf32>
    %c239_i32_59 = arith.constant 239 : i32
    %117 = tpu.dynamic_rotate %23 by %c239_i32_59 dim 1 : vector<2x256xf32>, i32 -> vector<2x256xf32>
    %cst_60 = arith.constant 0.000000e+00 : f32
    %118 = vector.broadcast %cst_60 : f32 to vector<2x256xf32>
    %119 = arith.select %15, %117, %118 : vector<2x256xi1>, vector<2x256xf32>
    %cst_61 = arith.constant 0.000000e+00 : f32
    %120 = vector.broadcast %cst_61 : f32 to vector<2x256xf32>
    %c0_62 = arith.constant 0 : index
    %121 = memref.load %arg2[%c0_62] : memref<108xf32, #tpu.memory_space<smem>>
    %122 = vector.broadcast %121 : f32 to vector<2x256xf32>
    %123 = arith.mulf %26, %122 : vector<2x256xf32>
    %124 = arith.addf %120, %123 : vector<2x256xf32>
    %c9 = arith.constant 9 : index
    %125 = memref.load %arg2[%c9] : memref<108xf32, #tpu.memory_space<smem>>
    %126 = vector.broadcast %125 : f32 to vector<2x256xf32>
    %127 = arith.mulf %29, %126 : vector<2x256xf32>
    %128 = arith.addf %124, %127 : vector<2x256xf32>
    %c18 = arith.constant 18 : index
    %129 = memref.load %arg2[%c18] : memref<108xf32, #tpu.memory_space<smem>>
    %130 = vector.broadcast %129 : f32 to vector<2x256xf32>
    %131 = arith.mulf %32, %130 : vector<2x256xf32>
    %132 = arith.addf %128, %131 : vector<2x256xf32>
    %c27 = arith.constant 27 : index
    %133 = memref.load %arg2[%c27] : memref<108xf32, #tpu.memory_space<smem>>
    %134 = vector.broadcast %133 : f32 to vector<2x256xf32>
    %135 = arith.mulf %35, %134 : vector<2x256xf32>
    %136 = arith.addf %132, %135 : vector<2x256xf32>
    %c1 = arith.constant 1 : index
    %137 = memref.load %arg2[%c1] : memref<108xf32, #tpu.memory_space<smem>>
    %138 = vector.broadcast %137 : f32 to vector<2x256xf32>
    %139 = arith.mulf %38, %138 : vector<2x256xf32>
    %140 = arith.addf %136, %139 : vector<2x256xf32>
    %c10 = arith.constant 10 : index
    %141 = memref.load %arg2[%c10] : memref<108xf32, #tpu.memory_space<smem>>
    %142 = vector.broadcast %141 : f32 to vector<2x256xf32>
    %143 = arith.mulf %41, %142 : vector<2x256xf32>
    %144 = arith.addf %140, %143 : vector<2x256xf32>
    %c19 = arith.constant 19 : index
    %145 = memref.load %arg2[%c19] : memref<108xf32, #tpu.memory_space<smem>>
    %146 = vector.broadcast %145 : f32 to vector<2x256xf32>
    %147 = arith.mulf %44, %146 : vector<2x256xf32>
    %148 = arith.addf %144, %147 : vector<2x256xf32>
    %c28 = arith.constant 28 : index
    %149 = memref.load %arg2[%c28] : memref<108xf32, #tpu.memory_space<smem>>
    %150 = vector.broadcast %149 : f32 to vector<2x256xf32>
    %151 = arith.mulf %47, %150 : vector<2x256xf32>
    %152 = arith.addf %148, %151 : vector<2x256xf32>
    %c2 = arith.constant 2 : index
    %153 = memref.load %arg2[%c2] : memref<108xf32, #tpu.memory_space<smem>>
    %154 = vector.broadcast %153 : f32 to vector<2x256xf32>
    %155 = arith.mulf %50, %154 : vector<2x256xf32>
    %156 = arith.addf %152, %155 : vector<2x256xf32>
    %c11 = arith.constant 11 : index
    %157 = memref.load %arg2[%c11] : memref<108xf32, #tpu.memory_space<smem>>
    %158 = vector.broadcast %157 : f32 to vector<2x256xf32>
    %159 = arith.mulf %53, %158 : vector<2x256xf32>
    %160 = arith.addf %156, %159 : vector<2x256xf32>
    %c20 = arith.constant 20 : index
    %161 = memref.load %arg2[%c20] : memref<108xf32, #tpu.memory_space<smem>>
    %162 = vector.broadcast %161 : f32 to vector<2x256xf32>
    %163 = arith.mulf %56, %162 : vector<2x256xf32>
    %164 = arith.addf %160, %163 : vector<2x256xf32>
    %c29 = arith.constant 29 : index
    %165 = memref.load %arg2[%c29] : memref<108xf32, #tpu.memory_space<smem>>
    %166 = vector.broadcast %165 : f32 to vector<2x256xf32>
    %167 = arith.mulf %59, %166 : vector<2x256xf32>
    %168 = arith.addf %164, %167 : vector<2x256xf32>
    %c3 = arith.constant 3 : index
    %169 = memref.load %arg2[%c3] : memref<108xf32, #tpu.memory_space<smem>>
    %170 = vector.broadcast %169 : f32 to vector<2x256xf32>
    %171 = arith.mulf %62, %170 : vector<2x256xf32>
    %172 = arith.addf %168, %171 : vector<2x256xf32>
    %c12 = arith.constant 12 : index
    %173 = memref.load %arg2[%c12] : memref<108xf32, #tpu.memory_space<smem>>
    %174 = vector.broadcast %173 : f32 to vector<2x256xf32>
    %175 = arith.mulf %65, %174 : vector<2x256xf32>
    %176 = arith.addf %172, %175 : vector<2x256xf32>
    %c21 = arith.constant 21 : index
    %177 = memref.load %arg2[%c21] : memref<108xf32, #tpu.memory_space<smem>>
    %178 = vector.broadcast %177 : f32 to vector<2x256xf32>
    %179 = arith.mulf %68, %178 : vector<2x256xf32>
    %180 = arith.addf %176, %179 : vector<2x256xf32>
    %c30 = arith.constant 30 : index
    %181 = memref.load %arg2[%c30] : memref<108xf32, #tpu.memory_space<smem>>
    %182 = vector.broadcast %181 : f32 to vector<2x256xf32>
    %183 = arith.mulf %71, %182 : vector<2x256xf32>
    %184 = arith.addf %180, %183 : vector<2x256xf32>
    %c4 = arith.constant 4 : index
    %185 = memref.load %arg2[%c4] : memref<108xf32, #tpu.memory_space<smem>>
    %186 = vector.broadcast %185 : f32 to vector<2x256xf32>
    %187 = arith.mulf %17, %186 : vector<2x256xf32>
    %188 = arith.addf %184, %187 : vector<2x256xf32>
    %c13 = arith.constant 13 : index
    %189 = memref.load %arg2[%c13] : memref<108xf32, #tpu.memory_space<smem>>
    %190 = vector.broadcast %189 : f32 to vector<2x256xf32>
    %191 = arith.mulf %19, %190 : vector<2x256xf32>
    %192 = arith.addf %188, %191 : vector<2x256xf32>
    %c22 = arith.constant 22 : index
    %193 = memref.load %arg2[%c22] : memref<108xf32, #tpu.memory_space<smem>>
    %194 = vector.broadcast %193 : f32 to vector<2x256xf32>
    %195 = arith.mulf %21, %194 : vector<2x256xf32>
    %196 = arith.addf %192, %195 : vector<2x256xf32>
    %c31 = arith.constant 31 : index
    %197 = memref.load %arg2[%c31] : memref<108xf32, #tpu.memory_space<smem>>
    %198 = vector.broadcast %197 : f32 to vector<2x256xf32>
    %199 = arith.mulf %23, %198 : vector<2x256xf32>
    %200 = arith.addf %196, %199 : vector<2x256xf32>
    %c5 = arith.constant 5 : index
    %201 = memref.load %arg2[%c5] : memref<108xf32, #tpu.memory_space<smem>>
    %202 = vector.broadcast %201 : f32 to vector<2x256xf32>
    %203 = arith.mulf %74, %202 : vector<2x256xf32>
    %204 = arith.addf %200, %203 : vector<2x256xf32>
    %c14 = arith.constant 14 : index
    %205 = memref.load %arg2[%c14] : memref<108xf32, #tpu.memory_space<smem>>
    %206 = vector.broadcast %205 : f32 to vector<2x256xf32>
    %207 = arith.mulf %77, %206 : vector<2x256xf32>
    %208 = arith.addf %204, %207 : vector<2x256xf32>
    %c23 = arith.constant 23 : index
    %209 = memref.load %arg2[%c23] : memref<108xf32, #tpu.memory_space<smem>>
    %210 = vector.broadcast %209 : f32 to vector<2x256xf32>
    %211 = arith.mulf %80, %210 : vector<2x256xf32>
    %212 = arith.addf %208, %211 : vector<2x256xf32>
    %c32 = arith.constant 32 : index
    %213 = memref.load %arg2[%c32] : memref<108xf32, #tpu.memory_space<smem>>
    %214 = vector.broadcast %213 : f32 to vector<2x256xf32>
    %215 = arith.mulf %83, %214 : vector<2x256xf32>
    %216 = arith.addf %212, %215 : vector<2x256xf32>
    %c6 = arith.constant 6 : index
    %217 = memref.load %arg2[%c6] : memref<108xf32, #tpu.memory_space<smem>>
    %218 = vector.broadcast %217 : f32 to vector<2x256xf32>
    %219 = arith.mulf %86, %218 : vector<2x256xf32>
    %220 = arith.addf %216, %219 : vector<2x256xf32>
    %c15 = arith.constant 15 : index
    %221 = memref.load %arg2[%c15] : memref<108xf32, #tpu.memory_space<smem>>
    %222 = vector.broadcast %221 : f32 to vector<2x256xf32>
    %223 = arith.mulf %89, %222 : vector<2x256xf32>
    %224 = arith.addf %220, %223 : vector<2x256xf32>
    %c24 = arith.constant 24 : index
    %225 = memref.load %arg2[%c24] : memref<108xf32, #tpu.memory_space<smem>>
    %226 = vector.broadcast %225 : f32 to vector<2x256xf32>
    %227 = arith.mulf %92, %226 : vector<2x256xf32>
    %228 = arith.addf %224, %227 : vector<2x256xf32>
    %c33 = arith.constant 33 : index
    %229 = memref.load %arg2[%c33] : memref<108xf32, #tpu.memory_space<smem>>
    %230 = vector.broadcast %229 : f32 to vector<2x256xf32>
    %231 = arith.mulf %95, %230 : vector<2x256xf32>
    %232 = arith.addf %228, %231 : vector<2x256xf32>
    %c7 = arith.constant 7 : index
    %233 = memref.load %arg2[%c7] : memref<108xf32, #tpu.memory_space<smem>>
    %234 = vector.broadcast %233 : f32 to vector<2x256xf32>
    %235 = arith.mulf %98, %234 : vector<2x256xf32>
    %236 = arith.addf %232, %235 : vector<2x256xf32>
    %c16 = arith.constant 16 : index
    %237 = memref.load %arg2[%c16] : memref<108xf32, #tpu.memory_space<smem>>
    %238 = vector.broadcast %237 : f32 to vector<2x256xf32>
    %239 = arith.mulf %101, %238 : vector<2x256xf32>
    %240 = arith.addf %236, %239 : vector<2x256xf32>
    %c25 = arith.constant 25 : index
    %241 = memref.load %arg2[%c25] : memref<108xf32, #tpu.memory_space<smem>>
    %242 = vector.broadcast %241 : f32 to vector<2x256xf32>
    %243 = arith.mulf %104, %242 : vector<2x256xf32>
    %244 = arith.addf %240, %243 : vector<2x256xf32>
    %c34 = arith.constant 34 : index
    %245 = memref.load %arg2[%c34] : memref<108xf32, #tpu.memory_space<smem>>
    %246 = vector.broadcast %245 : f32 to vector<2x256xf32>
    %247 = arith.mulf %107, %246 : vector<2x256xf32>
    %248 = arith.addf %244, %247 : vector<2x256xf32>
    %c8 = arith.constant 8 : index
    %249 = memref.load %arg2[%c8] : memref<108xf32, #tpu.memory_space<smem>>
    %250 = vector.broadcast %249 : f32 to vector<2x256xf32>
    %251 = arith.mulf %110, %250 : vector<2x256xf32>
    %252 = arith.addf %248, %251 : vector<2x256xf32>
    %c17 = arith.constant 17 : index
    %253 = memref.load %arg2[%c17] : memref<108xf32, #tpu.memory_space<smem>>
    %254 = vector.broadcast %253 : f32 to vector<2x256xf32>
    %255 = arith.mulf %113, %254 : vector<2x256xf32>
    %256 = arith.addf %252, %255 : vector<2x256xf32>
    %c26 = arith.constant 26 : index
    %257 = memref.load %arg2[%c26] : memref<108xf32, #tpu.memory_space<smem>>
    %258 = vector.broadcast %257 : f32 to vector<2x256xf32>
    %259 = arith.mulf %116, %258 : vector<2x256xf32>
    %260 = arith.addf %256, %259 : vector<2x256xf32>
    %c35 = arith.constant 35 : index
    %261 = memref.load %arg2[%c35] : memref<108xf32, #tpu.memory_space<smem>>
    %262 = vector.broadcast %261 : f32 to vector<2x256xf32>
    %263 = arith.mulf %119, %262 : vector<2x256xf32>
    %264 = arith.addf %260, %263 : vector<2x256xf32>
    %265 = vector.shape_cast %264 : vector<2x256xf32> to vector<1x2x256xf32>
    %cst_63 = arith.constant dense<0.000000e+00> : vector<1xf32>
    %266 = vector.multi_reduction <add>, %265, %cst_63 [1, 2] : vector<1x2x256xf32> to vector<1xf32>
    %267 = vector.shape_cast %266 : vector<1xf32> to vector<1x1x1xf32>
    %268 = vector.extract %267[0, 0, 0] : f32 from vector<1x1x1xf32>
    %269 = arith.mulf %264, %264 : vector<2x256xf32>
    %270 = vector.shape_cast %269 : vector<2x256xf32> to vector<1x2x256xf32>
    %cst_64 = arith.constant dense<0.000000e+00> : vector<1xf32>
    %271 = vector.multi_reduction <add>, %270, %cst_64 [1, 2] : vector<1x2x256xf32> to vector<1xf32>
    %272 = vector.shape_cast %271 : vector<1xf32> to vector<1x1x1xf32>
    %273 = vector.extract %272[0, 0, 0] : f32 from vector<1x1x1xf32>
    %cst_65 = arith.constant 0.001953125 : f32
    %274 = arith.mulf %268, %cst_65 : f32
    %cst_66 = arith.constant 0.001953125 : f32
    %275 = arith.mulf %273, %cst_66 : f32
    %276 = arith.mulf %274, %274 : f32
    %277 = arith.subf %275, %276 : f32
    %cst_67 = arith.constant 9.99999974E-6 : f32
    %278 = arith.addf %277, %cst_67 : f32
    %279 = math.rsqrt %278 : f32
    %c0_68 = arith.constant 0 : index
    %280 = memref.load %arg3[%c0_68] : memref<3xf32, #tpu.memory_space<smem>>
    %281 = arith.mulf %279, %280 : f32
    %282 = vector.broadcast %274 : f32 to vector<2x256xf32>
    %283 = arith.subf %264, %282 : vector<2x256xf32>
    %284 = vector.broadcast %281 : f32 to vector<2x256xf32>
    %285 = arith.mulf %283, %284 : vector<2x256xf32>
    %c0_69 = arith.constant 0 : index
    %286 = memref.load %arg4[%c0_69] : memref<3xf32, #tpu.memory_space<smem>>
    %287 = vector.broadcast %286 : f32 to vector<2x256xf32>
    %288 = arith.addf %285, %287 : vector<2x256xf32>
    %cst_70 = arith.constant 0.000000e+00 : f32
    %289 = vector.broadcast %cst_70 : f32 to vector<2x256xf32>
    %c36 = arith.constant 36 : index
    %290 = memref.load %arg2[%c36] : memref<108xf32, #tpu.memory_space<smem>>
    %291 = vector.broadcast %290 : f32 to vector<2x256xf32>
    %292 = arith.mulf %26, %291 : vector<2x256xf32>
    %293 = arith.addf %289, %292 : vector<2x256xf32>
    %c45 = arith.constant 45 : index
    %294 = memref.load %arg2[%c45] : memref<108xf32, #tpu.memory_space<smem>>
    %295 = vector.broadcast %294 : f32 to vector<2x256xf32>
    %296 = arith.mulf %29, %295 : vector<2x256xf32>
    %297 = arith.addf %293, %296 : vector<2x256xf32>
    %c54 = arith.constant 54 : index
    %298 = memref.load %arg2[%c54] : memref<108xf32, #tpu.memory_space<smem>>
    %299 = vector.broadcast %298 : f32 to vector<2x256xf32>
    %300 = arith.mulf %32, %299 : vector<2x256xf32>
    %301 = arith.addf %297, %300 : vector<2x256xf32>
    %c63 = arith.constant 63 : index
    %302 = memref.load %arg2[%c63] : memref<108xf32, #tpu.memory_space<smem>>
    %303 = vector.broadcast %302 : f32 to vector<2x256xf32>
    %304 = arith.mulf %35, %303 : vector<2x256xf32>
    %305 = arith.addf %301, %304 : vector<2x256xf32>
    %c37 = arith.constant 37 : index
    %306 = memref.load %arg2[%c37] : memref<108xf32, #tpu.memory_space<smem>>
    %307 = vector.broadcast %306 : f32 to vector<2x256xf32>
    %308 = arith.mulf %38, %307 : vector<2x256xf32>
    %309 = arith.addf %305, %308 : vector<2x256xf32>
    %c46 = arith.constant 46 : index
    %310 = memref.load %arg2[%c46] : memref<108xf32, #tpu.memory_space<smem>>
    %311 = vector.broadcast %310 : f32 to vector<2x256xf32>
    %312 = arith.mulf %41, %311 : vector<2x256xf32>
    %313 = arith.addf %309, %312 : vector<2x256xf32>
    %c55 = arith.constant 55 : index
    %314 = memref.load %arg2[%c55] : memref<108xf32, #tpu.memory_space<smem>>
    %315 = vector.broadcast %314 : f32 to vector<2x256xf32>
    %316 = arith.mulf %44, %315 : vector<2x256xf32>
    %317 = arith.addf %313, %316 : vector<2x256xf32>
    %c64 = arith.constant 64 : index
    %318 = memref.load %arg2[%c64] : memref<108xf32, #tpu.memory_space<smem>>
    %319 = vector.broadcast %318 : f32 to vector<2x256xf32>
    %320 = arith.mulf %47, %319 : vector<2x256xf32>
    %321 = arith.addf %317, %320 : vector<2x256xf32>
    %c38 = arith.constant 38 : index
    %322 = memref.load %arg2[%c38] : memref<108xf32, #tpu.memory_space<smem>>
    %323 = vector.broadcast %322 : f32 to vector<2x256xf32>
    %324 = arith.mulf %50, %323 : vector<2x256xf32>
    %325 = arith.addf %321, %324 : vector<2x256xf32>
    %c47 = arith.constant 47 : index
    %326 = memref.load %arg2[%c47] : memref<108xf32, #tpu.memory_space<smem>>
    %327 = vector.broadcast %326 : f32 to vector<2x256xf32>
    %328 = arith.mulf %53, %327 : vector<2x256xf32>
    %329 = arith.addf %325, %328 : vector<2x256xf32>
    %c56 = arith.constant 56 : index
    %330 = memref.load %arg2[%c56] : memref<108xf32, #tpu.memory_space<smem>>
    %331 = vector.broadcast %330 : f32 to vector<2x256xf32>
    %332 = arith.mulf %56, %331 : vector<2x256xf32>
    %333 = arith.addf %329, %332 : vector<2x256xf32>
    %c65 = arith.constant 65 : index
    %334 = memref.load %arg2[%c65] : memref<108xf32, #tpu.memory_space<smem>>
    %335 = vector.broadcast %334 : f32 to vector<2x256xf32>
    %336 = arith.mulf %59, %335 : vector<2x256xf32>
    %337 = arith.addf %333, %336 : vector<2x256xf32>
    %c39 = arith.constant 39 : index
    %338 = memref.load %arg2[%c39] : memref<108xf32, #tpu.memory_space<smem>>
    %339 = vector.broadcast %338 : f32 to vector<2x256xf32>
    %340 = arith.mulf %62, %339 : vector<2x256xf32>
    %341 = arith.addf %337, %340 : vector<2x256xf32>
    %c48 = arith.constant 48 : index
    %342 = memref.load %arg2[%c48] : memref<108xf32, #tpu.memory_space<smem>>
    %343 = vector.broadcast %342 : f32 to vector<2x256xf32>
    %344 = arith.mulf %65, %343 : vector<2x256xf32>
    %345 = arith.addf %341, %344 : vector<2x256xf32>
    %c57 = arith.constant 57 : index
    %346 = memref.load %arg2[%c57] : memref<108xf32, #tpu.memory_space<smem>>
    %347 = vector.broadcast %346 : f32 to vector<2x256xf32>
    %348 = arith.mulf %68, %347 : vector<2x256xf32>
    %349 = arith.addf %345, %348 : vector<2x256xf32>
    %c66 = arith.constant 66 : index
    %350 = memref.load %arg2[%c66] : memref<108xf32, #tpu.memory_space<smem>>
    %351 = vector.broadcast %350 : f32 to vector<2x256xf32>
    %352 = arith.mulf %71, %351 : vector<2x256xf32>
    %353 = arith.addf %349, %352 : vector<2x256xf32>
    %c40 = arith.constant 40 : index
    %354 = memref.load %arg2[%c40] : memref<108xf32, #tpu.memory_space<smem>>
    %355 = vector.broadcast %354 : f32 to vector<2x256xf32>
    %356 = arith.mulf %17, %355 : vector<2x256xf32>
    %357 = arith.addf %353, %356 : vector<2x256xf32>
    %c49 = arith.constant 49 : index
    %358 = memref.load %arg2[%c49] : memref<108xf32, #tpu.memory_space<smem>>
    %359 = vector.broadcast %358 : f32 to vector<2x256xf32>
    %360 = arith.mulf %19, %359 : vector<2x256xf32>
    %361 = arith.addf %357, %360 : vector<2x256xf32>
    %c58 = arith.constant 58 : index
    %362 = memref.load %arg2[%c58] : memref<108xf32, #tpu.memory_space<smem>>
    %363 = vector.broadcast %362 : f32 to vector<2x256xf32>
    %364 = arith.mulf %21, %363 : vector<2x256xf32>
    %365 = arith.addf %361, %364 : vector<2x256xf32>
    %c67 = arith.constant 67 : index
    %366 = memref.load %arg2[%c67] : memref<108xf32, #tpu.memory_space<smem>>
    %367 = vector.broadcast %366 : f32 to vector<2x256xf32>
    %368 = arith.mulf %23, %367 : vector<2x256xf32>
    %369 = arith.addf %365, %368 : vector<2x256xf32>
    %c41 = arith.constant 41 : index
    %370 = memref.load %arg2[%c41] : memref<108xf32, #tpu.memory_space<smem>>
    %371 = vector.broadcast %370 : f32 to vector<2x256xf32>
    %372 = arith.mulf %74, %371 : vector<2x256xf32>
    %373 = arith.addf %369, %372 : vector<2x256xf32>
    %c50 = arith.constant 50 : index
    %374 = memref.load %arg2[%c50] : memref<108xf32, #tpu.memory_space<smem>>
    %375 = vector.broadcast %374 : f32 to vector<2x256xf32>
    %376 = arith.mulf %77, %375 : vector<2x256xf32>
    %377 = arith.addf %373, %376 : vector<2x256xf32>
    %c59 = arith.constant 59 : index
    %378 = memref.load %arg2[%c59] : memref<108xf32, #tpu.memory_space<smem>>
    %379 = vector.broadcast %378 : f32 to vector<2x256xf32>
    %380 = arith.mulf %80, %379 : vector<2x256xf32>
    %381 = arith.addf %377, %380 : vector<2x256xf32>
    %c68 = arith.constant 68 : index
    %382 = memref.load %arg2[%c68] : memref<108xf32, #tpu.memory_space<smem>>
    %383 = vector.broadcast %382 : f32 to vector<2x256xf32>
    %384 = arith.mulf %83, %383 : vector<2x256xf32>
    %385 = arith.addf %381, %384 : vector<2x256xf32>
    %c42 = arith.constant 42 : index
    %386 = memref.load %arg2[%c42] : memref<108xf32, #tpu.memory_space<smem>>
    %387 = vector.broadcast %386 : f32 to vector<2x256xf32>
    %388 = arith.mulf %86, %387 : vector<2x256xf32>
    %389 = arith.addf %385, %388 : vector<2x256xf32>
    %c51 = arith.constant 51 : index
    %390 = memref.load %arg2[%c51] : memref<108xf32, #tpu.memory_space<smem>>
    %391 = vector.broadcast %390 : f32 to vector<2x256xf32>
    %392 = arith.mulf %89, %391 : vector<2x256xf32>
    %393 = arith.addf %389, %392 : vector<2x256xf32>
    %c60 = arith.constant 60 : index
    %394 = memref.load %arg2[%c60] : memref<108xf32, #tpu.memory_space<smem>>
    %395 = vector.broadcast %394 : f32 to vector<2x256xf32>
    %396 = arith.mulf %92, %395 : vector<2x256xf32>
    %397 = arith.addf %393, %396 : vector<2x256xf32>
    %c69 = arith.constant 69 : index
    %398 = memref.load %arg2[%c69] : memref<108xf32, #tpu.memory_space<smem>>
    %399 = vector.broadcast %398 : f32 to vector<2x256xf32>
    %400 = arith.mulf %95, %399 : vector<2x256xf32>
    %401 = arith.addf %397, %400 : vector<2x256xf32>
    %c43 = arith.constant 43 : index
    %402 = memref.load %arg2[%c43] : memref<108xf32, #tpu.memory_space<smem>>
    %403 = vector.broadcast %402 : f32 to vector<2x256xf32>
    %404 = arith.mulf %98, %403 : vector<2x256xf32>
    %405 = arith.addf %401, %404 : vector<2x256xf32>
    %c52 = arith.constant 52 : index
    %406 = memref.load %arg2[%c52] : memref<108xf32, #tpu.memory_space<smem>>
    %407 = vector.broadcast %406 : f32 to vector<2x256xf32>
    %408 = arith.mulf %101, %407 : vector<2x256xf32>
    %409 = arith.addf %405, %408 : vector<2x256xf32>
    %c61 = arith.constant 61 : index
    %410 = memref.load %arg2[%c61] : memref<108xf32, #tpu.memory_space<smem>>
    %411 = vector.broadcast %410 : f32 to vector<2x256xf32>
    %412 = arith.mulf %104, %411 : vector<2x256xf32>
    %413 = arith.addf %409, %412 : vector<2x256xf32>
    %c70 = arith.constant 70 : index
    %414 = memref.load %arg2[%c70] : memref<108xf32, #tpu.memory_space<smem>>
    %415 = vector.broadcast %414 : f32 to vector<2x256xf32>
    %416 = arith.mulf %107, %415 : vector<2x256xf32>
    %417 = arith.addf %413, %416 : vector<2x256xf32>
    %c44 = arith.constant 44 : index
    %418 = memref.load %arg2[%c44] : memref<108xf32, #tpu.memory_space<smem>>
    %419 = vector.broadcast %418 : f32 to vector<2x256xf32>
    %420 = arith.mulf %110, %419 : vector<2x256xf32>
    %421 = arith.addf %417, %420 : vector<2x256xf32>
    %c53 = arith.constant 53 : index
    %422 = memref.load %arg2[%c53] : memref<108xf32, #tpu.memory_space<smem>>
    %423 = vector.broadcast %422 : f32 to vector<2x256xf32>
    %424 = arith.mulf %113, %423 : vector<2x256xf32>
    %425 = arith.addf %421, %424 : vector<2x256xf32>
    %c62 = arith.constant 62 : index
    %426 = memref.load %arg2[%c62] : memref<108xf32, #tpu.memory_space<smem>>
    %427 = vector.broadcast %426 : f32 to vector<2x256xf32>
    %428 = arith.mulf %116, %427 : vector<2x256xf32>
    %429 = arith.addf %425, %428 : vector<2x256xf32>
    %c71 = arith.constant 71 : index
    %430 = memref.load %arg2[%c71] : memref<108xf32, #tpu.memory_space<smem>>
    %431 = vector.broadcast %430 : f32 to vector<2x256xf32>
    %432 = arith.mulf %119, %431 : vector<2x256xf32>
    %433 = arith.addf %429, %432 : vector<2x256xf32>
    %434 = vector.shape_cast %433 : vector<2x256xf32> to vector<1x2x256xf32>
    %cst_71 = arith.constant dense<0.000000e+00> : vector<1xf32>
    %435 = vector.multi_reduction <add>, %434, %cst_71 [1, 2] : vector<1x2x256xf32> to vector<1xf32>
    %436 = vector.shape_cast %435 : vector<1xf32> to vector<1x1x1xf32>
    %437 = vector.extract %436[0, 0, 0] : f32 from vector<1x1x1xf32>
    %438 = arith.mulf %433, %433 : vector<2x256xf32>
    %439 = vector.shape_cast %438 : vector<2x256xf32> to vector<1x2x256xf32>
    %cst_72 = arith.constant dense<0.000000e+00> : vector<1xf32>
    %440 = vector.multi_reduction <add>, %439, %cst_72 [1, 2] : vector<1x2x256xf32> to vector<1xf32>
    %441 = vector.shape_cast %440 : vector<1xf32> to vector<1x1x1xf32>
    %442 = vector.extract %441[0, 0, 0] : f32 from vector<1x1x1xf32>
    %cst_73 = arith.constant 0.001953125 : f32
    %443 = arith.mulf %437, %cst_73 : f32
    %cst_74 = arith.constant 0.001953125 : f32
    %444 = arith.mulf %442, %cst_74 : f32
    %445 = arith.mulf %443, %443 : f32
    %446 = arith.subf %444, %445 : f32
    %cst_75 = arith.constant 9.99999974E-6 : f32
    %447 = arith.addf %446, %cst_75 : f32
    %448 = math.rsqrt %447 : f32
    %c1_76 = arith.constant 1 : index
    %449 = memref.load %arg3[%c1_76] : memref<3xf32, #tpu.memory_space<smem>>
    %450 = arith.mulf %448, %449 : f32
    %451 = vector.broadcast %443 : f32 to vector<2x256xf32>
    %452 = arith.subf %433, %451 : vector<2x256xf32>
    %453 = vector.broadcast %450 : f32 to vector<2x256xf32>
    %454 = arith.mulf %452, %453 : vector<2x256xf32>
    %c1_77 = arith.constant 1 : index
    %455 = memref.load %arg4[%c1_77] : memref<3xf32, #tpu.memory_space<smem>>
    %456 = vector.broadcast %455 : f32 to vector<2x256xf32>
    %457 = arith.addf %454, %456 : vector<2x256xf32>
    %cst_78 = arith.constant 0.000000e+00 : f32
    %458 = vector.broadcast %cst_78 : f32 to vector<2x256xf32>
    %c72 = arith.constant 72 : index
    %459 = memref.load %arg2[%c72] : memref<108xf32, #tpu.memory_space<smem>>
    %460 = vector.broadcast %459 : f32 to vector<2x256xf32>
    %461 = arith.mulf %26, %460 : vector<2x256xf32>
    %462 = arith.addf %458, %461 : vector<2x256xf32>
    %c81 = arith.constant 81 : index
    %463 = memref.load %arg2[%c81] : memref<108xf32, #tpu.memory_space<smem>>
    %464 = vector.broadcast %463 : f32 to vector<2x256xf32>
    %465 = arith.mulf %29, %464 : vector<2x256xf32>
    %466 = arith.addf %462, %465 : vector<2x256xf32>
    %c90 = arith.constant 90 : index
    %467 = memref.load %arg2[%c90] : memref<108xf32, #tpu.memory_space<smem>>
    %468 = vector.broadcast %467 : f32 to vector<2x256xf32>
    %469 = arith.mulf %32, %468 : vector<2x256xf32>
    %470 = arith.addf %466, %469 : vector<2x256xf32>
    %c99 = arith.constant 99 : index
    %471 = memref.load %arg2[%c99] : memref<108xf32, #tpu.memory_space<smem>>
    %472 = vector.broadcast %471 : f32 to vector<2x256xf32>
    %473 = arith.mulf %35, %472 : vector<2x256xf32>
    %474 = arith.addf %470, %473 : vector<2x256xf32>
    %c73 = arith.constant 73 : index
    %475 = memref.load %arg2[%c73] : memref<108xf32, #tpu.memory_space<smem>>
    %476 = vector.broadcast %475 : f32 to vector<2x256xf32>
    %477 = arith.mulf %38, %476 : vector<2x256xf32>
    %478 = arith.addf %474, %477 : vector<2x256xf32>
    %c82 = arith.constant 82 : index
    %479 = memref.load %arg2[%c82] : memref<108xf32, #tpu.memory_space<smem>>
    %480 = vector.broadcast %479 : f32 to vector<2x256xf32>
    %481 = arith.mulf %41, %480 : vector<2x256xf32>
    %482 = arith.addf %478, %481 : vector<2x256xf32>
    %c91 = arith.constant 91 : index
    %483 = memref.load %arg2[%c91] : memref<108xf32, #tpu.memory_space<smem>>
    %484 = vector.broadcast %483 : f32 to vector<2x256xf32>
    %485 = arith.mulf %44, %484 : vector<2x256xf32>
    %486 = arith.addf %482, %485 : vector<2x256xf32>
    %c100 = arith.constant 100 : index
    %487 = memref.load %arg2[%c100] : memref<108xf32, #tpu.memory_space<smem>>
    %488 = vector.broadcast %487 : f32 to vector<2x256xf32>
    %489 = arith.mulf %47, %488 : vector<2x256xf32>
    %490 = arith.addf %486, %489 : vector<2x256xf32>
    %c74 = arith.constant 74 : index
    %491 = memref.load %arg2[%c74] : memref<108xf32, #tpu.memory_space<smem>>
    %492 = vector.broadcast %491 : f32 to vector<2x256xf32>
    %493 = arith.mulf %50, %492 : vector<2x256xf32>
    %494 = arith.addf %490, %493 : vector<2x256xf32>
    %c83 = arith.constant 83 : index
    %495 = memref.load %arg2[%c83] : memref<108xf32, #tpu.memory_space<smem>>
    %496 = vector.broadcast %495 : f32 to vector<2x256xf32>
    %497 = arith.mulf %53, %496 : vector<2x256xf32>
    %498 = arith.addf %494, %497 : vector<2x256xf32>
    %c92 = arith.constant 92 : index
    %499 = memref.load %arg2[%c92] : memref<108xf32, #tpu.memory_space<smem>>
    %500 = vector.broadcast %499 : f32 to vector<2x256xf32>
    %501 = arith.mulf %56, %500 : vector<2x256xf32>
    %502 = arith.addf %498, %501 : vector<2x256xf32>
    %c101 = arith.constant 101 : index
    %503 = memref.load %arg2[%c101] : memref<108xf32, #tpu.memory_space<smem>>
    %504 = vector.broadcast %503 : f32 to vector<2x256xf32>
    %505 = arith.mulf %59, %504 : vector<2x256xf32>
    %506 = arith.addf %502, %505 : vector<2x256xf32>
    %c75 = arith.constant 75 : index
    %507 = memref.load %arg2[%c75] : memref<108xf32, #tpu.memory_space<smem>>
    %508 = vector.broadcast %507 : f32 to vector<2x256xf32>
    %509 = arith.mulf %62, %508 : vector<2x256xf32>
    %510 = arith.addf %506, %509 : vector<2x256xf32>
    %c84 = arith.constant 84 : index
    %511 = memref.load %arg2[%c84] : memref<108xf32, #tpu.memory_space<smem>>
    %512 = vector.broadcast %511 : f32 to vector<2x256xf32>
    %513 = arith.mulf %65, %512 : vector<2x256xf32>
    %514 = arith.addf %510, %513 : vector<2x256xf32>
    %c93 = arith.constant 93 : index
    %515 = memref.load %arg2[%c93] : memref<108xf32, #tpu.memory_space<smem>>
    %516 = vector.broadcast %515 : f32 to vector<2x256xf32>
    %517 = arith.mulf %68, %516 : vector<2x256xf32>
    %518 = arith.addf %514, %517 : vector<2x256xf32>
    %c102 = arith.constant 102 : index
    %519 = memref.load %arg2[%c102] : memref<108xf32, #tpu.memory_space<smem>>
    %520 = vector.broadcast %519 : f32 to vector<2x256xf32>
    %521 = arith.mulf %71, %520 : vector<2x256xf32>
    %522 = arith.addf %518, %521 : vector<2x256xf32>
    %c76 = arith.constant 76 : index
    %523 = memref.load %arg2[%c76] : memref<108xf32, #tpu.memory_space<smem>>
    %524 = vector.broadcast %523 : f32 to vector<2x256xf32>
    %525 = arith.mulf %17, %524 : vector<2x256xf32>
    %526 = arith.addf %522, %525 : vector<2x256xf32>
    %c85 = arith.constant 85 : index
    %527 = memref.load %arg2[%c85] : memref<108xf32, #tpu.memory_space<smem>>
    %528 = vector.broadcast %527 : f32 to vector<2x256xf32>
    %529 = arith.mulf %19, %528 : vector<2x256xf32>
    %530 = arith.addf %526, %529 : vector<2x256xf32>
    %c94 = arith.constant 94 : index
    %531 = memref.load %arg2[%c94] : memref<108xf32, #tpu.memory_space<smem>>
    %532 = vector.broadcast %531 : f32 to vector<2x256xf32>
    %533 = arith.mulf %21, %532 : vector<2x256xf32>
    %534 = arith.addf %530, %533 : vector<2x256xf32>
    %c103 = arith.constant 103 : index
    %535 = memref.load %arg2[%c103] : memref<108xf32, #tpu.memory_space<smem>>
    %536 = vector.broadcast %535 : f32 to vector<2x256xf32>
    %537 = arith.mulf %23, %536 : vector<2x256xf32>
    %538 = arith.addf %534, %537 : vector<2x256xf32>
    %c77 = arith.constant 77 : index
    %539 = memref.load %arg2[%c77] : memref<108xf32, #tpu.memory_space<smem>>
    %540 = vector.broadcast %539 : f32 to vector<2x256xf32>
    %541 = arith.mulf %74, %540 : vector<2x256xf32>
    %542 = arith.addf %538, %541 : vector<2x256xf32>
    %c86 = arith.constant 86 : index
    %543 = memref.load %arg2[%c86] : memref<108xf32, #tpu.memory_space<smem>>
    %544 = vector.broadcast %543 : f32 to vector<2x256xf32>
    %545 = arith.mulf %77, %544 : vector<2x256xf32>
    %546 = arith.addf %542, %545 : vector<2x256xf32>
    %c95 = arith.constant 95 : index
    %547 = memref.load %arg2[%c95] : memref<108xf32, #tpu.memory_space<smem>>
    %548 = vector.broadcast %547 : f32 to vector<2x256xf32>
    %549 = arith.mulf %80, %548 : vector<2x256xf32>
    %550 = arith.addf %546, %549 : vector<2x256xf32>
    %c104 = arith.constant 104 : index
    %551 = memref.load %arg2[%c104] : memref<108xf32, #tpu.memory_space<smem>>
    %552 = vector.broadcast %551 : f32 to vector<2x256xf32>
    %553 = arith.mulf %83, %552 : vector<2x256xf32>
    %554 = arith.addf %550, %553 : vector<2x256xf32>
    %c78 = arith.constant 78 : index
    %555 = memref.load %arg2[%c78] : memref<108xf32, #tpu.memory_space<smem>>
    %556 = vector.broadcast %555 : f32 to vector<2x256xf32>
    %557 = arith.mulf %86, %556 : vector<2x256xf32>
    %558 = arith.addf %554, %557 : vector<2x256xf32>
    %c87 = arith.constant 87 : index
    %559 = memref.load %arg2[%c87] : memref<108xf32, #tpu.memory_space<smem>>
    %560 = vector.broadcast %559 : f32 to vector<2x256xf32>
    %561 = arith.mulf %89, %560 : vector<2x256xf32>
    %562 = arith.addf %558, %561 : vector<2x256xf32>
    %c96 = arith.constant 96 : index
    %563 = memref.load %arg2[%c96] : memref<108xf32, #tpu.memory_space<smem>>
    %564 = vector.broadcast %563 : f32 to vector<2x256xf32>
    %565 = arith.mulf %92, %564 : vector<2x256xf32>
    %566 = arith.addf %562, %565 : vector<2x256xf32>
    %c105 = arith.constant 105 : index
    %567 = memref.load %arg2[%c105] : memref<108xf32, #tpu.memory_space<smem>>
    %568 = vector.broadcast %567 : f32 to vector<2x256xf32>
    %569 = arith.mulf %95, %568 : vector<2x256xf32>
    %570 = arith.addf %566, %569 : vector<2x256xf32>
    %c79 = arith.constant 79 : index
    %571 = memref.load %arg2[%c79] : memref<108xf32, #tpu.memory_space<smem>>
    %572 = vector.broadcast %571 : f32 to vector<2x256xf32>
    %573 = arith.mulf %98, %572 : vector<2x256xf32>
    %574 = arith.addf %570, %573 : vector<2x256xf32>
    %c88 = arith.constant 88 : index
    %575 = memref.load %arg2[%c88] : memref<108xf32, #tpu.memory_space<smem>>
    %576 = vector.broadcast %575 : f32 to vector<2x256xf32>
    %577 = arith.mulf %101, %576 : vector<2x256xf32>
    %578 = arith.addf %574, %577 : vector<2x256xf32>
    %c97 = arith.constant 97 : index
    %579 = memref.load %arg2[%c97] : memref<108xf32, #tpu.memory_space<smem>>
    %580 = vector.broadcast %579 : f32 to vector<2x256xf32>
    %581 = arith.mulf %104, %580 : vector<2x256xf32>
    %582 = arith.addf %578, %581 : vector<2x256xf32>
    %c106 = arith.constant 106 : index
    %583 = memref.load %arg2[%c106] : memref<108xf32, #tpu.memory_space<smem>>
    %584 = vector.broadcast %583 : f32 to vector<2x256xf32>
    %585 = arith.mulf %107, %584 : vector<2x256xf32>
    %586 = arith.addf %582, %585 : vector<2x256xf32>
    %c80 = arith.constant 80 : index
    %587 = memref.load %arg2[%c80] : memref<108xf32, #tpu.memory_space<smem>>
    %588 = vector.broadcast %587 : f32 to vector<2x256xf32>
    %589 = arith.mulf %110, %588 : vector<2x256xf32>
    %590 = arith.addf %586, %589 : vector<2x256xf32>
    %c89 = arith.constant 89 : index
    %591 = memref.load %arg2[%c89] : memref<108xf32, #tpu.memory_space<smem>>
    %592 = vector.broadcast %591 : f32 to vector<2x256xf32>
    %593 = arith.mulf %113, %592 : vector<2x256xf32>
    %594 = arith.addf %590, %593 : vector<2x256xf32>
    %c98 = arith.constant 98 : index
    %595 = memref.load %arg2[%c98] : memref<108xf32, #tpu.memory_space<smem>>
    %596 = vector.broadcast %595 : f32 to vector<2x256xf32>
    %597 = arith.mulf %116, %596 : vector<2x256xf32>
    %598 = arith.addf %594, %597 : vector<2x256xf32>
    %c107 = arith.constant 107 : index
    %599 = memref.load %arg2[%c107] : memref<108xf32, #tpu.memory_space<smem>>
    %600 = vector.broadcast %599 : f32 to vector<2x256xf32>
    %601 = arith.mulf %119, %600 : vector<2x256xf32>
    %602 = arith.addf %598, %601 : vector<2x256xf32>
    %603 = vector.shape_cast %602 : vector<2x256xf32> to vector<1x2x256xf32>
    %cst_79 = arith.constant dense<0.000000e+00> : vector<1xf32>
    %604 = vector.multi_reduction <add>, %603, %cst_79 [1, 2] : vector<1x2x256xf32> to vector<1xf32>
    %605 = vector.shape_cast %604 : vector<1xf32> to vector<1x1x1xf32>
    %606 = vector.extract %605[0, 0, 0] : f32 from vector<1x1x1xf32>
    %607 = arith.mulf %602, %602 : vector<2x256xf32>
    %608 = vector.shape_cast %607 : vector<2x256xf32> to vector<1x2x256xf32>
    %cst_80 = arith.constant dense<0.000000e+00> : vector<1xf32>
    %609 = vector.multi_reduction <add>, %608, %cst_80 [1, 2] : vector<1x2x256xf32> to vector<1xf32>
    %610 = vector.shape_cast %609 : vector<1xf32> to vector<1x1x1xf32>
    %611 = vector.extract %610[0, 0, 0] : f32 from vector<1x1x1xf32>
    %cst_81 = arith.constant 0.001953125 : f32
    %612 = arith.mulf %606, %cst_81 : f32
    %cst_82 = arith.constant 0.001953125 : f32
    %613 = arith.mulf %611, %cst_82 : f32
    %614 = arith.mulf %612, %612 : f32
    %615 = arith.subf %613, %614 : f32
    %cst_83 = arith.constant 9.99999974E-6 : f32
    %616 = arith.addf %615, %cst_83 : f32
    %617 = math.rsqrt %616 : f32
    %c2_84 = arith.constant 2 : index
    %618 = memref.load %arg3[%c2_84] : memref<3xf32, #tpu.memory_space<smem>>
    %619 = arith.mulf %617, %618 : f32
    %620 = vector.broadcast %612 : f32 to vector<2x256xf32>
    %621 = arith.subf %602, %620 : vector<2x256xf32>
    %622 = vector.broadcast %619 : f32 to vector<2x256xf32>
    %623 = arith.mulf %621, %622 : vector<2x256xf32>
    %c2_85 = arith.constant 2 : index
    %624 = memref.load %arg4[%c2_85] : memref<3xf32, #tpu.memory_space<smem>>
    %625 = vector.broadcast %624 : f32 to vector<2x256xf32>
    %626 = arith.addf %623, %625 : vector<2x256xf32>
    %cst_86 = arith.constant 0.000000e+00 : f32
    %627 = vector.broadcast %cst_86 : f32 to vector<2x256xf32>
    %c17_i32_87 = arith.constant 17 : i32
    %628 = tpu.dynamic_rotate %288 by %c17_i32_87 dim 1 : vector<2x256xf32>, i32 -> vector<2x256xf32>
    %cst_88 = arith.constant 0.000000e+00 : f32
    %629 = vector.broadcast %cst_88 : f32 to vector<2x256xf32>
    %630 = arith.select %12, %628, %629 : vector<2x256xi1>, vector<2x256xf32>
    %c0_89 = arith.constant 0 : index
    %631 = memref.load %arg5[%c0_89] : memref<27xf32, #tpu.memory_space<smem>>
    %632 = vector.broadcast %631 : f32 to vector<2x256xf32>
    %633 = arith.mulf %630, %632 : vector<2x256xf32>
    %634 = arith.addf %627, %633 : vector<2x256xf32>
    %c16_i32_90 = arith.constant 16 : i32
    %635 = tpu.dynamic_rotate %288 by %c16_i32_90 dim 1 : vector<2x256xf32>, i32 -> vector<2x256xf32>
    %cst_91 = arith.constant 0.000000e+00 : f32
    %636 = vector.broadcast %cst_91 : f32 to vector<2x256xf32>
    %637 = arith.select %5, %635, %636 : vector<2x256xi1>, vector<2x256xf32>
    %c1_92 = arith.constant 1 : index
    %638 = memref.load %arg5[%c1_92] : memref<27xf32, #tpu.memory_space<smem>>
    %639 = vector.broadcast %638 : f32 to vector<2x256xf32>
    %640 = arith.mulf %637, %639 : vector<2x256xf32>
    %641 = arith.addf %634, %640 : vector<2x256xf32>
    %c15_i32_93 = arith.constant 15 : i32
    %642 = tpu.dynamic_rotate %288 by %c15_i32_93 dim 1 : vector<2x256xf32>, i32 -> vector<2x256xf32>
    %cst_94 = arith.constant 0.000000e+00 : f32
    %643 = vector.broadcast %cst_94 : f32 to vector<2x256xf32>
    %644 = arith.select %13, %642, %643 : vector<2x256xi1>, vector<2x256xf32>
    %c2_95 = arith.constant 2 : index
    %645 = memref.load %arg5[%c2_95] : memref<27xf32, #tpu.memory_space<smem>>
    %646 = vector.broadcast %645 : f32 to vector<2x256xf32>
    %647 = arith.mulf %644, %646 : vector<2x256xf32>
    %648 = arith.addf %641, %647 : vector<2x256xf32>
    %c1_i32_96 = arith.constant 1 : i32
    %649 = tpu.dynamic_rotate %288 by %c1_i32_96 dim 1 : vector<2x256xf32>, i32 -> vector<2x256xf32>
    %cst_97 = arith.constant 0.000000e+00 : f32
    %650 = vector.broadcast %cst_97 : f32 to vector<2x256xf32>
    %651 = arith.select %9, %649, %650 : vector<2x256xi1>, vector<2x256xf32>
    %c3_98 = arith.constant 3 : index
    %652 = memref.load %arg5[%c3_98] : memref<27xf32, #tpu.memory_space<smem>>
    %653 = vector.broadcast %652 : f32 to vector<2x256xf32>
    %654 = arith.mulf %651, %653 : vector<2x256xf32>
    %655 = arith.addf %648, %654 : vector<2x256xf32>
    %c4_99 = arith.constant 4 : index
    %656 = memref.load %arg5[%c4_99] : memref<27xf32, #tpu.memory_space<smem>>
    %657 = vector.broadcast %656 : f32 to vector<2x256xf32>
    %658 = arith.mulf %288, %657 : vector<2x256xf32>
    %659 = arith.addf %655, %658 : vector<2x256xf32>
    %c255_i32_100 = arith.constant 255 : i32
    %660 = tpu.dynamic_rotate %288 by %c255_i32_100 dim 1 : vector<2x256xf32>, i32 -> vector<2x256xf32>
    %cst_101 = arith.constant 0.000000e+00 : f32
    %661 = vector.broadcast %cst_101 : f32 to vector<2x256xf32>
    %662 = arith.select %11, %660, %661 : vector<2x256xi1>, vector<2x256xf32>
    %c5_102 = arith.constant 5 : index
    %663 = memref.load %arg5[%c5_102] : memref<27xf32, #tpu.memory_space<smem>>
    %664 = vector.broadcast %663 : f32 to vector<2x256xf32>
    %665 = arith.mulf %662, %664 : vector<2x256xf32>
    %666 = arith.addf %659, %665 : vector<2x256xf32>
    %c241_i32_103 = arith.constant 241 : i32
    %667 = tpu.dynamic_rotate %288 by %c241_i32_103 dim 1 : vector<2x256xf32>, i32 -> vector<2x256xf32>
    %cst_104 = arith.constant 0.000000e+00 : f32
    %668 = vector.broadcast %cst_104 : f32 to vector<2x256xf32>
    %669 = arith.select %14, %667, %668 : vector<2x256xi1>, vector<2x256xf32>
    %c6_105 = arith.constant 6 : index
    %670 = memref.load %arg5[%c6_105] : memref<27xf32, #tpu.memory_space<smem>>
    %671 = vector.broadcast %670 : f32 to vector<2x256xf32>
    %672 = arith.mulf %669, %671 : vector<2x256xf32>
    %673 = arith.addf %666, %672 : vector<2x256xf32>
    %c240_i32_106 = arith.constant 240 : i32
    %674 = tpu.dynamic_rotate %288 by %c240_i32_106 dim 1 : vector<2x256xf32>, i32 -> vector<2x256xf32>
    %cst_107 = arith.constant 0.000000e+00 : f32
    %675 = vector.broadcast %cst_107 : f32 to vector<2x256xf32>
    %676 = arith.select %7, %674, %675 : vector<2x256xi1>, vector<2x256xf32>
    %c7_108 = arith.constant 7 : index
    %677 = memref.load %arg5[%c7_108] : memref<27xf32, #tpu.memory_space<smem>>
    %678 = vector.broadcast %677 : f32 to vector<2x256xf32>
    %679 = arith.mulf %676, %678 : vector<2x256xf32>
    %680 = arith.addf %673, %679 : vector<2x256xf32>
    %c239_i32_109 = arith.constant 239 : i32
    %681 = tpu.dynamic_rotate %288 by %c239_i32_109 dim 1 : vector<2x256xf32>, i32 -> vector<2x256xf32>
    %cst_110 = arith.constant 0.000000e+00 : f32
    %682 = vector.broadcast %cst_110 : f32 to vector<2x256xf32>
    %683 = arith.select %15, %681, %682 : vector<2x256xi1>, vector<2x256xf32>
    %c8_111 = arith.constant 8 : index
    %684 = memref.load %arg5[%c8_111] : memref<27xf32, #tpu.memory_space<smem>>
    %685 = vector.broadcast %684 : f32 to vector<2x256xf32>
    %686 = arith.mulf %683, %685 : vector<2x256xf32>
    %687 = arith.addf %680, %686 : vector<2x256xf32>
    %c17_i32_112 = arith.constant 17 : i32
    %688 = tpu.dynamic_rotate %457 by %c17_i32_112 dim 1 : vector<2x256xf32>, i32 -> vector<2x256xf32>
    %cst_113 = arith.constant 0.000000e+00 : f32
    %689 = vector.broadcast %cst_113 : f32 to vector<2x256xf32>
    %690 = arith.select %12, %688, %689 : vector<2x256xi1>, vector<2x256xf32>
    %c9_114 = arith.constant 9 : index
    %691 = memref.load %arg5[%c9_114] : memref<27xf32, #tpu.memory_space<smem>>
    %692 = vector.broadcast %691 : f32 to vector<2x256xf32>
    %693 = arith.mulf %690, %692 : vector<2x256xf32>
    %694 = arith.addf %687, %693 : vector<2x256xf32>
    %c16_i32_115 = arith.constant 16 : i32
    %695 = tpu.dynamic_rotate %457 by %c16_i32_115 dim 1 : vector<2x256xf32>, i32 -> vector<2x256xf32>
    %cst_116 = arith.constant 0.000000e+00 : f32
    %696 = vector.broadcast %cst_116 : f32 to vector<2x256xf32>
    %697 = arith.select %5, %695, %696 : vector<2x256xi1>, vector<2x256xf32>
    %c10_117 = arith.constant 10 : index
    %698 = memref.load %arg5[%c10_117] : memref<27xf32, #tpu.memory_space<smem>>
    %699 = vector.broadcast %698 : f32 to vector<2x256xf32>
    %700 = arith.mulf %697, %699 : vector<2x256xf32>
    %701 = arith.addf %694, %700 : vector<2x256xf32>
    %c15_i32_118 = arith.constant 15 : i32
    %702 = tpu.dynamic_rotate %457 by %c15_i32_118 dim 1 : vector<2x256xf32>, i32 -> vector<2x256xf32>
    %cst_119 = arith.constant 0.000000e+00 : f32
    %703 = vector.broadcast %cst_119 : f32 to vector<2x256xf32>
    %704 = arith.select %13, %702, %703 : vector<2x256xi1>, vector<2x256xf32>
    %c11_120 = arith.constant 11 : index
    %705 = memref.load %arg5[%c11_120] : memref<27xf32, #tpu.memory_space<smem>>
    %706 = vector.broadcast %705 : f32 to vector<2x256xf32>
    %707 = arith.mulf %704, %706 : vector<2x256xf32>
    %708 = arith.addf %701, %707 : vector<2x256xf32>
    %c1_i32_121 = arith.constant 1 : i32
    %709 = tpu.dynamic_rotate %457 by %c1_i32_121 dim 1 : vector<2x256xf32>, i32 -> vector<2x256xf32>
    %cst_122 = arith.constant 0.000000e+00 : f32
    %710 = vector.broadcast %cst_122 : f32 to vector<2x256xf32>
    %711 = arith.select %9, %709, %710 : vector<2x256xi1>, vector<2x256xf32>
    %c12_123 = arith.constant 12 : index
    %712 = memref.load %arg5[%c12_123] : memref<27xf32, #tpu.memory_space<smem>>
    %713 = vector.broadcast %712 : f32 to vector<2x256xf32>
    %714 = arith.mulf %711, %713 : vector<2x256xf32>
    %715 = arith.addf %708, %714 : vector<2x256xf32>
    %c13_124 = arith.constant 13 : index
    %716 = memref.load %arg5[%c13_124] : memref<27xf32, #tpu.memory_space<smem>>
    %717 = vector.broadcast %716 : f32 to vector<2x256xf32>
    %718 = arith.mulf %457, %717 : vector<2x256xf32>
    %719 = arith.addf %715, %718 : vector<2x256xf32>
    %c255_i32_125 = arith.constant 255 : i32
    %720 = tpu.dynamic_rotate %457 by %c255_i32_125 dim 1 : vector<2x256xf32>, i32 -> vector<2x256xf32>
    %cst_126 = arith.constant 0.000000e+00 : f32
    %721 = vector.broadcast %cst_126 : f32 to vector<2x256xf32>
    %722 = arith.select %11, %720, %721 : vector<2x256xi1>, vector<2x256xf32>
    %c14_127 = arith.constant 14 : index
    %723 = memref.load %arg5[%c14_127] : memref<27xf32, #tpu.memory_space<smem>>
    %724 = vector.broadcast %723 : f32 to vector<2x256xf32>
    %725 = arith.mulf %722, %724 : vector<2x256xf32>
    %726 = arith.addf %719, %725 : vector<2x256xf32>
    %c241_i32_128 = arith.constant 241 : i32
    %727 = tpu.dynamic_rotate %457 by %c241_i32_128 dim 1 : vector<2x256xf32>, i32 -> vector<2x256xf32>
    %cst_129 = arith.constant 0.000000e+00 : f32
    %728 = vector.broadcast %cst_129 : f32 to vector<2x256xf32>
    %729 = arith.select %14, %727, %728 : vector<2x256xi1>, vector<2x256xf32>
    %c15_130 = arith.constant 15 : index
    %730 = memref.load %arg5[%c15_130] : memref<27xf32, #tpu.memory_space<smem>>
    %731 = vector.broadcast %730 : f32 to vector<2x256xf32>
    %732 = arith.mulf %729, %731 : vector<2x256xf32>
    %733 = arith.addf %726, %732 : vector<2x256xf32>
    %c240_i32_131 = arith.constant 240 : i32
    %734 = tpu.dynamic_rotate %457 by %c240_i32_131 dim 1 : vector<2x256xf32>, i32 -> vector<2x256xf32>
    %cst_132 = arith.constant 0.000000e+00 : f32
    %735 = vector.broadcast %cst_132 : f32 to vector<2x256xf32>
    %736 = arith.select %7, %734, %735 : vector<2x256xi1>, vector<2x256xf32>
    %c16_133 = arith.constant 16 : index
    %737 = memref.load %arg5[%c16_133] : memref<27xf32, #tpu.memory_space<smem>>
    %738 = vector.broadcast %737 : f32 to vector<2x256xf32>
    %739 = arith.mulf %736, %738 : vector<2x256xf32>
    %740 = arith.addf %733, %739 : vector<2x256xf32>
    %c239_i32_134 = arith.constant 239 : i32
    %741 = tpu.dynamic_rotate %457 by %c239_i32_134 dim 1 : vector<2x256xf32>, i32 -> vector<2x256xf32>
    %cst_135 = arith.constant 0.000000e+00 : f32
    %742 = vector.broadcast %cst_135 : f32 to vector<2x256xf32>
    %743 = arith.select %15, %741, %742 : vector<2x256xi1>, vector<2x256xf32>
    %c17_136 = arith.constant 17 : index
    %744 = memref.load %arg5[%c17_136] : memref<27xf32, #tpu.memory_space<smem>>
    %745 = vector.broadcast %744 : f32 to vector<2x256xf32>
    %746 = arith.mulf %743, %745 : vector<2x256xf32>
    %747 = arith.addf %740, %746 : vector<2x256xf32>
    %c17_i32_137 = arith.constant 17 : i32
    %748 = tpu.dynamic_rotate %626 by %c17_i32_137 dim 1 : vector<2x256xf32>, i32 -> vector<2x256xf32>
    %cst_138 = arith.constant 0.000000e+00 : f32
    %749 = vector.broadcast %cst_138 : f32 to vector<2x256xf32>
    %750 = arith.select %12, %748, %749 : vector<2x256xi1>, vector<2x256xf32>
    %c18_139 = arith.constant 18 : index
    %751 = memref.load %arg5[%c18_139] : memref<27xf32, #tpu.memory_space<smem>>
    %752 = vector.broadcast %751 : f32 to vector<2x256xf32>
    %753 = arith.mulf %750, %752 : vector<2x256xf32>
    %754 = arith.addf %747, %753 : vector<2x256xf32>
    %c16_i32_140 = arith.constant 16 : i32
    %755 = tpu.dynamic_rotate %626 by %c16_i32_140 dim 1 : vector<2x256xf32>, i32 -> vector<2x256xf32>
    %cst_141 = arith.constant 0.000000e+00 : f32
    %756 = vector.broadcast %cst_141 : f32 to vector<2x256xf32>
    %757 = arith.select %5, %755, %756 : vector<2x256xi1>, vector<2x256xf32>
    %c19_142 = arith.constant 19 : index
    %758 = memref.load %arg5[%c19_142] : memref<27xf32, #tpu.memory_space<smem>>
    %759 = vector.broadcast %758 : f32 to vector<2x256xf32>
    %760 = arith.mulf %757, %759 : vector<2x256xf32>
    %761 = arith.addf %754, %760 : vector<2x256xf32>
    %c15_i32_143 = arith.constant 15 : i32
    %762 = tpu.dynamic_rotate %626 by %c15_i32_143 dim 1 : vector<2x256xf32>, i32 -> vector<2x256xf32>
    %cst_144 = arith.constant 0.000000e+00 : f32
    %763 = vector.broadcast %cst_144 : f32 to vector<2x256xf32>
    %764 = arith.select %13, %762, %763 : vector<2x256xi1>, vector<2x256xf32>
    %c20_145 = arith.constant 20 : index
    %765 = memref.load %arg5[%c20_145] : memref<27xf32, #tpu.memory_space<smem>>
    %766 = vector.broadcast %765 : f32 to vector<2x256xf32>
    %767 = arith.mulf %764, %766 : vector<2x256xf32>
    %768 = arith.addf %761, %767 : vector<2x256xf32>
    %c1_i32_146 = arith.constant 1 : i32
    %769 = tpu.dynamic_rotate %626 by %c1_i32_146 dim 1 : vector<2x256xf32>, i32 -> vector<2x256xf32>
    %cst_147 = arith.constant 0.000000e+00 : f32
    %770 = vector.broadcast %cst_147 : f32 to vector<2x256xf32>
    %771 = arith.select %9, %769, %770 : vector<2x256xi1>, vector<2x256xf32>
    %c21_148 = arith.constant 21 : index
    %772 = memref.load %arg5[%c21_148] : memref<27xf32, #tpu.memory_space<smem>>
    %773 = vector.broadcast %772 : f32 to vector<2x256xf32>
    %774 = arith.mulf %771, %773 : vector<2x256xf32>
    %775 = arith.addf %768, %774 : vector<2x256xf32>
    %c22_149 = arith.constant 22 : index
    %776 = memref.load %arg5[%c22_149] : memref<27xf32, #tpu.memory_space<smem>>
    %777 = vector.broadcast %776 : f32 to vector<2x256xf32>
    %778 = arith.mulf %626, %777 : vector<2x256xf32>
    %779 = arith.addf %775, %778 : vector<2x256xf32>
    %c255_i32_150 = arith.constant 255 : i32
    %780 = tpu.dynamic_rotate %626 by %c255_i32_150 dim 1 : vector<2x256xf32>, i32 -> vector<2x256xf32>
    %cst_151 = arith.constant 0.000000e+00 : f32
    %781 = vector.broadcast %cst_151 : f32 to vector<2x256xf32>
    %782 = arith.select %11, %780, %781 : vector<2x256xi1>, vector<2x256xf32>
    %c23_152 = arith.constant 23 : index
    %783 = memref.load %arg5[%c23_152] : memref<27xf32, #tpu.memory_space<smem>>
    %784 = vector.broadcast %783 : f32 to vector<2x256xf32>
    %785 = arith.mulf %782, %784 : vector<2x256xf32>
    %786 = arith.addf %779, %785 : vector<2x256xf32>
    %c241_i32_153 = arith.constant 241 : i32
    %787 = tpu.dynamic_rotate %626 by %c241_i32_153 dim 1 : vector<2x256xf32>, i32 -> vector<2x256xf32>
    %cst_154 = arith.constant 0.000000e+00 : f32
    %788 = vector.broadcast %cst_154 : f32 to vector<2x256xf32>
    %789 = arith.select %14, %787, %788 : vector<2x256xi1>, vector<2x256xf32>
    %c24_155 = arith.constant 24 : index
    %790 = memref.load %arg5[%c24_155] : memref<27xf32, #tpu.memory_space<smem>>
    %791 = vector.broadcast %790 : f32 to vector<2x256xf32>
    %792 = arith.mulf %789, %791 : vector<2x256xf32>
    %793 = arith.addf %786, %792 : vector<2x256xf32>
    %c240_i32_156 = arith.constant 240 : i32
    %794 = tpu.dynamic_rotate %626 by %c240_i32_156 dim 1 : vector<2x256xf32>, i32 -> vector<2x256xf32>
    %cst_157 = arith.constant 0.000000e+00 : f32
    %795 = vector.broadcast %cst_157 : f32 to vector<2x256xf32>
    %796 = arith.select %7, %794, %795 : vector<2x256xi1>, vector<2x256xf32>
    %c25_158 = arith.constant 25 : index
    %797 = memref.load %arg5[%c25_158] : memref<27xf32, #tpu.memory_space<smem>>
    %798 = vector.broadcast %797 : f32 to vector<2x256xf32>
    %799 = arith.mulf %796, %798 : vector<2x256xf32>
    %800 = arith.addf %793, %799 : vector<2x256xf32>
    %c239_i32_159 = arith.constant 239 : i32
    %801 = tpu.dynamic_rotate %626 by %c239_i32_159 dim 1 : vector<2x256xf32>, i32 -> vector<2x256xf32>
    %cst_160 = arith.constant 0.000000e+00 : f32
    %802 = vector.broadcast %cst_160 : f32 to vector<2x256xf32>
    %803 = arith.select %15, %801, %802 : vector<2x256xi1>, vector<2x256xf32>
    %c26_161 = arith.constant 26 : index
    %804 = memref.load %arg5[%c26_161] : memref<27xf32, #tpu.memory_space<smem>>
    %805 = vector.broadcast %804 : f32 to vector<2x256xf32>
    %806 = arith.mulf %803, %805 : vector<2x256xf32>
    %807 = arith.addf %800, %806 : vector<2x256xf32>
    %c0_162 = arith.constant 0 : index
    %808 = memref.load %arg6[%c0_162] : memref<1xf32, #tpu.memory_space<smem>>
    %809 = vector.broadcast %808 : f32 to vector<2x256xf32>
    %810 = arith.addf %807, %809 : vector<2x256xf32>
    %811 = arith.negf %810 : vector<2x256xf32>
    %812 = math.exp %811 : vector<2x256xf32>
    %cst_163 = arith.constant 1.000000e+00 : f32
    %813 = vector.broadcast %cst_163 : f32 to vector<2x256xf32>
    %814 = arith.addf %813, %812 : vector<2x256xf32>
    %815 = arith.divf %813, %814 : vector<2x256xf32>
    %c0_164 = arith.constant 0 : index
    %c0_165 = arith.constant 0 : index
    %816 = vector.load %arg7[%c0_164, %c0_165] : memref<2x256xf32, #tpu.memory_space<vmem>>, vector<2x256xf32>
    tpu.vector_store %arg7[%c0_164, %c0_165], %815 {strides = array<i32>} : memref<2x256xf32, #tpu.memory_space<vmem>>, vector<2x256xf32>,
    return
  }
  func.func @transform_0(%arg0: i32) -> (i32, i32, i32) {
    %c0_i32 = arith.constant 0 : i32
    %c0_i32_0 = arith.constant 0 : i32
    %c0_i32_1 = arith.constant 0 : i32
    %c0_i32_2 = arith.constant 0 : i32
    return %c0_i32, %c0_i32_0, %c0_i32_1 : i32, i32, i32
  }
  func.func @transform_1(%arg0: i32) -> i32 {
    %c0_i32 = arith.constant 0 : i32
    %c0_i32_0 = arith.constant 0 : i32
    return %c0_i32 : i32
  }
  func.func @transform_2(%arg0: i32) -> i32 {
    %c0_i32 = arith.constant 0 : i32
    %c0_i32_0 = arith.constant 0 : i32
    return %c0_i32 : i32
  }
  func.func @transform_3(%arg0: i32) -> i32 {
    %c0_i32 = arith.constant 0 : i32
    %c0_i32_0 = arith.constant 0 : i32
    return %c0_i32 : i32
  }
  func.func @transform_4(%arg0: i32) -> i32 {
    %c0_i32 = arith.constant 0 : i32
    %c0_i32_0 = arith.constant 0 : i32
    return %c0_i32 : i32
  }
  func.func @transform_5(%arg0: i32) -> i32 {
    %c0_i32 = arith.constant 0 : i32
    %c0_i32_0 = arith.constant 0 : i32
    return %c0_i32 : i32
  }
  func.func @transform_6(%arg0: i32) -> (i32, i32) {
    %c0_i32 = arith.constant 0 : i32
    %c0_i32_0 = arith.constant 0 : i32
    %c0_i32_1 = arith.constant 0 : i32
    return %c0_i32, %c0_i32_0 : i32, i32
  }
}

</mosaic_0001>

<bundles_post_ra>
// kernel: tpu_custom_call.1
= control target key start
LH: loop header
LB: loop body
LE: loop exit
PB: predicated region body
PF: predicated region fallthrough
CT: control target
= control target key end

     0   :  { %s4139_s0 = inlined_call_operand.hbm [shape: f32[2,4,256], index: 0, kind: input, shape index: {}]   ;;  %s4140_s1 = inlined_call_operand.vmem [shape: f32[108], index: 1, kind: input, shape index: {}]   ;;  %s4141_s2 = inlined_call_operand.vmem [shape: f32[3], index: 2, kind: input, shape index: {}]   ;;  %s4142_s3 = inlined_call_operand.vmem [shape: f32[3], index: 3, kind: input, shape index: {}]   ;;  %s4143_s4 = inlined_call_operand.vmem [shape: f32[27], index: 4, kind: input, shape index: {}]   ;;  %s4144_s5 = inlined_call_operand.<no memory space> [shape: f32[1], index: 5, kind: input, shape index: {}]   ;;  %s4145_s6 = inlined_call_operand.hbm [shape: f32[2,256], index: 6, kind: output, shape index: {}]  }
   0x1   :  { %4303 = sst [smem:[#allocation91_spill]] %s4144_s5 }
   0x2   :  { %4304 = sst [smem:[#allocation92_spill]] %s4145_s6 }
   0x3   :  { %12 = vsyncpa [#allocation4], 0 }
   0x4   :  { %13 = vsyncpa [#allocation6], 0 }
   0x5   :  { %14 = vsyncpa [#allocation9], 0 }
   0x6   :  { %15 = vsyncpa [#allocation12], 0  ;;  %s45_s23 = sshll.u32 %s4141_s2, 4  ;;  %s46_s23 = int_to_ptr.vmem [resolvable:$true] %s45_s23 }
   0x7   :  { %16 = vsyncpa [#allocation5], 0  ;;  %s2096_s24 = scalar_lea.vmem %s46_s23, 16  ;;  %p2101_p1 = scmp.lt.s32.totalorder %s46_s23, %s46_s23 }
   0x8   :  { %p2097_p0 = scmp.ne.s32.totalorder %s46_s23, %s2096_s24  ;;  %p2102_p2 = scmp.lt.s32.totalorder %s2096_s24, %s2096_s24 }
   0xa   :  { %p2103_p3 = por %p2102_p2, %p2101_p1 }
   0xc   :  { %p2104_p4 = pnand %p2103_p3, %p2097_p0 }
   0xe   :  { %2107 = shalt.err (!%p2104_p4)
}
   0xf   :  { %s2198_s25 = smov [#allocation8]   ;;  %s2199_s26 = smov [#allocation3]  }
  0x10   :  { %48 = dma.vmem_to_smem %s46_s23, 16, %s2198_s25, [#allocation9]  }
  0x11   :  { %s22_s27 = sshll.u32 %s2199_s26, 4  ;;  %s2108_s30 = scalar_lea.hbm %s4139_s0, 256  ;;  %s23_s27 = int_to_ptr.vmem [resolvable:$true] %s22_s27 }
  0x12   :  { %p2109_p5 = scmp.ne.s32.totalorder %s4139_s0, %s2108_s30  ;;  %p2112_p6 = scmp.lt.u32.totalorder %s2108_s30, %s4139_s0 }
  0x14   :  { %p2114_p7 = pnand %p2112_p6, %p2109_p5 }
  0x16   :  { %2117 = shalt.err (!%p2114_p7)
}
  0x17   :  { %s2118_s10 = scalar_lea.vmem %s23_s27, 256  ;;  %p2123_p9 = scmp.lt.s32.totalorder %s23_s27, %s23_s27 }
  0x18   :  { %p2119_p8 = scmp.ne.s32.totalorder %s23_s27, %s2118_s10  ;;  %p2124_p10 = scmp.lt.s32.totalorder %s2118_s10, %s2118_s10 }
  0x1a   :  { %p2125_p11 = por %p2124_p10, %p2123_p9 }
  0x1c   :  { %p2126_p12 = pnand %p2125_p11, %p2119_p8 }
  0x1e   :  { %2129 = shalt.err (!%p2126_p12)
}
  0x1f   :  { %s2200_s11 = smov 128   ;;  %s2201_s12 = smov 8  }
  0x20   :  { %28 = dma.hbm_to_vmem [thread:$0]  %s4139_s0, 256, %s23_s27, [#allocation4], %s2200_s11, %s2200_s11, %s2201_s12  }
  0x21   :  { %s35_s17 = sshll.u32 %s4140_s1, 4  ;;  %s55_s20 = sshll.u32 %s4142_s3, 4  ;;  %s36_s17 = int_to_ptr.vmem [resolvable:$true] %s35_s17  ;;  %s56_s20 = int_to_ptr.vmem [resolvable:$true] %s55_s20 }
  0x22   :  { %s2130_s21 = scalar_lea.vmem %s36_s17, 16  ;;  %p2135_p0 = scmp.lt.s32.totalorder %s36_s17, %s36_s17 }
  0x23   :  { %p2131_p13 = scmp.ne.s32.totalorder %s36_s17, %s2130_s21  ;;  %p2136_p1 = scmp.lt.s32.totalorder %s2130_s21, %s2130_s21 }
  0x25   :  { %p2137_p2 = por %p2136_p1, %p2135_p0 }
  0x27   :  { %p2138_p3 = pnand %p2137_p2, %p2131_p13 }
  0x29   :  { %2141 = shalt.err (!%p2138_p3)
}
  0x2a   :  { %s2202_s22 = smov [#allocation7]   ;;  %s2142_s0 = scalar_lea.vmem %s56_s20, 16 }
  0x2b   :  { %38 = dma.vmem_to_smem %s36_s17, 16, %s2202_s22, [#allocation6]  }
  0x2c   :  { %p2143_p4 = scmp.ne.s32.totalorder %s56_s20, %s2142_s0  ;;  %p2147_p5 = scmp.lt.s32.totalorder %s56_s20, %s56_s20 }
  0x2d   :  { %p2148_p6 = scmp.lt.s32.totalorder %s2142_s0, %s2142_s0 }
  0x2f   :  { %p2149_p7 = por %p2148_p6, %p2147_p5 }
  0x31   :  { %p2150_p8 = pnand %p2149_p7, %p2143_p4 }
  0x33   :  { %2153 = shalt.err (!%p2150_p8)
}
  0x34   :  { %s2203_s1 = smov [#allocation10]   ;;  %s65_s24 = sshll.u32 %s4143_s4, 4  ;;  %s66_s24 = int_to_ptr.vmem [resolvable:$true] %s65_s24 }
  0x35   :  { %58 = dma.vmem_to_smem %s56_s20, 16, %s2203_s1, [#allocation9]  }
  0x36   :  { %s2154_s25 = scalar_lea.vmem %s66_s24, 16  ;;  %p2159_p10 = scmp.lt.s32.totalorder %s66_s24, %s66_s24 }
  0x37   :  { %p2155_p9 = scmp.ne.s32.totalorder %s66_s24, %s2154_s25  ;;  %p2160_p11 = scmp.lt.s32.totalorder %s2154_s25, %s2154_s25 }
  0x39   :  { %p2161_p12 = por %p2160_p11, %p2159_p10 }
  0x3b   :  { %p2162_p13 = pnand %p2161_p12, %p2155_p9 }
  0x3d   :  { %2165 = shalt.err (!%p2162_p13)
}
  0x3e   :  { %s2204_s26 = smov [#allocation11]  }
  0x3f   :  { %68 = dma.vmem_to_smem %s66_s24, 16, %s2204_s26, [#allocation12]  }
  0x40   :  { %2188 = dma.done.wait [#allocation4], 256  }
  0x41   :  { %2189 = vsyncadd [#allocation4], 4294967040 }
  0x42   :  { %2190 = dma.done.wait [#allocation6], 16  }
  0x43   :  { %2191 = vsyncadd [#allocation6], 4294967280 }
  0x44   :  { %2192 = dma.done.wait [#allocation9], 32  }
  0x45   :  { %2193 = vsyncadd [#allocation9], 4294967264 }
  0x46   :  { %2194 = dma.done.wait [#allocation12], 16  }
  0x47   :  { %2195 = vsyncadd [#allocation12], 4294967280 }
  0x48   :  { %86 = sfence }
  0x49   :  { %v89_v0 = vlaneseq  ;;  %v2274_v2 = vld [vmem:[#allocation3] sm:$0xff]  ;;  %v2276_v3 = vld [vmem:[#allocation3 + $0x8] sm:$0xff]  ;;  %vm128_vm0 = vcmask 1041409   ;;  %s4150_s4 = smov 17   ;;  %s4146_s27 = smov 16  }
  0x4a   :  { %s4148_s28 = smov 15   ;;  %s4152_s29 = smov 1  }
  0x4b   :  { %v113_v1 = vshrl.u32 %v89_v0, 7  ;;  %s2402_s30 = sld [smem:[#allocation7 + $0x9]]  ;;  %s2404_s7 = sld [smem:[#allocation7 + $0x2d]]  ;;  %v2490_v37 = vand.u32 127, %v89_v0 }
  0x4c   :  { %s2406_s2 = sld [smem:[#allocation7 + $0x51]]  ;;  %s2412_s8 = sld [smem:[#allocation7]] }
  0x4d   :  { %v2278_v4 = vsub.s32 1, %v113_v1  ;;  %v2280_v5 = vsub.s32 0, %v113_v1  ;;  %v2282_v6 = vsub.s32 5, %v113_v1  ;;  %v2284_v7 = vsub.s32 4, %v113_v1  ;;  %s2414_s9 = sld [smem:[#allocation7 + $0x24]]  ;;  %s2416_s10 = sld [smem:[#allocation7 + $0x48]] }
  0x4e   :  { %v2286_v8 = vsub.s32 6, %v113_v1  ;;  %v2288_v9 = vsub.s32 2, %v113_v1  ;;  %v2320_v22 = vsub.s32 7, %v113_v1  ;;  %v2322_v23 = vsub.s32 3, %v113_v1  ;;  %s2418_s11 = sld [smem:[#allocation7 + $0x12]]  ;;  %s2420_s12 = sld [smem:[#allocation7 + $0x36]] }
  0x4f   :  { %v145_v10 = vrot.slane %v2274_v2, %v2278_v4  ;;  %v153_v11 = vrot.slane %v2276_v3, %v2278_v4  ;;  %v115_v12 = vrot.slane %v2274_v2, %v2280_v5  ;;  %v123_v13 = vrot.slane %v2276_v3, %v2280_v5  ;;  %s2422_s13 = sld [smem:[#allocation7 + $0x5a]]  ;;  %s2424_s14 = sld [smem:[#allocation7 + $0x1b]] }
  0x50   :  { %v149_v14 = vrot.slane %v2274_v2, %v2282_v6  ;;  %v157_v15 = vrot.slane %v2276_v3, %v2282_v6  ;;  %v119_v16 = vrot.slane %v2274_v2, %v2284_v7  ;;  %v127_v17 = vrot.slane %v2276_v3, %v2284_v7  ;;  %s2426_s15 = sld [smem:[#allocation7 + $0x3f]]  ;;  %s2432_s16 = sld [smem:[#allocation7 + $0x63]] }
  0x51   :  { %v2307_v18 = vsel %vm128_vm0, %v153_v11, %v145_v10  ;;  %v2310_v19 = vsel %vm128_vm0, %v123_v13, %v115_v12  ;;  %v177_v20 = vrot.slane %v2274_v2, %v2286_v8  ;;  %v185_v21 = vrot.slane %v2276_v3, %v2286_v8  ;;  %4305 = sst [smem:[#allocation19_spill]] %s2402_s30  ;;  %s2434_s17 = sld [smem:[#allocation7 + $0x1]] }
  0x52   :  { %162 = vrot.lane.b32.xlu1 %v2307_v18, %s4150_s4  ;;  %133 = vrot.lane.b32.xlu0 %v2310_v19, %s4150_s4  ;;  %v2325_v24 = vsel %vm128_vm0, %v157_v15, %v149_v14  ;;  %v2328_v25 = vsel %vm128_vm0, %v127_v17, %v119_v16  ;;  %v173_v26 = vrot.slane %v2274_v2, %v2288_v9  ;;  %4306 = sst [smem:[#allocation20_spill]] %s2404_s7  ;;  %s2436_s18 = sld [smem:[#allocation7 + $0x25]]  ;;  %v464_v36 = vstv %s2402_s30 }
  0x53   :  { %v181_v27 = vrot.slane %v2276_v3, %v2288_v9  ;;  %v2339_v28 = vsel %vm128_vm0, %v185_v21, %v177_v20  ;;  %v205_v29 = vrot.slane %v2274_v2, %v2320_v22  ;;  %v213_v31 = vrot.slane %v2276_v3, %v2320_v22  ;;  %4307 = sst [smem:[#allocation21_spill]] %s2406_s2  ;;  %s2438_s19 = sld [smem:[#allocation7 + $0x49]] }
  0x54   :  { %v201_v32 = vrot.slane %v2274_v2, %v2322_v23  ;;  %v209_v33 = vrot.slane %v2276_v3, %v2322_v23  ;;  %4308 = sst [smem:[#allocation22_spill]] %s2412_s8  ;;  %s2440_s20 = sld [smem:[#allocation7 + $0xa]]  ;;  %v815_v38 = vstv %s2404_s7  ;;  %v1165_v39 = vstv %s2406_s2 }
  0x55   :  { %v2344_v30 = vsel %vm128_vm0, %v181_v27, %v173_v26  ;;  %v2357_v34 = vsel %vm128_vm0, %v213_v31, %v205_v29  ;;  %4309 = sst [smem:[#allocation23_spill]] %s2414_s9  ;;  %s2442_s21 = sld [smem:[#allocation7 + $0x2e]]  ;;  %v458_v40 = vstv %s2412_s8  ;;  %v809_v41 = vstv %s2414_s9 }
  0x56   :  { %164 = vrot.lane.b32.xlu1 %v2325_v24, %s4150_s4  ;;  %135 = vrot.lane.b32.xlu0 %v2328_v25, %s4150_s4  ;;  %v2360_v35 = vsel %vm128_vm0, %v209_v33, %v201_v32  ;;  %4310 = sst [smem:[#allocation24_spill]] %s2416_s10  ;;  %s2444_s22 = sld [smem:[#allocation7 + $0x52]]  ;;  %v1159_v42 = vstv %s2416_s10  ;;  %v470_v43 = vstv %s2418_s11  ;;  %v2531_v52 = vadd.s32 128, %v2490_v37 }
  0x57   :  { %4311 = sst [smem:[#allocation25_spill]] %s2418_s11  ;;  %s2446_s0 = sld [smem:[#allocation7 + $0x13]]  ;;  %v821_v44 = vstv %s2420_s12  ;;  %v1171_v45 = vstv %s2422_s13  ;;  %v476_v46 = vstv %s2424_s14  ;;  %v92_v11 = vand.u32 15, %v2490_v37 }
  0x58   :  { %4312 = sst [smem:[#allocation26_spill]] %s2420_s12  ;;  %s2454_s3 = sld [smem:[#allocation7 + $0x5b]]  ;;  %v93_v12 = vand.u32 15, %v2531_v52  ;;  %vm94_vm1 = vcmp.ge.s32.totalorder %v2490_v37, 16  ;;  %vm137_vm3 = vcmp.lt.s32.totalorder %v2490_v37, 17  ;;  %vm230_vm6 = vcmp.lt.s32.totalorder %v2490_v37, 16 }
  0x59   :  { %4313 = sst [smem:[#allocation27_spill]] %s2422_s13  ;;  %s2452_s1 = sld [smem:[#allocation7 + $0x37]]  ;;  %vm2858_vm2 = vcmp.ge.s32.totalorder %v92_v11, 1  ;;  %vm3094_vm7 = vcmp.le.s32.totalorder %v92_v11, 14  ;;  %vm263_vm8 = vcmp.lt.s32.totalorder %v2490_v37, 15  ;;  %vm4302_vm11 = vcmp.lt.s32.totalorder %v2490_v37, 1 }
  0x5a   :  { %192 = vrot.lane.b32.xlu1 %v2339_v28, %s4150_s4  ;;  %190 = vrot.lane.b32.xlu0 %v2344_v30, %s4150_s4  ;;  %4314 = sst [smem:[#allocation28_spill]] %s2424_s14  ;;  %s2456_s23 = sld [smem:[#allocation7 + $0x1c]]  ;;  %vm2905_vm4 = vcmp.ge.s32.totalorder %v93_v12, 1  ;;  %vm2973_vm5 = vmand %vm94_vm1, %vm2858_vm2  ;;  %vm3113_vm9 = vcmp.le.s32.totalorder %v93_v12, 14  ;;  %vm329_vm12 = vcmp.lt.s32.totalorder %v2490_v37, 127  ;;  %vm4301_vm13 = vcmp.lt.s32.totalorder %v2531_v52, 240 }
  0x5b   :  { %4315 = sst [smem:[#allocation29_spill]] %s2426_s15  ;;  %s2458_s24 = sld [smem:[#allocation7 + $0x40]]  ;;  %vm3161_vm10 = vmand %vm94_vm1, %vm3094_vm7  ;;  %vm4299_vm14 = vcmp.lt.s32.totalorder %v2490_v37, 113 }
  0x5c   :  { %4316 = sst [smem:[#allocation30_spill]] %s2432_s16  ;;  %s2460_s25 = sld [smem:[#allocation7 + $0x64]]  ;;  %vm3443_vm15 = vmand %vm4301_vm13, %vm2905_vm4 }
  0x5d   :  { %4317 = sst [smem:[#allocation31_spill]] %s2434_s17  ;;  %s2462_s26 = sld [smem:[#allocation7 + $0x2]] }
  0x5e   :  { %220 = vrot.lane.b32.xlu1 %v2357_v34, %s4150_s4  ;;  %218 = vrot.lane.b32.xlu0 %v2360_v35, %s4150_s4  ;;  %4318 = sst [smem:[#allocation32_spill]] %s2436_s18  ;;  %s4159_s4 = smov 127  }
  0x5f   :  { %4319 = sst [smem:[#allocation33_spill]] %s2438_s19  ;;  %s2474_s6 = sld [smem:[#allocation7 + $0x2f]] }
  0x60   :  { %4320 = sst [smem:[#allocation34_spill]] %s2440_s20  ;;  %s2476_s5 = sld [smem:[#allocation7 + $0x53]] }
  0x61   :  { %4321 = sst [smem:[#allocation35_spill]] %s2442_s21  ;;  %s2498_s30 = sld [smem:[#allocation7 + $0x65]] }
  0x62   :  { %228 = vrot.lane.b32.xlu1 %v2328_v25, %s4146_s27  ;;  %226 = vrot.lane.b32.xlu0 %v2310_v19, %s4146_s27  ;;  %4322 = sst [smem:[#allocation36_spill]] %s2444_s22  ;;  %s2514_s2 = sld [smem:[#allocation7 + $0x3]] }
  0x63   :  { %4323 = sst [smem:[#allocation37_spill]] %s2446_s0  ;;  %s2516_s7 = sld [smem:[#allocation7 + $0x27]] }
  0x64   :  { %4324 = sst [smem:[#allocation38_spill]] %s2452_s1  ;;  %s2524_s12 = sld [smem:[#allocation7 + $0xc]] }
  0x65   :  { %4325 = sst [smem:[#allocation39_spill]] %s2454_s3  ;;  %s2522_s11 = sld [smem:[#allocation7 + $0x4b]] }
  0x66   :  { %237 = vrot.lane.b32.xlu1 %v2325_v24, %s4146_s27  ;;  %235 = vrot.lane.b32.xlu0 %v2307_v18, %s4146_s27  ;;  %4326 = sst [smem:[#allocation40_spill]] %s2456_s23  ;;  %s2535_s17 = sld [smem:[#allocation7 + $0x30]] }
  0x67   :  { %4327 = sst [smem:[#allocation41_spill]] %s2458_s24  ;;  %s2537_s16 = sld [smem:[#allocation7 + $0x54]] }
  0x68   :  { %4328 = sst [smem:[#allocation42_spill]] %s2460_s25  ;;  %s2485_s25 = sld [smem:[#allocation7 + $0x1d]] }
  0x69   :  { %4329 = sst [smem:[#allocation43_spill]] %s2462_s26  ;;  %s2482_s26 = sld [smem:[#allocation7 + $0x5c]] }
  0x6a   :  { %245 = vrot.lane.b32.xlu1 %v2339_v28, %s4146_s27  ;;  %243 = vrot.lane.b32.xlu0 %v2344_v30, %s4146_s27  ;;  %4333 = sst [smem:[#allocation47_spill]] %s2474_s6  ;;  %s2543_s13 = sld [smem:[#allocation7 + $0x15]] }
  0x6b   :  { %4334 = sst [smem:[#allocation48_spill]] %s2476_s5  ;;  %s4340_s5 = smov 127  }
  0x6c   :  { %4341 = sst [smem:[#allocation54_spill]] %s2498_s30  ;;  %s2545_s9 = sld [smem:[#allocation7 + $0x39]] }
  0x6d   :  { %4342 = sst [smem:[#allocation55_spill]] %s2514_s2  ;;  %s2551_s21 = sld [smem:[#allocation7 + $0x5d]] }
  0x6e   :  { %253 = vrot.lane.b32.xlu1 %v2357_v34, %s4146_s27  ;;  %251 = vrot.lane.b32.xlu0 %v2360_v35, %s4146_s27  ;;  %s2464_s27 = sld [smem:[#allocation7 + $0x26]]  ;;  %4338 = sst [smem:[#allocation52_spill]] %s2485_s25 }
  0x6f   :  { %4337 = sst [smem:[#allocation51_spill]] %s2482_s26  ;;  %s2500_s25 = sld [smem:[#allocation7 + $0x4]] }
  0x70   :  { %s2508_s26 = sld [smem:[#allocation7 + $0x28]]  ;;  %4343 = sst [smem:[#allocation56_spill]] %s2516_s7 }
  0x71   :  { %4344 = sst [smem:[#allocation57_spill]] %s2522_s11  ;;  %s2553_s22 = sld [smem:[#allocation7 + $0x31]] }
  0x72   :  { %261 = vrot.lane.b32.xlu1 %v2328_v25, %s4148_s28  ;;  %259 = vrot.lane.b32.xlu0 %v2310_v19, %s4148_s28  ;;  %4345 = sst [smem:[#allocation58_spill]] %s2524_s12  ;;  %s2567_s19 = sld [smem:[#allocation7 + $0x4c]] }
  0x73   :  { %4350 = sst [smem:[#allocation59_spill]] %s2535_s17  ;;  %s2573_s6 = sld [smem:[#allocation7 + $0x55]] }
  0x74   :  { %4330 = sst [smem:[#allocation44_spill]] %s2464_s27  ;;  %s2478_s27 = sld [smem:[#allocation7 + $0x14]] }
  0x75   :  { %4351 = sst [smem:[#allocation60_spill]] %s2537_s16  ;;  %v554_v14 = vstv %s2500_s25  ;;  %s4206_s25 = smov 113  }
  0x76   :  { %270 = vrot.lane.b32.xlu1 %v2325_v24, %s4148_s28  ;;  %268 = vrot.lane.b32.xlu0 %v2307_v18, %s4148_s28  ;;  %4352 = sst [smem:[#allocation61_spill]] %s2543_s13  ;;  %v905_v20 = vstv %s2508_s26  ;;  %v555_v33 = vmul.f32 %v554_v14, %v2274_v2  ;;  %v556_v16 = vmul.f32 %v554_v14, %v2276_v3  ;;  %s2595_s26 = sld [smem:[#allocation7 + $0x66]] }
  0x77   :  { %4354 = sst [smem:[#allocation62_spill]] %s2545_s9  ;;  %v906_v29 = vmul.f32 %v905_v20, %v2274_v2  ;;  %v907_v27 = vmul.f32 %v905_v20, %v2276_v3  ;;  %v933_v0 = vstv %s2553_s22  ;;  %s4362_s17 = smov 113  }
  0x78   :  { %4355 = sst [smem:[#allocation63_spill]] %s2551_s21  ;;  %v562_v32 = vrot.slane %v555_v33, %v2280_v5  ;;  %v566_v63 = vrot.slane %v555_v33, %v2284_v7  ;;  %v570_v20 = vrot.slane %v556_v16, %v2280_v5  ;;  %v574_v14 = vrot.slane %v556_v16, %v2284_v7  ;;  %s2619_s22 = sld [smem:[#allocation7 + $0x1f]] }
  0x79   :  { %v913_v1 = vrot.slane %v906_v29, %v2280_v5  ;;  %v921_v10 = vrot.slane %v907_v27, %v2280_v5  ;;  %v1255_v13 = vstv %s2567_s19  ;;  %v1283_v26 = vstv %s2573_s6  ;;  %s2625_s21 = sld [smem:[#allocation7 + $0x3a]]  ;;  %s2631_s19 = sld [smem:[#allocation7 + $0x43]] }
  0x7a   :  { %278 = vrot.lane.b32.xlu1 %v2339_v28, %s4148_s28  ;;  %276 = vrot.lane.b32.xlu0 %v2344_v30, %s4148_s28  ;;  %4335 = sst [smem:[#allocation49_spill]] %s2478_s27  ;;  %v917_v62 = vrot.slane %v906_v29, %v2284_v7  ;;  %v925_v61 = vrot.slane %v907_v27, %v2284_v7  ;;  %v934_v60 = vmul.f32 %v933_v0, %v2274_v2  ;;  %s2651_s6 = sld [smem:[#allocation7 + $0x5]] }
  0x7b   :  { %v935_v59 = vmul.f32 %v933_v0, %v2276_v3  ;;  %v1256_v57 = vmul.f32 %v1255_v13, %v2274_v2  ;;  %v2642_v27 = vsel %vm128_vm0, %v570_v20, %v562_v32  ;;  %v2645_v0 = vsel %vm128_vm0, %v574_v14, %v566_v63  ;;  %s2675_s9 = sld [smem:[#allocation7 + $0x4d]]  ;;  %s2681_s13 = sld [smem:[#allocation7 + $0xe]] }
  0x7c   :  { %4361 = sst [smem:[#allocation66_spill]] %s2595_s26  ;;  %v2660_v56 = vsel %vm128_vm0, %v921_v10, %v913_v1  ;;  %v1285_v32 = vmul.f32 %v1283_v26, %v2276_v3  ;;  %v2668_v63 = vsel %vm128_vm0, %v925_v61, %v917_v62  ;;  %v941_v14 = vrot.slane %v934_v60, %v2278_v4  ;;  %s2683_s16 = sld [smem:[#allocation7 + $0x32]] }
  0x7d   :  { %v949_v20 = vrot.slane %v935_v59, %v2278_v4  ;;  %s2673_s26 = sld [smem:[#allocation7 + $0x67]]  ;;  %v945_v1 = vrot.slane %v934_v60, %v2282_v6  ;;  %v953_v10 = vrot.slane %v935_v59, %v2282_v6  ;;  %v1267_v60 = vrot.slane %v1256_v57, %v2284_v7  ;;  %s2719_s7 = sld [smem:[#allocation7 + $0x44]] }
  0x7e   :  { %286 = vrot.lane.b32.xlu1 %v2357_v34, %s4148_s28  ;;  %284 = vrot.lane.b32.xlu0 %v2360_v35, %s4148_s28  ;;  %s2466_s28 = sld [smem:[#allocation7 + $0x4a]]  ;;  %s2696_s12 = sld [smem:[#allocation7 + $0x17]] }
  0x7f   :  { %v961_v29 = vstv %s2625_s21  ;;  %s2708_s11 = sld [smem:[#allocation7 + $0x5f]]  ;;  %s2729_s21 = sld [smem:[#allocation7 + $0x68]] }
  0x80   :  { %4363 = sst [smem:[#allocation67_spill]] %s2651_s6  ;;  %s2731_s2 = sld [smem:[#allocation7 + $0x6]] }
  0x81   :  { %4365 = sst [smem:[#allocation69_spill]] %s2675_s9  ;;  %s4235_s30 = smov 112  }
  0x82   :  { %294 = vrot.lane.b32.xlu1 %v2328_v25, %s4152_s29  ;;  %292 = vrot.lane.b32.xlu0 %v2310_v19, %s4152_s29  ;;  %4366 = sst [smem:[#allocation70_spill]] %s2681_s13  ;;  %s2745_s0 = sld [smem:[#allocation7 + $0x4e]] }
  0x83   :  { %4367 = sst [smem:[#allocation71_spill]] %s2683_s16  ;;  %s2757_s6 = sld [smem:[#allocation7 + $0x33]] }
  0x84   :  { %4331 = sst [smem:[#allocation45_spill]] %s2466_s28  ;;  %s2480_s28 = sld [smem:[#allocation7 + $0x38]] }
  0x85   :  { %4369 = sst [smem:[#allocation73_spill]] %s2696_s12  ;;  %s2767_s1 = sld [smem:[#allocation7 + $0x57]] }
  0x86   :  { %303 = vrot.lane.b32.xlu1 %v2325_v24, %s4152_s29  ;;  %301 = vrot.lane.b32.xlu0 %v2307_v18, %s4152_s29  ;;  %4371 = sst [smem:[#allocation75_spill]] %s2719_s7  ;;  %s4375_s10 = smov 112  }
  0x87   :  { %4372 = sst [smem:[#allocation76_spill]] %s2729_s21  ;;  %s2769_s3 = sld [smem:[#allocation7 + $0x18]] }
  0x88   :  { %4373 = sst [smem:[#allocation77_spill]] %s2731_s2  ;;  %s2777_s27 = sld [smem:[#allocation7 + $0x60]] }
  0x89   :  { %s2797_s18 = sld [smem:[#allocation7 + $0x69]]  ;;  %s2799_s14 = sld [smem:[#allocation7 + $0x7]] }
  0x8a   :  { %311 = vrot.lane.b32.xlu1 %v2339_v28, %s4152_s29  ;;  %309 = vrot.lane.b32.xlu0 %v2344_v30, %s4152_s29  ;;  %4336 = sst [smem:[#allocation50_spill]] %s2480_s28  ;;  %s2775_s28 = sld [smem:[#allocation7 + $0x3c]] }
  0x8b   :  { %s2809_s15 = sld [smem:[#allocation7 + $0x4f]]  ;;  %s2823_s24 = sld [smem:[#allocation7 + $0x10]] }
  0x8c   :  { %s2825_s23 = sld [smem:[#allocation7 + $0x34]]  ;;  %s2841_s20 = sld [smem:[#allocation7 + $0x58]] }
  0x8d   :  { %4374 = sst [smem:[#allocation78_spill]] %s2769_s3  ;;  %s2843_s8 = sld [smem:[#allocation7 + $0x19]] }
  0x8e   :  { %319 = vrot.lane.b32.xlu1 %v2357_v34, %s4152_s29  ;;  %317 = vrot.lane.b32.xlu0 %v2360_v35, %s4152_s29  ;;  %s2472_s29 = sld [smem:[#allocation7 + $0xb]]  ;;  %s2871_s16 = sld [smem:[#allocation7 + $0x22]] }
  0x8f   :  { %s2873_s13 = sld [smem:[#allocation7 + $0x46]]  ;;  %s2915_s12 = sld [smem:[#allocation7 + $0x35]] }
  0x90   :  { %s4278_s21 = smov 111   ;;  %s4410_s3 = sld [smem:[#allocation30_spill]] }
  0x91   :  { %4377 = sst [smem:[#allocation80_spill]] %s2823_s24  ;;  %s2853_s24 = sld [smem:[#allocation7 + $0x61]] }
  0x92   :  { %327 = vrot.lane.b32.xlu1 %v2328_v25, %s4159_s4  ;;  %325 = vrot.lane.b32.xlu0 %v2310_v19, %s4159_s4  ;;  %s2487_s4 = sld [smem:[#allocation7 + $0x41]]  ;;  %4378 = sst [smem:[#allocation81_spill]] %s2825_s23 }
  0x93   :  { %4379 = sst [smem:[#allocation82_spill]] %s2843_s8  ;;  %s2851_s23 = sld [smem:[#allocation7 + $0x3d]] }
  0x94   :  { %4332 = sst [smem:[#allocation46_spill]] %s2472_s29  ;;  %s2787_s29 = sld [smem:[#allocation7 + $0x21]] }
  0x95   :  { %4384 = sst [smem:[#allocation85_spill]] %s2871_s16  ;;  %s4392_s7 = sld [smem:[#allocation80_spill]] }
  0x96   :  { %336 = vrot.lane.b32.xlu1 %v2325_v24, %s4340_s5  ;;  %334 = vrot.lane.b32.xlu0 %v2307_v18, %s4340_s5  ;;  %4385 = sst [smem:[#allocation86_spill]] %s2873_s13  ;;  %s4393_s2 = sld [smem:[#allocation81_spill]] }
  0x97   :  { %4381 = sst [smem:[#allocation84_spill]] %s2853_s24  ;;  %s2967_s24 = sld [smem:[#allocation7 + $0x62]] }
  0x98   :  { %4339 = sst [smem:[#allocation53_spill]] %s2487_s4  ;;  %s2506_s4 = sld [smem:[#allocation7 + $0xd]] }
  0x99   :  { %4380 = sst [smem:[#allocation83_spill]] %s2851_s23  ;;  %s2965_s23 = sld [smem:[#allocation7 + $0x3e]] }
  0x9a   :  { %344 = vrot.lane.b32.xlu1 %v2339_v28, %s4340_s5  ;;  %342 = vrot.lane.b32.xlu0 %v2344_v30, %s4340_s5  ;;  %4376 = sst [smem:[#allocation79_spill]] %s2787_s29  ;;  %s4396_s29 = smov 111  }
  0x9b   :  { %s4411_s8 = sld [smem:[#allocation31_spill]]  ;;  %s4415_s13 = sld [smem:[#allocation32_spill]] }
  0x9c   :  { %s4417_s16 = sld [smem:[#allocation33_spill]] }
  0x9e   :  { %352 = vrot.lane.b32.xlu1 %v2357_v34, %s4340_s5  ;;  %350 = vrot.lane.b32.xlu0 %v2360_v35, %s4340_s5  ;;  %v582_v17 = vstv %s2506_s4  ;;  %s2581_s5 = sld [smem:[#allocation7 + $0x1e]]  ;;  %s2585_s4 = sld [smem:[#allocation7 + $0x42]] }
  0x9f   :  { %v583_v31 = vmul.f32 %v582_v17, %v2274_v2  ;;  %v584_v15 = vmul.f32 %v582_v17, %v2276_v3 }
  0xa1   :  { %v590_v17 = vrot.slane %v583_v31, %v2278_v4  ;;  %v594_v33 = vrot.slane %v583_v31, %v2282_v6  ;;  %v598_v16 = vrot.slane %v584_v15, %v2278_v4  ;;  %v602_v21 = vrot.slane %v584_v15, %v2282_v6 }
  0xa2   :  { %360 = vrot.lane.b32.xlu1 %v2328_v25, %s4206_s25  ;;  %358 = vrot.lane.b32.xlu0 %v2310_v19, %s4206_s25  ;;  %s2605_s25 = sld [smem:[#allocation7 + $0x16]]  ;;  %v1257_v15 = vmul.f32 %v1255_v13, %v2276_v3  ;;  %v2649_v31 = vmul.f32 %v1283_v26, %v2274_v2  ;;  %v638_v26 = vstv %s2619_s22  ;;  %s2717_s22 = sld [smem:[#allocation7 + $0x20]] }
  0xa3   :  { %v2654_v13 = vsel %vm128_vm0, %v598_v16, %v590_v17  ;;  %v2657_v58 = vsel %vm128_vm0, %v602_v21, %v594_v33  ;;  %v1263_v21 = vrot.slane %v1256_v57, %v2280_v5 }
  0xa4   :  { %4359 = sst [smem:[#allocation64_spill]] %s2581_s5  ;;  %s2665_s5 = sld [smem:[#allocation7 + $0x5e]]  ;;  %v1271_v61 = vrot.slane %v1257_v15, %v2280_v5  ;;  %v1275_v59 = vrot.slane %v1257_v15, %v2284_v7  ;;  %v1291_v62 = vrot.slane %v2649_v31, %v2278_v4  ;;  %v1299_v5 = vrot.slane %v1285_v32, %v2278_v4 }
  0xa5   :  { %4360 = sst [smem:[#allocation65_spill]] %s2585_s4  ;;  %s2663_s4 = sld [smem:[#allocation7 + $0x29]]  ;;  %v2711_v7 = vsel %vm128_vm0, %v949_v20, %v941_v14  ;;  %v1295_v57 = vrot.slane %v2649_v31, %v2282_v6  ;;  %v1303_v4 = vrot.slane %v1285_v32, %v2282_v6  ;;  %v989_v15 = vstv %s2631_s19 }
  0xa6   :  { %369 = vrot.lane.b32.xlu1 %v2325_v24, %s4362_s17  ;;  %367 = vrot.lane.b32.xlu0 %v2307_v18, %s4362_s17  ;;  %v2725_v55 = vsel %vm128_vm0, %v1271_v61, %v1263_v21  ;;  %v639_v14 = vmul.f32 %v638_v26, %v2274_v2  ;;  %v640_v20 = vmul.f32 %v638_v26, %v2276_v3  ;;  %s2743_s19 = sld [smem:[#allocation7 + $0x2a]] }
  0xa7   :  { %v2738_v6 = vsel %vm128_vm0, %v1275_v59, %v1267_v60  ;;  %v962_v32 = vmul.f32 %v961_v29, %v2274_v2  ;;  %v990_v60 = vmul.f32 %v989_v15, %v2274_v2  ;;  %v991_v26 = vmul.f32 %v989_v15, %v2276_v3 }
  0xa8   :  { %v610_v17 = vstv %s2605_s25  ;;  %s2694_s25 = sld [smem:[#allocation7 + $0x56]]  ;;  %v650_v31 = vrot.slane %v639_v14, %v2320_v22 }
  0xa9   :  { %v2700_v33 = vmul.f32 %v610_v17, %v2274_v2  ;;  %v2703_v16 = vmul.f32 %v610_v17, %v2276_v3  ;;  %v2722_v17 = vsel %vm128_vm0, %v953_v10, %v945_v1  ;;  %v963_v1 = vmul.f32 %v961_v29, %v2276_v3 }
  0xaa   :  { %377 = vrot.lane.b32.xlu1 %v2339_v28, %s4362_s17  ;;  %375 = vrot.lane.b32.xlu0 %v2344_v30, %s4362_s17  ;;  %v2748_v10 = vsel %vm128_vm0, %v1299_v5, %v1291_v62  ;;  %v2760_v29 = vsel %vm128_vm0, %v1303_v4, %v1295_v57  ;;  %v646_v5 = vrot.slane %v639_v14, %v2322_v23  ;;  %v1311_v4 = vstv %s2665_s5  ;;  %s2789_s5 = sld [smem:[#allocation7 + $0x45]] }
  0xab   :  { %4364 = sst [smem:[#allocation68_spill]] %s2663_s4  ;;  %v618_v21 = vrot.slane %v2700_v33, %v2288_v9  ;;  %v626_v61 = vrot.slane %v2703_v16, %v2288_v9  ;;  %v622_v59 = vrot.slane %v2700_v33, %v2286_v8  ;;  %v630_v62 = vrot.slane %v2703_v16, %v2286_v8 }
  0xac   :  { %v654_v57 = vrot.slane %v640_v20, %v2322_v23  ;;  %v658_v33 = vrot.slane %v640_v20, %v2320_v22  ;;  %v969_v16 = vrot.slane %v962_v32, %v2288_v9  ;;  %v977_v15 = vrot.slane %v963_v1, %v2288_v9 }
  0xad   :  { %v1339_v14 = vstv %s2673_s26  ;;  %v2792_v54 = vsel %vm128_vm0, %v626_v61, %v618_v21  ;;  %v973_v53 = vrot.slane %v962_v32, %v2286_v8  ;;  %v981_v51 = vrot.slane %v963_v1, %v2286_v8  ;;  %s2807_s26 = sld [smem:[#allocation7 + $0x2b]] }
  0xae   :  { %385 = vrot.lane.b32.xlu1 %v2357_v34, %s4362_s17  ;;  %383 = vrot.lane.b32.xlu0 %v2360_v35, %s4362_s17  ;;  %4368 = sst [smem:[#allocation72_spill]] %s2694_s25  ;;  %s2706_s17 = sld [smem:[#allocation7 + $0x3b]]  ;;  %v997_v50 = vrot.slane %v990_v60, %v2322_v23  ;;  %v1001_v20 = vrot.slane %v990_v60, %v2320_v22  ;;  %v1005_v49 = vrot.slane %v991_v26, %v2322_v23 }
  0xaf   :  { %v1009_v48 = vrot.slane %v991_v26, %v2320_v22  ;;  %v2805_v21 = vmul.f32 %v1311_v4, %v2274_v2  ;;  %v2812_v32 = vsel %vm128_vm0, %v630_v62, %v622_v59  ;;  %v2815_v1 = vsel %vm128_vm0, %v654_v57, %v646_v5  ;;  %s2883_s25 = sld [smem:[#allocation7 + $0x6a]] }
  0xb0   :  { %v2818_v61 = vmul.f32 %v1311_v4, %v2276_v3  ;;  %v2821_v60 = vmul.f32 %v1339_v14, %v2274_v2  ;;  %v2832_v59 = vsel %vm128_vm0, %v658_v33, %v650_v31  ;;  %v2835_v62 = vsel %vm128_vm0, %v977_v15, %v969_v16 }
  0xb1   :  { %v1017_v26 = vstv %s2663_s4  ;;  %v2839_v2 = vmul.f32 %v1339_v14, %v2276_v3  ;;  %v2846_v5 = vsel %vm128_vm0, %v981_v51, %v973_v53  ;;  %v1367_v57 = vstv %s2675_s9  ;;  %s2885_s9 = sld [smem:[#allocation7 + $0x8]]  ;;  %s2899_s4 = sld [smem:[#allocation7 + $0x2c]] }
  0xb2   :  { %393 = vrot.lane.b32.xlu1 %v2328_v25, %s4235_s30  ;;  %391 = vrot.lane.b32.xlu0 %v2310_v19, %s4235_s30  ;;  %s2755_s30 = sld [smem:[#allocation7 + $0xf]]  ;;  %v2863_v31 = vsel %vm128_vm0, %v1005_v49, %v997_v50  ;;  %v2866_v51 = vsel %vm128_vm0, %v1009_v48, %v1001_v20  ;;  %v1319_v53 = vrot.slane %v2805_v21, %v2288_v9 }
  0xb3   :  { %v1323_v16 = vrot.slane %v2805_v21, %v2286_v8  ;;  %v1327_v49 = vrot.slane %v2818_v61, %v2288_v9  ;;  %v1331_v48 = vrot.slane %v2818_v61, %v2286_v8  ;;  %v1347_v50 = vrot.slane %v2821_v60, %v2322_v23 }
  0xb4   :  { %4370 = sst [smem:[#allocation74_spill]] %s2706_s17  ;;  %v1351_v8 = vrot.slane %v2821_v60, %v2320_v22  ;;  %v1355_v9 = vrot.slane %v2839_v2, %v2322_v23  ;;  %v1359_v15 = vrot.slane %v2839_v2, %v2320_v22  ;;  %s2923_s17 = sld [smem:[#allocation7 + $0x1a]] }
  0xb5   :  { %v2934_v33 = vsel %vm128_vm0, %v1327_v49, %v1319_v53  ;;  %v2937_v60 = vsel %vm128_vm0, %v1331_v48, %v1323_v16 }
  0xb6   :  { %402 = vrot.lane.b32.xlu1 %v2325_v24, %s4375_s10  ;;  %400 = vrot.lane.b32.xlu0 %v2307_v18, %s4375_s10  ;;  %v2958_v4 = vsel %vm128_vm0, %v1355_v9, %v1347_v50  ;;  %v2961_v49 = vsel %vm128_vm0, %v1359_v15, %v1351_v8  ;;  %vm4300_vm0 = vcmp.lt.s32.totalorder %v2490_v37, 112 }
  0xb7   :  { %4386 = sst [smem:[#allocation87_spill]] %s2885_s9  ;;  %s2913_s9 = sld [smem:[#allocation7 + $0x11]] }
  0xba   :  { %410 = vrot.lane.b32.xlu1 %v2339_v28, %s4375_s10  ;;  %408 = vrot.lane.b32.xlu0 %v2344_v30, %s4375_s10  ;;  %4391 = sst [smem:[#allocation90_spill]] %s2923_s17  ;;  %s4409_s17 = sld [smem:[#allocation29_spill]] }
  0xbe   :  { %418 = vrot.lane.b32.xlu1 %v2357_v34, %s4375_s10  ;;  %416 = vrot.lane.b32.xlu0 %v2360_v35, %s4375_s10  ;;  %s2901_s10 = sld [smem:[#allocation7 + $0x50]] }
  0xc2   :  { %426 = vrot.lane.b32.xlu1 %v2328_v25, %s4278_s21  ;;  %424 = vrot.lane.b32.xlu0 %v2310_v19, %s4278_s21  ;;  %s4394_s21 = sld [smem:[#allocation87_spill]] }
  0xc4   :  { %4387 = sst [smem:[#allocation88_spill]] %s2901_s10  ;;  %s2921_s10 = sld [smem:[#allocation7 + $0x59]]  ;;  %v163_v22 = vpop.permute.xlu1 %162  ;;  %v134_v47 = vpop.permute.xlu0 %133 }
  0xc6   :  { %435 = vrot.lane.b32.xlu1 %v2325_v24, %s4396_s29  ;;  %433 = vrot.lane.b32.xlu0 %v2307_v18, %s4396_s29 }
  0xc8   :  { %v165_v8 = vpop.permute.xlu1 %164  ;;  %v136_v15 = vpop.permute.xlu0 %135 }
  0xc9   :  { %v166_v19 = vsel %vm137_vm3, %v163_v22, %v165_v8  ;;  %v167_v50 = vsel %vm137_vm3, %v165_v8, %v163_v22  ;;  %v138_v23 = vsel %vm137_vm3, %v134_v47, %v136_v15  ;;  %v139_v48 = vsel %vm137_vm3, %v136_v15, %v134_v47 }
  0xca   :  { %4390 = sst [smem:[#allocation89_spill]] %s2921_s10  ;;  %v168_v21 = vsel %vm2973_vm5, %v167_v50, 0.0  ;;  %v169_v53 = vsel %vm2905_vm4, %v166_v19, 0.0  ;;  %v140_v16 = vsel %vm2973_vm5, %v139_v48, 0.0  ;;  %v141_v22 = vsel %vm2905_vm4, %v138_v23, 0.0  ;;  %443 = vrot.lane.b32.xlu1 %v2339_v28, %s4396_s29  ;;  %441 = vrot.lane.b32.xlu0 %v2344_v30, %s4396_s29  ;;  %s4421_s10 = sld [smem:[#allocation34_spill]] }
  0xcb   :  { %v465_v47 = vmul.f32 %v464_v36, %v168_v21  ;;  %v466_v19 = vmul.f32 %v464_v36, %v169_v53  ;;  %v816_v50 = vmul.f32 %v815_v38, %v168_v21  ;;  %v817_v48 = vmul.f32 %v815_v38, %v169_v53 }
  0xcc   :  { %v1166_v23 = vmul.f32 %v1165_v39, %v168_v21  ;;  %v1167_v28 = vmul.f32 %v1165_v39, %v169_v53  ;;  %v459_v8 = vmul.f32 %v458_v40, %v140_v16  ;;  %v460_v30 = vmul.f32 %v458_v40, %v141_v22  ;;  %v193_v15 = vpop.permute.xlu1 %192  ;;  %v191_v9 = vpop.permute.xlu0 %190 }
  0xcd   :  { %v810_v36 = vmul.f32 %v809_v41, %v140_v16  ;;  %v811_v24 = vmul.f32 %v809_v41, %v141_v22  ;;  %v1160_v25 = vmul.f32 %v1159_v42, %v140_v16  ;;  %v1161_v38 = vmul.f32 %v1159_v42, %v141_v22 }
  0xce   :  { %v194_v2 = vsel %vm137_vm3, %v191_v9, %v193_v15  ;;  %v195_v39 = vsel %vm137_vm3, %v193_v15, %v191_v9  ;;  %451 = vrot.lane.b32.xlu1 %v2357_v34, %s4396_s29  ;;  %v467_v41 = vadd.f32 %v465_v47, %v459_v8  ;;  %v468_v53 = vadd.f32 %v466_v19, %v460_v30 }
  0xcf   :  { %v818_v42 = vadd.f32 %v816_v50, %v810_v36  ;;  %v819_v16 = vadd.f32 %v817_v48, %v811_v24  ;;  %449 = vrot.lane.b32.xlu0 %v2360_v35, %s4396_s29  ;;  %v1168_v22 = vadd.f32 %v1166_v23, %v1160_v25  ;;  %v1169_v14 = vadd.f32 %v1167_v28, %v1161_v38  ;;  %s4542_s29 = sld [smem:[#allocation74_spill]] }
  0xd0   :  { %v196_v9 = vsel %vm2973_vm5, %v195_v39, 0.0  ;;  %v197_v34 = vsel %vm2905_vm4, %v194_v2, 0.0  ;;  %v221_v15 = vpop.permute.xlu1 %220  ;;  %v219_v40 = vpop.permute.xlu0 %218 }
  0xd1   :  { %v471_v21 = vmul.f32 %v470_v43, %v196_v9  ;;  %v472_v47 = vmul.f32 %v470_v43, %v197_v34  ;;  %v822_v19 = vmul.f32 %v821_v44, %v196_v9  ;;  %v823_v24 = vmul.f32 %v821_v44, %v197_v34 }
  0xd2   :  { %v1172_v35 = vmul.f32 %v1171_v45, %v196_v9  ;;  %v1173_v25 = vmul.f32 %v1171_v45, %v197_v34  ;;  %v222_v2 = vsel %vm137_vm3, %v219_v40, %v221_v15  ;;  %v223_v50 = vsel %vm137_vm3, %v221_v15, %v219_v40 }
  0xd3   :  { %v473_v43 = vadd.f32 %v471_v21, %v467_v41  ;;  %v474_v48 = vadd.f32 %v472_v47, %v468_v53  ;;  %v824_v23 = vadd.f32 %v822_v19, %v818_v42  ;;  %v825_v28 = vadd.f32 %v823_v24, %v819_v16 }
  0xd4   :  { %v1174_v44 = vadd.f32 %v1172_v35, %v1168_v22  ;;  %v1175_v8 = vadd.f32 %v1173_v25, %v1169_v14  ;;  %v224_v30 = vsel %vm2973_vm5, %v223_v50, 0.0  ;;  %v225_v45 = vsel %vm2905_vm4, %v222_v2, 0.0  ;;  %v229_v36 = vpop.permute.xlu1 %228  ;;  %v227_v38 = vpop.permute.xlu0 %226 }
  0xd5   :  { %v477_v39 = vmul.f32 %v476_v46, %v224_v30  ;;  %v478_v40 = vmul.f32 %v476_v46, %v225_v45  ;;  %v4412_v9 = vstv %s4409_s17  ;;  %v4414_v42 = vstv %s4410_s3  ;;  %s4423_s17 = sld [smem:[#allocation35_spill]]  ;;  %s4428_s3 = sld [smem:[#allocation36_spill]] }
  0xd6   :  { %v828_v21 = vmul.f32 %v4412_v9, %v224_v30  ;;  %v4413_v41 = vmov %v4412_v9  ;;  %v1178_v14 = vmul.f32 %v4414_v42, %v224_v30  ;;  %v4416_v16 = vmov %v4414_v42 }
  0xd7   :  { %v829_v53 = vmul.f32 %v4413_v41, %v225_v45  ;;  %v1179_v22 = vmul.f32 %v4416_v16, %v225_v45  ;;  %v231_v34 = vsel %vm230_vm6, %v227_v38, %v229_v36  ;;  %v232_v15 = vsel %vm230_vm6, %v229_v36, %v227_v38 }
  0xd8   :  { %v479_v47 = vadd.f32 %v477_v39, %v473_v43  ;;  %v480_v46 = vadd.f32 %v478_v40, %v474_v48  ;;  %v830_v19 = vadd.f32 %v828_v21, %v824_v23  ;;  %v1180_v35 = vadd.f32 %v1178_v14, %v1174_v44  ;;  %v238_v45 = vpop.permute.xlu1 %237  ;;  %v236_v9 = vpop.permute.xlu0 %235 }
  0xd9   :  { %v831_v24 = vadd.f32 %v829_v53, %v825_v28  ;;  %v1181_v25 = vadd.f32 %v1179_v22, %v1175_v8  ;;  %v233_v2 = vsel %vm94_vm1, %v232_v15, 0.0  ;;  %v4418_v50 = vstv %s4411_s8  ;;  %s4431_s8 = sld [smem:[#allocation37_spill]] }
  0xda   :  { %v484_v30 = vmul.f32 %v4418_v50, %v231_v34  ;;  %v4419_v41 = vmov %v4418_v50  ;;  %v4420_v16 = vstv %s4415_s13  ;;  %v4424_v48 = vstv %s4417_s16  ;;  %s4432_s13 = sld [smem:[#allocation38_spill]]  ;;  %s4436_s16 = sld [smem:[#allocation39_spill]] }
  0xdb   :  { %v483_v42 = vmul.f32 %v4419_v41, %v233_v2  ;;  %v834_v61 = vmul.f32 %v4420_v16, %v233_v2  ;;  %v4422_v36 = vmov %v4420_v16  ;;  %v1184_v23 = vmul.f32 %v4424_v48, %v233_v2 }
  0xdc   :  { %v835_v43 = vmul.f32 %v4422_v36, %v231_v34  ;;  %v486_v44 = vadd.f32 %v484_v30, %v480_v46  ;;  %v4427_v8 = vmov %v4424_v48  ;;  %v239_v39 = vsel %vm230_vm6, %v236_v9, %v238_v45  ;;  %v246_v30 = vpop.permute.xlu1 %245  ;;  %v244_v41 = vpop.permute.xlu0 %243 }
  0xdd   :  { %v1185_v38 = vmul.f32 %v4427_v8, %v231_v34  ;;  %v240_v40 = vsel %vm230_vm6, %v238_v45, %v236_v9  ;;  %v485_v21 = vadd.f32 %v483_v42, %v479_v47  ;;  %v836_v11 = vadd.f32 %v834_v61, %v830_v19 }
  0xde   :  { %v837_v53 = vadd.f32 %v835_v43, %v831_v24  ;;  %v1186_v14 = vadd.f32 %v1184_v23, %v1180_v35  ;;  %v241_v15 = vsel %vm94_vm1, %v240_v40, 0.0  ;;  %v4429_v34 = vstv %s4421_s10  ;;  %s4443_s10 = sld [smem:[#allocation40_spill]] }
  0xdf   :  { %v1187_v22 = vadd.f32 %v1185_v38, %v1181_v25  ;;  %v490_v46 = vmul.f32 %v4429_v34, %v239_v39  ;;  %v4430_v2 = vstv %s4423_s17  ;;  %v4435_v61 = vmov %v4429_v34  ;;  %s4444_s17 = sld [smem:[#allocation41_spill]] }
  0xe0   :  { %v841_v50 = vmul.f32 %v4430_v2, %v239_v39  ;;  %v489_v47 = vmul.f32 %v4435_v61, %v241_v15  ;;  %v4437_v19 = vmov %v4430_v2  ;;  %v4438_v35 = vstv %s4428_s3  ;;  %s4448_s3 = sld [smem:[#allocation42_spill]] }
  0xe1   :  { %v840_v24 = vmul.f32 %v4437_v19, %v241_v15  ;;  %v1190_v25 = vmul.f32 %v4438_v35, %v241_v15  ;;  %v4439_v9 = vmov %v4438_v35  ;;  %v492_v16 = vadd.f32 %v490_v46, %v486_v44  ;;  %v254_v46 = vpop.permute.xlu1 %253 }
  0xe2   :  { %v1191_v42 = vmul.f32 %v4439_v9, %v239_v39  ;;  %v843_v36 = vadd.f32 %v841_v50, %v837_v53  ;;  %v247_v12 = vsel %vm230_vm6, %v244_v41, %v246_v30  ;;  %v248_v43 = vsel %vm230_vm6, %v246_v30, %v244_v41  ;;  %v252_v50 = vpop.permute.xlu0 %251 }
  0xe3   :  { %v491_v48 = vadd.f32 %v489_v47, %v485_v21  ;;  %v842_v23 = vadd.f32 %v840_v24, %v836_v11  ;;  %v1192_v8 = vadd.f32 %v1190_v25, %v1186_v14  ;;  %v249_v40 = vsel %vm94_vm1, %v248_v43, 0.0 }
  0xe4   :  { %v1193_v38 = vadd.f32 %v1191_v42, %v1187_v22  ;;  %v4440_v15 = vstv %s4431_s8  ;;  %v4441_v39 = vstv %s4432_s13  ;;  %v4442_v44 = vstv %s4436_s16  ;;  %s4453_s8 = sld [smem:[#allocation43_spill]]  ;;  %s4456_s13 = sld [smem:[#allocation44_spill]] }
  0xe5   :  { %v496_v34 = vmul.f32 %v4440_v15, %v247_v12  ;;  %v847_v2 = vmul.f32 %v4441_v39, %v247_v12  ;;  %v1197_v53 = vmul.f32 %v4442_v44, %v247_v12  ;;  %v4445_v61 = vmov %v4440_v15  ;;  %s4459_s16 = sld [smem:[#allocation45_spill]] }
  0xe6   :  { %v495_v21 = vmul.f32 %v4445_v61, %v249_v40  ;;  %v4446_v11 = vmov %v4441_v39  ;;  %v4447_v22 = vmov %v4442_v44  ;;  %v255_v41 = vsel %vm230_vm6, %v252_v50, %v254_v46 }
  0xe7   :  { %v846_v14 = vmul.f32 %v4446_v11, %v249_v40  ;;  %v1196_v30 = vmul.f32 %v4447_v22, %v249_v40  ;;  %v498_v47 = vadd.f32 %v496_v34, %v492_v16  ;;  %v849_v19 = vadd.f32 %v847_v2, %v843_v36  ;;  %v262_v36 = vpop.permute.xlu1 %261 }
  0xe8   :  { %v1199_v24 = vadd.f32 %v1197_v53, %v1193_v38  ;;  %v256_v35 = vsel %vm230_vm6, %v254_v46, %v252_v50  ;;  %v497_v25 = vadd.f32 %v495_v21, %v491_v48  ;;  %v4449_v43 = vstv %s4443_s10  ;;  %s4464_s10 = sld [smem:[#allocation46_spill]] }
  0xe9   :  { %v848_v9 = vadd.f32 %v846_v14, %v842_v23  ;;  %v1198_v42 = vadd.f32 %v1196_v30, %v1192_v8  ;;  %v257_v12 = vsel %vm94_vm1, %v256_v35, 0.0  ;;  %v4450_v40 = vmov %v4449_v43  ;;  %v260_v23 = vpop.permute.xlu0 %259 }
  0xea   :  { %v501_v15 = vmul.f32 %v4449_v43, %v257_v12  ;;  %v502_v39 = vmul.f32 %v4450_v40, %v255_v41  ;;  %v4451_v44 = vstv %s4444_s17  ;;  %v4457_v8 = vstv %s4448_s3  ;;  %s4466_s17 = sld [smem:[#allocation47_spill]]  ;;  %s4468_s3 = sld [smem:[#allocation48_spill]] }
  0xeb   :  { %v852_v61 = vmul.f32 %v4451_v44, %v257_v12  ;;  %v4452_v11 = vmov %v4451_v44  ;;  %v1202_v38 = vmul.f32 %v4457_v8, %v257_v12  ;;  %v4458_v34 = vmov %v4457_v8 }
  0xec   :  { %v853_v16 = vmul.f32 %v4452_v11, %v255_v41  ;;  %v1203_v2 = vmul.f32 %v4458_v34, %v255_v41  ;;  %v264_v53 = vsel %vm263_vm8, %v260_v23, %v262_v36  ;;  %v265_v46 = vsel %vm263_vm8, %v262_v36, %v260_v23 }
  0xed   :  { %v503_v50 = vadd.f32 %v501_v15, %v497_v25  ;;  %v504_v21 = vadd.f32 %v502_v39, %v498_v47  ;;  %v854_v14 = vadd.f32 %v852_v61, %v848_v9  ;;  %v1204_v30 = vadd.f32 %v1202_v38, %v1198_v42  ;;  %v271_v47 = vpop.permute.xlu1 %270 }
  0xee   :  { %v855_v22 = vadd.f32 %v853_v16, %v849_v19  ;;  %v1205_v35 = vadd.f32 %v1203_v2, %v1199_v24  ;;  %v266_v43 = vsel %vm3161_vm10, %v265_v46, 0.0  ;;  %v267_v41 = vsel %vm3113_vm9, %v264_v53, 0.0  ;;  %v269_v19 = vpop.permute.xlu0 %268 }
  0xef   :  { %v4460_v12 = vstv %s4453_s8  ;;  %v4462_v8 = vstv %s4456_s13  ;;  %v4465_v25 = vstv %s4459_s16  ;;  %v272_v15 = vsel %vm263_vm8, %v269_v19, %v271_v47  ;;  %s4473_s8 = sld [smem:[#allocation49_spill]]  ;;  %s4474_s13 = sld [smem:[#allocation50_spill]] }
  0xf0   :  { %v507_v40 = vmul.f32 %v4460_v12, %v266_v43  ;;  %v4461_v44 = vmov %v4460_v12  ;;  %v858_v34 = vmul.f32 %v4462_v8, %v266_v43  ;;  %v4463_v36 = vmov %v4462_v8  ;;  %s4477_s16 = sld [smem:[#allocation51_spill]] }
  0xf1   :  { %v508_v11 = vmul.f32 %v4461_v44, %v267_v41  ;;  %v859_v23 = vmul.f32 %v4463_v36, %v267_v41  ;;  %v1208_v24 = vmul.f32 %v4465_v25, %v266_v43  ;;  %v4467_v9 = vmov %v4465_v25 }
  0xf2   :  { %v1209_v42 = vmul.f32 %v4467_v9, %v267_v41  ;;  %v273_v39 = vsel %vm263_vm8, %v271_v47, %v269_v19  ;;  %v509_v61 = vadd.f32 %v507_v40, %v503_v50  ;;  %v860_v38 = vadd.f32 %v858_v34, %v854_v14  ;;  %v279_v14 = vpop.permute.xlu1 %278 }
  0xf3   :  { %v510_v16 = vadd.f32 %v508_v11, %v504_v21  ;;  %v861_v2 = vadd.f32 %v859_v23, %v855_v22  ;;  %v1210_v53 = vadd.f32 %v1208_v24, %v1204_v30  ;;  %v274_v43 = vsel %vm3161_vm10, %v273_v39, 0.0  ;;  %v277_v22 = vpop.permute.xlu0 %276 }
  0xf4   :  { %v1211_v46 = vadd.f32 %v1209_v42, %v1205_v35  ;;  %v275_v41 = vsel %vm3113_vm9, %v272_v15, 0.0  ;;  %v4469_v12 = vstv %s4464_s10  ;;  %v4471_v47 = vstv %s4466_s17  ;;  %s4482_s10 = sld [smem:[#allocation52_spill]]  ;;  %s4483_s17 = sld [smem:[#allocation53_spill]] }
  0xf5   :  { %v513_v44 = vmul.f32 %v4469_v12, %v274_v43  ;;  %v4470_v8 = vmov %v4469_v12  ;;  %v864_v50 = vmul.f32 %v4471_v47, %v274_v43  ;;  %v4472_v40 = vmov %v4471_v47 }
  0xf6   :  { %v514_v36 = vmul.f32 %v4470_v8, %v275_v41  ;;  %v865_v21 = vmul.f32 %v4472_v40, %v275_v41  ;;  %v4475_v30 = vstv %s4468_s3  ;;  %v280_v23 = vsel %vm263_vm8, %v277_v22, %v279_v14  ;;  %s4486_s3 = sld [smem:[#allocation54_spill]] }
  0xf7   :  { %v1214_v35 = vmul.f32 %v4475_v30, %v274_v43  ;;  %v4476_v11 = vmov %v4475_v30  ;;  %v281_v19 = vsel %vm263_vm8, %v279_v14, %v277_v22  ;;  %v515_v25 = vadd.f32 %v513_v44, %v509_v61 }
  0xf8   :  { %v1215_v34 = vmul.f32 %v4476_v11, %v275_v41  ;;  %v516_v24 = vadd.f32 %v514_v36, %v510_v16  ;;  %v866_v9 = vadd.f32 %v864_v50, %v860_v38  ;;  %v867_v42 = vadd.f32 %v865_v21, %v861_v2  ;;  %v287_v16 = vpop.permute.xlu1 %286  ;;  %v285_v38 = vpop.permute.xlu0 %284 }
  0xf9   :  { %v1216_v15 = vadd.f32 %v1214_v35, %v1210_v53  ;;  %v282_v12 = vsel %vm3161_vm10, %v281_v19, 0.0  ;;  %v283_v43 = vsel %vm3113_vm9, %v280_v23, 0.0  ;;  %v4478_v41 = vstv %s4473_s8  ;;  %s4491_s8 = sld [smem:[#allocation55_spill]] }
  0xfa   :  { %v1217_v39 = vadd.f32 %v1215_v34, %v1211_v46  ;;  %v519_v8 = vmul.f32 %v4478_v41, %v282_v12  ;;  %v4479_v47 = vmov %v4478_v41  ;;  %v4480_v30 = vstv %s4474_s13  ;;  %s4492_s13 = sld [smem:[#allocation56_spill]] }
  0xfb   :  { %v520_v40 = vmul.f32 %v4479_v47, %v283_v43  ;;  %v870_v11 = vmul.f32 %v4480_v30, %v282_v12  ;;  %v4481_v14 = vmov %v4480_v30  ;;  %v4484_v2 = vstv %s4477_s16  ;;  %s4495_s16 = sld [smem:[#allocation57_spill]] }
  0xfc   :  { %v871_v61 = vmul.f32 %v4481_v14, %v283_v43  ;;  %v1220_v53 = vmul.f32 %v4484_v2, %v282_v12  ;;  %v4485_v46 = vmov %v4484_v2  ;;  %v288_v36 = vsel %vm263_vm8, %v285_v38, %v287_v16 }
  0xfd   :  { %v1221_v44 = vmul.f32 %v4485_v46, %v283_v43  ;;  %v289_v50 = vsel %vm263_vm8, %v287_v16, %v285_v38  ;;  %v521_v21 = vadd.f32 %v519_v8, %v515_v25  ;;  %v522_v22 = vadd.f32 %v520_v40, %v516_v24  ;;  %v295_v24 = vpop.permute.xlu1 %294 }
  0xfe   :  { %v872_v35 = vadd.f32 %v870_v11, %v866_v9  ;;  %v873_v34 = vadd.f32 %v871_v61, %v867_v42  ;;  %v1222_v23 = vadd.f32 %v1220_v53, %v1216_v15  ;;  %v290_v41 = vsel %vm3161_vm10, %v289_v50, 0.0  ;;  %v293_v9 = vpop.permute.xlu0 %292 }
  0xff   :  { %v1223_v19 = vadd.f32 %v1221_v44, %v1217_v39  ;;  %v291_v12 = vsel %vm3113_vm9, %v288_v36, 0.0  ;;  %v4487_v43 = vstv %s4482_s10  ;;  %v4489_v2 = vstv %s4483_s17  ;;  %s4500_s10 = sld [smem:[#allocation58_spill]]  ;;  %s4502_s17 = sld [smem:[#allocation59_spill]] }
 0x100   :  { %v525_v47 = vmul.f32 %v4487_v43, %v290_v41  ;;  %v4488_v30 = vmov %v4487_v43  ;;  %v876_v46 = vmul.f32 %v4489_v2, %v290_v41  ;;  %v4490_v16 = vmov %v4489_v2 }
 0x101   :  { %v526_v14 = vmul.f32 %v4488_v30, %v291_v12  ;;  %v877_v25 = vmul.f32 %v4490_v16, %v291_v12  ;;  %v4493_v42 = vstv %s4486_s3  ;;  %v297_v40 = vsel %vm4302_vm11, %v293_v9, %v295_v24  ;;  %s4504_s3 = sld [smem:[#allocation60_spill]] }
 0x102   :  { %v1226_v15 = vmul.f32 %v4493_v42, %v290_v41  ;;  %v4494_v39 = vmov %v4493_v42  ;;  %v298_v11 = vsel %vm4302_vm11, %v295_v24, %v293_v9  ;;  %v527_v61 = vadd.f32 %v525_v47, %v521_v21  ;;  %v304_v21 = vpop.permute.xlu1 %303 }
 0x103   :  { %v1227_v8 = vmul.f32 %v4494_v39, %v291_v12  ;;  %v528_v38 = vadd.f32 %v526_v14, %v522_v22  ;;  %v878_v53 = vadd.f32 %v876_v46, %v872_v35  ;;  %v879_v44 = vadd.f32 %v877_v25, %v873_v34  ;;  %v302_v22 = vpop.permute.xlu0 %301 }
 0x104   :  { %v1228_v36 = vadd.f32 %v1226_v15, %v1222_v23  ;;  %v299_v43 = vsel %vm2858_vm2, %v298_v11, 0.0  ;;  %v300_v41 = vsel %vm2905_vm4, %v297_v40, 0.0  ;;  %v4496_v12 = vstv %s4491_s8  ;;  %s4509_s8 = sld [smem:[#allocation61_spill]] }
 0x105   :  { %v1229_v50 = vadd.f32 %v1227_v8, %v1223_v19  ;;  %v531_v30 = vmul.f32 %v4496_v12, %v299_v43  ;;  %v4497_v2 = vmov %v4496_v12  ;;  %v4498_v42 = vstv %s4492_s13  ;;  %s4510_s13 = sld [smem:[#allocation62_spill]] }
 0x106   :  { %v532_v16 = vmul.f32 %v4497_v2, %v300_v41  ;;  %v882_v39 = vmul.f32 %v4498_v42, %v299_v43  ;;  %v4499_v24 = vmov %v4498_v42  ;;  %v4501_v35 = vstv %s4495_s16  ;;  %s4513_s16 = sld [smem:[#allocation63_spill]] }
 0x107   :  { %v883_v9 = vmul.f32 %v4499_v24, %v300_v41  ;;  %v1232_v34 = vmul.f32 %v4501_v35, %v299_v43  ;;  %v4503_v23 = vmov %v4501_v35  ;;  %v305_v47 = vsel %vm4302_vm11, %v302_v22, %v304_v21 }
 0x108   :  { %v1233_v19 = vmul.f32 %v4503_v23, %v300_v41  ;;  %v306_v14 = vsel %vm4302_vm11, %v304_v21, %v302_v22  ;;  %v533_v46 = vadd.f32 %v531_v30, %v527_v61  ;;  %v534_v25 = vadd.f32 %v532_v16, %v528_v38 }
 0x109   :  { %v884_v15 = vadd.f32 %v882_v39, %v878_v53  ;;  %v885_v8 = vadd.f32 %v883_v9, %v879_v44  ;;  %v1234_v40 = vadd.f32 %v1232_v34, %v1228_v36  ;;  %v307_v43 = vsel %vm2858_vm2, %v306_v14, 0.0  ;;  %v312_v53 = vpop.permute.xlu1 %311  ;;  %v310_v44 = vpop.permute.xlu0 %309 }
 0x10a   :  { %v1235_v11 = vadd.f32 %v1233_v19, %v1229_v50  ;;  %v308_v41 = vsel %vm2905_vm4, %v305_v47, 0.0  ;;  %v4505_v12 = vstv %s4500_s10  ;;  %v4507_v21 = vstv %s4502_s17  ;;  %s4518_s10 = sld [smem:[#allocation64_spill]]  ;;  %s4521_s17 = sld [smem:[#allocation65_spill]] }
 0x10b   :  { %v537_v2 = vmul.f32 %v4505_v12, %v307_v43  ;;  %v4506_v42 = vmov %v4505_v12  ;;  %v888_v61 = vmul.f32 %v4507_v21, %v307_v43  ;;  %v4508_v30 = vmov %v4507_v21 }
 0x10c   :  { %v538_v24 = vmul.f32 %v4506_v42, %v308_v41  ;;  %v889_v38 = vmul.f32 %v4508_v30, %v308_v41  ;;  %v4511_v36 = vstv %s4504_s3  ;;  %v313_v9 = vsel %vm4302_vm11, %v310_v44, %v312_v53  ;;  %s3315_s3 = sld [smem:[#allocation7 + $0x23]] }
 0x10d   :  { %v1238_v50 = vmul.f32 %v4511_v36, %v307_v43  ;;  %v4512_v16 = vmov %v4511_v36  ;;  %v314_v22 = vsel %vm4302_vm11, %v312_v53, %v310_v44  ;;  %v539_v35 = vadd.f32 %v537_v2, %v533_v46  ;;  %v320_v46 = vpop.permute.xlu1 %319 }
 0x10e   :  { %v1239_v39 = vmul.f32 %v4512_v16, %v308_v41  ;;  %v540_v34 = vadd.f32 %v538_v24, %v534_v25  ;;  %v890_v23 = vadd.f32 %v888_v61, %v884_v15  ;;  %v891_v19 = vadd.f32 %v889_v38, %v885_v8  ;;  %v318_v25 = vpop.permute.xlu0 %317 }
 0x10f   :  { %v1240_v47 = vadd.f32 %v1238_v50, %v1234_v40  ;;  %v315_v12 = vsel %vm2858_vm2, %v314_v22, 0.0  ;;  %v316_v43 = vsel %vm2905_vm4, %v313_v9, 0.0  ;;  %v4514_v41 = vstv %s4509_s8  ;;  %s4522_s8 = sld [smem:[#allocation66_spill]] }
 0x110   :  { %v1241_v14 = vadd.f32 %v1239_v39, %v1235_v11  ;;  %v543_v42 = vmul.f32 %v4514_v41, %v315_v12  ;;  %v4515_v21 = vmov %v4514_v41  ;;  %v4516_v36 = vstv %s4510_s13  ;;  %s3317_s13 = sld [smem:[#allocation7 + $0x47]] }
 0x111   :  { %v544_v30 = vmul.f32 %v4515_v21, %v316_v43  ;;  %v894_v16 = vmul.f32 %v4516_v36, %v315_v12  ;;  %v4517_v53 = vmov %v4516_v36  ;;  %v4519_v15 = vstv %s4513_s16  ;;  %s4529_s16 = sld [smem:[#allocation67_spill]] }
 0x112   :  { %v895_v44 = vmul.f32 %v4517_v53, %v316_v43  ;;  %v1244_v8 = vmul.f32 %v4519_v15, %v315_v12  ;;  %v4520_v40 = vmov %v4519_v15  ;;  %v321_v2 = vsel %vm4302_vm11, %v318_v25, %v320_v46 }
 0x113   :  { %v1245_v11 = vmul.f32 %v4520_v40, %v316_v43  ;;  %v322_v24 = vsel %vm4302_vm11, %v320_v46, %v318_v25  ;;  %v545_v61 = vadd.f32 %v543_v42, %v539_v35  ;;  %v546_v38 = vadd.f32 %v544_v30, %v540_v34  ;;  %v328_v35 = vpop.permute.xlu1 %327  ;;  %v326_v34 = vpop.permute.xlu0 %325 }
 0x114   :  { %v896_v50 = vadd.f32 %v894_v16, %v890_v23  ;;  %v897_v39 = vadd.f32 %v895_v44, %v891_v19  ;;  %v1246_v9 = vadd.f32 %v1244_v8, %v1240_v47  ;;  %v323_v12 = vsel %vm2858_vm2, %v322_v24, 0.0 }
 0x115   :  { %v1247_v22 = vadd.f32 %v1245_v11, %v1241_v14  ;;  %v324_v43 = vsel %vm2905_vm4, %v321_v2, 0.0  ;;  %v4523_v41 = vstv %s4518_s10  ;;  %v4525_v46 = vstv %s4521_s17  ;;  %s4536_s10 = sld [smem:[#allocation72_spill]]  ;;  %s4541_s17 = sld [smem:[#allocation73_spill]] }
 0x116   :  { %v549_v21 = vmul.f32 %v4523_v41, %v323_v12  ;;  %v4524_v36 = vmov %v4523_v41  ;;  %v900_v25 = vmul.f32 %v4525_v46, %v323_v12  ;;  %v4526_v15 = vmov %v4525_v46 }
 0x117   :  { %v550_v53 = vmul.f32 %v4524_v36, %v324_v43  ;;  %v901_v40 = vmul.f32 %v4526_v15, %v324_v43  ;;  %v4527_v23 = vstv %s4522_s8  ;;  %v330_v42 = vsel %vm329_vm12, %v326_v34, %v328_v35  ;;  %s4534_s8 = sld [smem:[#allocation70_spill]] }
 0x118   :  { %v1250_v19 = vmul.f32 %v4527_v23, %v323_v12  ;;  %v4528_v47 = vmov %v4527_v23  ;;  %v331_v30 = vsel %vm329_vm12, %v328_v35, %v326_v34  ;;  %v551_v16 = vadd.f32 %v549_v21, %v545_v61 }
 0x119   :  { %v1251_v14 = vmul.f32 %v4528_v47, %v324_v43  ;;  %v552_v44 = vadd.f32 %v550_v53, %v546_v38  ;;  %v902_v8 = vadd.f32 %v900_v25, %v896_v50  ;;  %v903_v11 = vadd.f32 %v901_v40, %v897_v39  ;;  %v337_v50 = vpop.permute.xlu1 %336  ;;  %v335_v39 = vpop.permute.xlu0 %334 }
 0x11a   :  { %v1252_v2 = vadd.f32 %v1250_v19, %v1246_v9  ;;  %v332_v41 = vsel %vm3094_vm7, %v330_v42, 0.0  ;;  %v333_v12 = vsel %vm3113_vm9, %v331_v30, 0.0  ;;  %v579_v43 = vadd.f32 %v2642_v27, %v551_v16 }
 0x11b   :  { %v1253_v24 = vadd.f32 %v1251_v14, %v1247_v22  ;;  %v580_v36 = vadd.f32 %v2645_v0, %v552_v44  ;;  %v930_v61 = vadd.f32 %v2660_v56, %v902_v8  ;;  %v931_v38 = vadd.f32 %v2668_v63, %v903_v11 }
 0x11c   :  { %v1280_v9 = vadd.f32 %v2725_v55, %v1252_v2  ;;  %v756_v21 = vstv %s3315_s3  ;;  %v1107_v53 = vstv %s3317_s13  ;;  %v607_v46 = vadd.f32 %v2654_v13, %v579_v43 }
 0x11d   :  { %v1281_v22 = vadd.f32 %v2738_v6, %v1253_v24  ;;  %v608_v27 = vadd.f32 %v2657_v58, %v580_v36  ;;  %v958_v0 = vadd.f32 %v2711_v7, %v930_v61  ;;  %v959_v56 = vadd.f32 %v2722_v17, %v931_v38  ;;  %v345_v23 = vpop.permute.xlu1 %344  ;;  %v343_v7 = vpop.permute.xlu0 %342 }
 0x11e   :  { %v1308_v63 = vadd.f32 %v2748_v10, %v1280_v9  ;;  %v4531_v15 = vstv %s4529_s16  ;;  %v635_v35 = vadd.f32 %v2792_v54, %v607_v46  ;;  %v1019_v19 = vmul.f32 %v1017_v26, %v333_v12  ;;  %s4535_s16 = sld [smem:[#allocation71_spill]] }
 0x11f   :  { %v1309_v25 = vadd.f32 %v2760_v29, %v1281_v22  ;;  %v667_v55 = vmul.f32 %v4531_v15, %v332_v41  ;;  %v4532_v40 = vmov %v4531_v15  ;;  %v636_v13 = vadd.f32 %v2812_v32, %v608_v27 }
 0x120   :  { %v668_v6 = vmul.f32 %v4532_v40, %v333_v12  ;;  %v986_v34 = vadd.f32 %v2835_v62, %v958_v0  ;;  %v987_v58 = vadd.f32 %v2846_v5, %v959_v56  ;;  %v1336_v17 = vadd.f32 %v2934_v33, %v1308_v63 }
 0x121   :  { %v1337_v10 = vadd.f32 %v2937_v60, %v1309_v25  ;;  %v1018_v29 = vmul.f32 %v1017_v26, %v332_v41  ;;  %v663_v54 = vadd.f32 %v2815_v1, %v635_v35  ;;  %v664_v32 = vadd.f32 %v2832_v59, %v636_v13 }
 0x122   :  { %v1014_v62 = vadd.f32 %v2863_v31, %v986_v34  ;;  %v1015_v5 = vadd.f32 %v2866_v51, %v987_v58  ;;  %v1364_v47 = vadd.f32 %v2958_v4, %v1336_v17  ;;  %v338_v33 = vsel %vm329_vm12, %v335_v39, %v337_v50  ;;  %v353_v31 = vpop.permute.xlu1 %352  ;;  %v351_v51 = vpop.permute.xlu0 %350 }
 0x123   :  { %v1365_v14 = vadd.f32 %v2961_v49, %v1337_v10  ;;  %v339_v60 = vsel %vm329_vm12, %v337_v50, %v335_v39  ;;  %v669_v1 = vadd.f32 %v667_v55, %v663_v54  ;;  %v670_v59 = vadd.f32 %v668_v6, %v664_v32 }
 0x124   :  { %v1368_v26 = vmul.f32 %v1367_v57, %v332_v41  ;;  %v1369_v4 = vmul.f32 %v1367_v57, %v333_v12  ;;  %v1020_v49 = vadd.f32 %v1018_v29, %v1014_v62  ;;  %v1021_v42 = vadd.f32 %v1019_v19, %v1015_v5 }
 0x125   :  { %v340_v30 = vsel %vm3094_vm7, %v338_v33, 0.0  ;;  %v341_v16 = vsel %vm3113_vm9, %v339_v60, 0.0  ;;  %v4537_v11 = vstv %s4534_s8  ;;  %v4539_v41 = vstv %s4535_s16  ;;  %s4549_s8 = sld [smem:[#allocation75_spill]]  ;;  %s4550_s16 = sld [smem:[#allocation76_spill]] }
 0x126   :  { %v1370_v44 = vadd.f32 %v1368_v26, %v1364_v47  ;;  %v1371_v8 = vadd.f32 %v1369_v4, %v1365_v14  ;;  %v673_v2 = vmul.f32 %v4537_v11, %v340_v30  ;;  %v4538_v24 = vmov %v4537_v11  ;;  %v361_v0 = vpop.permute.xlu1 %360  ;;  %v359_v56 = vpop.permute.xlu0 %358 }
 0x127   :  { %v674_v57 = vmul.f32 %v4538_v24, %v341_v16  ;;  %v1024_v12 = vmul.f32 %v4539_v41, %v340_v30  ;;  %v4540_v43 = vmov %v4539_v41  ;;  %v346_v61 = vsel %vm329_vm12, %v343_v7, %v345_v23 }
 0x128   :  { %v1025_v36 = vmul.f32 %v4540_v43, %v341_v16  ;;  %v347_v38 = vsel %vm329_vm12, %v345_v23, %v343_v7  ;;  %v675_v50 = vadd.f32 %v673_v2, %v669_v1  ;;  %v4543_v9 = vstv %s4536_s10 }
 0x129   :  { %v676_v39 = vadd.f32 %v674_v57, %v670_v59  ;;  %v1374_v22 = vmul.f32 %v4543_v9, %v340_v30  ;;  %v4544_v46 = vmov %v4543_v9  ;;  %v1026_v63 = vadd.f32 %v1024_v12, %v1020_v49 }
 0x12a   :  { %v1375_v27 = vmul.f32 %v4544_v46, %v341_v16  ;;  %v1027_v25 = vadd.f32 %v1025_v36, %v1021_v42  ;;  %v348_v15 = vsel %vm3094_vm7, %v346_v61, 0.0  ;;  %v349_v55 = vsel %vm3113_vm9, %v347_v38, 0.0  ;;  %v370_v33 = vpop.permute.xlu1 %369  ;;  %v368_v60 = vpop.permute.xlu0 %367 }
 0x12b   :  { %v1376_v40 = vadd.f32 %v1374_v22, %v1370_v44  ;;  %v4545_v35 = vstv %s4541_s17  ;;  %v4547_v23 = vstv %s4542_s29  ;;  %v354_v29 = vsel %vm329_vm12, %v351_v51, %v353_v31  ;;  %s4557_s29 = sld [smem:[#allocation77_spill]] }
 0x12c   :  { %v1377_v6 = vadd.f32 %v1375_v27, %v1371_v8  ;;  %v679_v13 = vmul.f32 %v4545_v35, %v348_v15  ;;  %v4546_v34 = vmov %v4545_v35  ;;  %v1030_v7 = vmul.f32 %v4547_v23, %v348_v15 }
 0x12d   :  { %v680_v58 = vmul.f32 %v4546_v34, %v349_v55  ;;  %v4548_v17 = vmov %v4547_v23  ;;  %v355_v19 = vsel %vm329_vm12, %v353_v31, %v351_v51  ;;  %v4551_v62 = vstv %s2708_s11  ;;  %s4572_s11 = sld [smem:[#allocation78_spill]] }
 0x12e   :  { %v1031_v10 = vmul.f32 %v4548_v17, %v349_v55  ;;  %v681_v54 = vadd.f32 %v679_v13, %v675_v50  ;;  %v1380_v5 = vmul.f32 %v4551_v62, %v348_v15  ;;  %v4552_v47 = vmov %v4551_v62  ;;  %v376_v9 = vpop.permute.xlu0 %375 }
 0x12f   :  { %v682_v32 = vadd.f32 %v680_v58, %v676_v39  ;;  %v1381_v14 = vmul.f32 %v4552_v47, %v349_v55  ;;  %v1032_v1 = vadd.f32 %v1030_v7, %v1026_v63  ;;  %v356_v26 = vsel %vm3094_vm7, %v354_v29, 0.0  ;;  %v378_v39 = vpop.permute.xlu1 %377 }
 0x130   :  { %v1033_v59 = vadd.f32 %v1031_v10, %v1027_v25  ;;  %v357_v4 = vsel %vm3113_vm9, %v355_v19, 0.0  ;;  %v4553_v49 = vstv %s2717_s22  ;;  %v4555_v30 = vstv %s4549_s8  ;;  %s804_s22 = sld [smem:[#allocation10]] }
 0x131   :  { %v685_v31 = vmul.f32 %v4553_v49, %v356_v26  ;;  %v4554_v51 = vmov %v4553_v49  ;;  %v1036_v16 = vmul.f32 %v4555_v30, %v356_v26  ;;  %v4556_v44 = vmov %v4555_v30 }
 0x132   :  { %v686_v42 = vmul.f32 %v4554_v51, %v357_v4  ;;  %v1037_v8 = vmul.f32 %v4556_v44, %v357_v4  ;;  %v1382_v2 = vadd.f32 %v1380_v5, %v1376_v40  ;;  %v4560_v24 = vstv %s4550_s16  ;;  %v384_v62 = vpop.permute.xlu0 %383  ;;  %s4640_s16 = smov 17  }
 0x133   :  { %v1386_v57 = vmul.f32 %v4560_v24, %v356_v26  ;;  %v363_v41 = vsel %vm4299_vm14, %v359_v56, %v361_v0  ;;  %v364_v12 = vsel %vm4299_vm14, %v361_v0, %v359_v56  ;;  %v1383_v43 = vadd.f32 %v1381_v14, %v1377_v6 }
 0x134   :  { %v687_v36 = vadd.f32 %v685_v31, %v681_v54  ;;  %v688_v61 = vadd.f32 %v686_v42, %v682_v32  ;;  %v4561_v38 = vmov %v4560_v24  ;;  %v1038_v22 = vadd.f32 %v1036_v16, %v1032_v1  ;;  %v386_v32 = vpop.permute.xlu1 %385 }
 0x135   :  { %v1387_v50 = vmul.f32 %v4561_v38, %v357_v4  ;;  %v1039_v46 = vadd.f32 %v1037_v8, %v1033_v59  ;;  %v365_v27 = vsel %vm2858_vm2, %v363_v41, 0.0  ;;  %v366_v63 = vsel %vm3443_vm15, %v364_v12, 0.0 }
 0x136   :  { %v4562_v25 = vstv %s4557_s29  ;;  %v4564_v55 = vstv %s2743_s19  ;;  %v1388_v13 = vadd.f32 %v1386_v57, %v1382_v2  ;;  %v4566_v34 = vstv %s2745_s0  ;;  %s4631_s0 = sld [smem:[#allocation90_spill]]  ;;  %s4641_s29 = smov 15  }
 0x137   :  { %v691_v15 = vmul.f32 %v4562_v25, %v365_v27  ;;  %v4563_v0 = vmov %v4562_v25  ;;  %v1042_v40 = vmul.f32 %v4564_v55, %v365_v27  ;;  %v4565_v6 = vmov %v4564_v55 }
 0x138   :  { %v692_v56 = vmul.f32 %v4563_v0, %v366_v63  ;;  %v1043_v35 = vmul.f32 %v4565_v6, %v366_v63  ;;  %v1392_v58 = vmul.f32 %v4566_v34, %v365_v27  ;;  %v371_v23 = vsel %vm4299_vm14, %v368_v60, %v370_v33 }
 0x139   :  { %v372_v7 = vsel %vm4299_vm14, %v370_v33, %v368_v60  ;;  %v1389_v17 = vadd.f32 %v1387_v50, %v1383_v43  ;;  %v693_v10 = vadd.f32 %v691_v15, %v687_v36  ;;  %v4567_v19 = vmov %v4566_v34  ;;  %v394_v43 = vpop.permute.xlu1 %393  ;;  %v392_v36 = vpop.permute.xlu0 %391 }
 0x13a   :  { %v694_v29 = vadd.f32 %v692_v56, %v688_v61  ;;  %v1393_v54 = vmul.f32 %v4567_v19, %v366_v63  ;;  %v1044_v5 = vadd.f32 %v1042_v40, %v1038_v22  ;;  %v1045_v47 = vadd.f32 %v1043_v35, %v1039_v46 }
 0x13b   :  { %v373_v14 = vsel %vm2858_vm2, %v371_v23, 0.0  ;;  %v374_v1 = vsel %vm3443_vm15, %v372_v7, 0.0  ;;  %v4568_v33 = vstv %s2755_s30  ;;  %v4570_v4 = vstv %s2757_s6  ;;  %s4579_s30 = sld [smem:[#allocation79_spill]] }
 0x13c   :  { %v697_v60 = vmul.f32 %v4568_v33, %v373_v14  ;;  %v4569_v59 = vmov %v4568_v33  ;;  %v1048_v49 = vmul.f32 %v4570_v4, %v373_v14  ;;  %v4571_v31 = vmov %v4570_v4 }
 0x13d   :  { %v698_v26 = vmul.f32 %v4569_v59, %v374_v1  ;;  %v1049_v51 = vmul.f32 %v4571_v31, %v374_v1  ;;  %v1394_v42 = vadd.f32 %v1392_v58, %v1388_v13  ;;  %v4573_v30 = vstv %s2767_s1 }
 0x13e   :  { %v1398_v16 = vmul.f32 %v4573_v30, %v373_v14  ;;  %v379_v44 = vsel %vm4299_vm14, %v376_v9, %v378_v39  ;;  %v380_v8 = vsel %vm4299_vm14, %v378_v39, %v376_v9  ;;  %v1395_v2 = vadd.f32 %v1393_v54, %v1389_v17  ;;  %v403_v17 = vpop.permute.xlu1 %402 }
 0x13f   :  { %v699_v24 = vadd.f32 %v697_v60, %v693_v10  ;;  %v700_v57 = vadd.f32 %v698_v26, %v694_v29  ;;  %v4574_v41 = vmov %v4573_v30  ;;  %v1050_v61 = vadd.f32 %v1048_v49, %v1044_v5  ;;  %v401_v10 = vpop.permute.xlu0 %400 }
 0x140   :  { %v1399_v12 = vmul.f32 %v4574_v41, %v374_v1  ;;  %v1051_v38 = vadd.f32 %v1049_v51, %v1045_v47  ;;  %v381_v50 = vsel %vm2858_vm2, %v379_v44, 0.0  ;;  %v382_v22 = vsel %vm3443_vm15, %v380_v8, 0.0 }
 0x141   :  { %v4575_v46 = vstv %s4572_s11  ;;  %v4577_v63 = vstv %s2775_s28  ;;  %v1400_v56 = vadd.f32 %v1398_v16, %v1394_v42  ;;  %v4580_v55 = vstv %s2777_s27  ;;  %s4598_s27 = sld [smem:[#allocation82_spill]]  ;;  %s4600_s28 = sld [smem:[#allocation83_spill]] }
 0x142   :  { %v703_v27 = vmul.f32 %v4575_v46, %v381_v50  ;;  %v4576_v39 = vmov %v4575_v46  ;;  %v1054_v25 = vmul.f32 %v4577_v63, %v381_v50  ;;  %v4578_v15 = vmov %v4577_v63  ;;  %s4642_s11 = smov 16  }
 0x143   :  { %v704_v9 = vmul.f32 %v4576_v39, %v382_v22  ;;  %v1055_v0 = vmul.f32 %v4578_v15, %v382_v22  ;;  %v1404_v40 = vmul.f32 %v4580_v55, %v381_v50  ;;  %v387_v6 = vsel %vm4299_vm14, %v384_v62, %v386_v32 }
 0x144   :  { %v388_v35 = vsel %vm4299_vm14, %v386_v32, %v384_v62  ;;  %v1401_v13 = vadd.f32 %v1399_v12, %v1395_v2  ;;  %v705_v34 = vadd.f32 %v703_v27, %v699_v24  ;;  %v4581_v23 = vmov %v4580_v55  ;;  %v411_v2 = vpop.permute.xlu1 %410  ;;  %v409_v24 = vpop.permute.xlu0 %408 }
 0x145   :  { %v706_v58 = vadd.f32 %v704_v9, %v700_v57  ;;  %v1405_v7 = vmul.f32 %v4581_v23, %v382_v22  ;;  %v1056_v29 = vadd.f32 %v1054_v25, %v1050_v61  ;;  %v1057_v19 = vadd.f32 %v1055_v0, %v1051_v38 }
 0x146   :  { %v389_v54 = vsel %vm2858_vm2, %v387_v6, 0.0  ;;  %v390_v5 = vsel %vm3443_vm15, %v388_v35, 0.0  ;;  %v4582_v47 = vstv %s4579_s30  ;;  %v4584_v1 = vstv %s2789_s5  ;;  %s4643_s30 = smov 1  }
 0x147   :  { %v709_v14 = vmul.f32 %v4582_v47, %v389_v54  ;;  %v4583_v32 = vmov %v4582_v47  ;;  %v1060_v33 = vmul.f32 %v4584_v1, %v389_v54  ;;  %v4585_v60 = vmov %v4584_v1 }
 0x148   :  { %v710_v62 = vmul.f32 %v4583_v32, %v390_v5  ;;  %v1061_v59 = vmul.f32 %v4585_v60, %v390_v5  ;;  %v1406_v26 = vadd.f32 %v1404_v40, %v1400_v56  ;;  %v4586_v4 = vstv %s2797_s18  ;;  %s4624_s18 = sld [smem:[#allocation89_spill]] }
 0x149   :  { %v1410_v49 = vmul.f32 %v4586_v4, %v389_v54  ;;  %v396_v31 = vsel %vm4300_vm0, %v392_v36, %v394_v43  ;;  %v397_v51 = vsel %vm4300_vm0, %v394_v43, %v392_v36  ;;  %v1407_v42 = vadd.f32 %v1405_v7, %v1401_v13  ;;  %v419_v13 = vpop.permute.xlu1 %418 }
 0x14a   :  { %v711_v30 = vadd.f32 %v709_v14, %v705_v34  ;;  %v1062_v16 = vadd.f32 %v1060_v33, %v1056_v29  ;;  %v4587_v44 = vmov %v4586_v4  ;;  %v712_v57 = vadd.f32 %v710_v62, %v706_v58  ;;  %v417_v34 = vpop.permute.xlu0 %416 }
 0x14b   :  { %v1411_v8 = vmul.f32 %v4587_v44, %v390_v5  ;;  %v1063_v41 = vadd.f32 %v1061_v59, %v1057_v19  ;;  %v399_v12 = vsel %vm4301_vm13, %v397_v51, 0.0  ;;  %v4588_v61 = vstv %s2799_s14  ;;  %s4607_s14 = sld [smem:[#allocation86_spill]] }
 0x14c   :  { %v715_v38 = vmul.f32 %v4588_v61, %v396_v31  ;;  %v1412_v50 = vadd.f32 %v1410_v49, %v1406_v26  ;;  %v4589_v22 = vmov %v4588_v61  ;;  %v4590_v27 = vstv %s2807_s26 }
 0x14d   :  { %v716_v46 = vmul.f32 %v4589_v22, %v399_v12  ;;  %v1066_v43 = vmul.f32 %v4590_v27, %v396_v31  ;;  %v4591_v36 = vmov %v4590_v27  ;;  %v4592_v9 = vstv %s2809_s15  ;;  %s4619_s15 = sld [smem:[#allocation88_spill]] }
 0x14e   :  { %v1067_v39 = vmul.f32 %v4591_v36, %v399_v12  ;;  %v1416_v63 = vmul.f32 %v4592_v9, %v396_v31  ;;  %v4593_v25 = vmov %v4592_v9  ;;  %v404_v0 = vsel %vm4300_vm0, %v401_v10, %v403_v17 }
 0x14f   :  { %v1417_v15 = vmul.f32 %v4593_v25, %v399_v12  ;;  %v405_v56 = vsel %vm4300_vm0, %v403_v17, %v401_v10  ;;  %vm428_vm14 = vcmp.lt.s32.totalorder %v2490_v37, 111  ;;  %v1413_v55 = vadd.f32 %v1411_v8, %v1407_v42  ;;  %v427_v42 = vpop.permute.xlu1 %426 }
 0x150   :  { %v717_v40 = vadd.f32 %v715_v38, %v711_v30  ;;  %v718_v6 = vadd.f32 %v716_v46, %v712_v57  ;;  %v1068_v35 = vadd.f32 %v1066_v43, %v1062_v16  ;;  %v1069_v58 = vadd.f32 %v1067_v39, %v1063_v41  ;;  %v425_v30 = vpop.permute.xlu0 %424 }
 0x151   :  { %v407_v23 = vsel %vm4301_vm13, %v405_v56, 0.0  ;;  %v4594_v7 = vstv %s4392_s7  ;;  %v4595_v19 = vstv %s4393_s2  ;;  %v4599_v10 = vstv %s2841_s20  ;;  %s4602_s7 = sld [smem:[#allocation84_spill]]  ;;  %s4605_s2 = sld [smem:[#allocation85_spill]] }
 0x152   :  { %v721_v29 = vmul.f32 %v4594_v7, %v404_v0  ;;  %v1072_v54 = vmul.f32 %v4595_v19, %v404_v0  ;;  %v4596_v5 = vmov %v4594_v7  ;;  %v4597_v14 = vmov %v4595_v19  ;;  %s3633_s20 = sld [smem:[#allocation7 + $0x6b]] }
 0x153   :  { %v722_v47 = vmul.f32 %v4596_v5, %v407_v23  ;;  %v1073_v17 = vmul.f32 %v4597_v14, %v407_v23  ;;  %v1422_v32 = vmul.f32 %v4599_v10, %v404_v0  ;;  %v4601_v62 = vmov %v4599_v10  ;;  %v436_v56 = vpop.permute.xlu1 %435 }
 0x154   :  { %v1423_v1 = vmul.f32 %v4601_v62, %v407_v23  ;;  %v1418_v33 = vadd.f32 %v1416_v63, %v1412_v50  ;;  %v1419_v60 = vadd.f32 %v1417_v15, %v1413_v55  ;;  %v412_v59 = vsel %vm4300_vm0, %v409_v24, %v411_v2  ;;  %v434_v55 = vpop.permute.xlu0 %433 }
 0x155   :  { %v413_v26 = vsel %vm4300_vm0, %v411_v2, %v409_v24  ;;  %v723_v4 = vadd.f32 %v721_v29, %v717_v40  ;;  %v724_v49 = vadd.f32 %v722_v47, %v718_v6  ;;  %v1074_v31 = vadd.f32 %v1072_v54, %v1068_v35 }
 0x156   :  { %v1075_v51 = vadd.f32 %v1073_v17, %v1069_v58  ;;  %v1424_v16 = vadd.f32 %v1422_v32, %v1418_v33  ;;  %v415_v44 = vsel %vm4301_vm13, %v413_v26, 0.0  ;;  %v4603_v8 = vstv %s4598_s27  ;;  %s4644_s27 = smov 127  }
 0x157   :  { %v727_v57 = vmul.f32 %v4603_v8, %v412_v59  ;;  %v4604_v41 = vstv %s4600_s28  ;;  %v1425_v61 = vadd.f32 %v1423_v1, %v1419_v60  ;;  %v4606_v2 = vmov %v4603_v8  ;;  %v444_v8 = vpop.permute.xlu1 %443  ;;  %s4645_s28 = smov 113  }
 0x158   :  { %v1078_v12 = vmul.f32 %v4604_v41, %v412_v59  ;;  %v728_v24 = vmul.f32 %v4606_v2, %v415_v44  ;;  %v4608_v38 = vmov %v4604_v41  ;;  %v420_v22 = vsel %vm4300_vm0, %v417_v34, %v419_v13 }
 0x159   :  { %v1079_v50 = vmul.f32 %v4608_v38, %v415_v44  ;;  %v729_v46 = vadd.f32 %v727_v57, %v723_v4  ;;  %v4609_v27 = vstv %s4602_s7  ;;  %v421_v9 = vsel %vm4300_vm0, %v419_v13, %v417_v34  ;;  %vm3605_vm0 = vmand %vm4301_vm13, %vm3113_vm9  ;;  %v442_v57 = vpop.permute.xlu0 %441  ;;  %s4646_s7 = smov 112  }
 0x15a   :  { %v1428_v43 = vmul.f32 %v4609_v27, %v412_v59  ;;  %v4610_v36 = vmov %v4609_v27  ;;  %v730_v63 = vadd.f32 %v728_v24, %v724_v49  ;;  %v1080_v25 = vadd.f32 %v1078_v12, %v1074_v31 }
 0x15b   :  { %v1429_v39 = vmul.f32 %v4610_v36, %v415_v44  ;;  %v1081_v15 = vadd.f32 %v1079_v50, %v1075_v51  ;;  %v423_v0 = vsel %vm4301_vm13, %v421_v9, 0.0  ;;  %v4611_v40 = vstv %s4605_s2  ;;  %s4647_s2 = smov 111  }
 0x15c   :  { %v733_v6 = vmul.f32 %v4611_v40, %v420_v22  ;;  %v4612_v35 = vmov %v4611_v40  ;;  %v4613_v23 = vstv %s4607_s14  ;;  %v4617_v34 = vstv %s2883_s25  ;;  %s796_s25 = sld [smem:[#allocation8]]  ;;  %s1979_s14 = sld [smem:[#allocation8 + $0x1]] }
 0x15d   :  { %v734_v58 = vmul.f32 %v4612_v35, %v423_v0  ;;  %v1084_v7 = vmul.f32 %v4613_v23, %v420_v22  ;;  %v4614_v29 = vmov %v4613_v23  ;;  %v1434_v54 = vmul.f32 %v4617_v34, %v420_v22 }
 0x15e   :  { %v1085_v19 = vmul.f32 %v4614_v29, %v423_v0  ;;  %v4618_v5 = vmov %v4617_v34  ;;  %v429_v14 = vsel %vm428_vm14, %v425_v30, %v427_v42  ;;  %v430_v17 = vsel %vm428_vm14, %v427_v42, %v425_v30 }
 0x15f   :  { %v1435_v47 = vmul.f32 %v4618_v5, %v423_v0  ;;  %v1430_v10 = vadd.f32 %v1428_v43, %v1424_v16  ;;  %v1431_v32 = vadd.f32 %v1429_v39, %v1425_v61  ;;  %v735_v62 = vadd.f32 %v733_v6, %v729_v46 }
 0x160   :  { %v736_v1 = vadd.f32 %v734_v58, %v730_v63  ;;  %v1086_v33 = vadd.f32 %v1084_v7, %v1080_v25  ;;  %v1087_v60 = vadd.f32 %v1085_v19, %v1081_v15  ;;  %v431_v59 = vsel %vm3094_vm7, %v429_v14, 0.0  ;;  %v452_v14 = vpop.permute.xlu1 %451 }
 0x161   :  { %v432_v26 = vsel %vm3605_vm0, %v430_v17, 0.0  ;;  %v4620_v4 = vstv %s4394_s21  ;;  %v4622_v44 = vstv %s2899_s4  ;;  %v1436_v41 = vadd.f32 %v1434_v54, %v1430_v10  ;;  %v450_v17 = vpop.permute.xlu0 %449 }
 0x162   :  { %v739_v49 = vmul.f32 %v4620_v4, %v431_v59  ;;  %v4621_v31 = vmov %v4620_v4  ;;  %v1090_v42 = vmul.f32 %v4622_v44, %v431_v59  ;;  %v4623_v30 = vmov %v4622_v44 }
 0x163   :  { %v740_v51 = vmul.f32 %v4621_v31, %v432_v26  ;;  %v1091_v16 = vmul.f32 %v4623_v30, %v432_v26  ;;  %v1437_v12 = vadd.f32 %v1435_v47, %v1431_v32  ;;  %v437_v61 = vsel %vm428_vm14, %v434_v55, %v436_v56 }
 0x164   :  { %v438_v2 = vsel %vm428_vm14, %v436_v56, %v434_v55  ;;  %v741_v24 = vadd.f32 %v739_v49, %v735_v62  ;;  %v4625_v50 = vstv %s4619_s15  ;;  %v1092_v43 = vadd.f32 %v1090_v42, %v1086_v33  ;;  %s1980_s15 = sld [smem:[#allocation10 + $0x1]] }
 0x165   :  { %v742_v38 = vadd.f32 %v740_v51, %v736_v1  ;;  %v1440_v22 = vmul.f32 %v4625_v50, %v431_v59  ;;  %v4626_v46 = vmov %v4625_v50  ;;  %v1093_v36 = vadd.f32 %v1091_v16, %v1087_v60 }
 0x166   :  { %v1441_v27 = vmul.f32 %v4626_v46, %v432_v26  ;;  %v439_v39 = vsel %vm3094_vm7, %v437_v61, 0.0  ;;  %v440_v9 = vsel %vm3605_vm0, %v438_v2, 0.0  ;;  %v4627_v63 = vstv %s2913_s9 }
 0x167   :  { %v745_v25 = vmul.f32 %v4627_v63, %v439_v39  ;;  %v4628_v15 = vmov %v4627_v63  ;;  %v4629_v56 = vstv %s2915_s12  ;;  %v4632_v35 = vstv %s4624_s18 }
 0x168   :  { %v746_v0 = vmul.f32 %v4628_v15, %v440_v9  ;;  %v1096_v55 = vmul.f32 %v4629_v56, %v439_v39  ;;  %v4630_v40 = vmov %v4629_v56  ;;  %v1446_v58 = vmul.f32 %v4632_v35, %v439_v39 }
 0x169   :  { %v1097_v6 = vmul.f32 %v4630_v40, %v440_v9  ;;  %v4633_v23 = vmov %v4632_v35  ;;  %v445_v29 = vsel %vm428_vm14, %v442_v57, %v444_v8  ;;  %v446_v19 = vsel %vm428_vm14, %v444_v8, %v442_v57 }
 0x16a   :  { %v1447_v7 = vmul.f32 %v4633_v23, %v440_v9  ;;  %v1442_v34 = vadd.f32 %v1440_v22, %v1436_v41  ;;  %v1443_v54 = vadd.f32 %v1441_v27, %v1437_v12  ;;  %v747_v5 = vadd.f32 %v745_v25, %v741_v24 }
 0x16b   :  { %v748_v47 = vadd.f32 %v746_v0, %v742_v38  ;;  %v1098_v10 = vadd.f32 %v1096_v55, %v1092_v43  ;;  %v1099_v32 = vadd.f32 %v1097_v6, %v1093_v36  ;;  %v447_v62 = vsel %vm3094_vm7, %v445_v29, 0.0 }
 0x16c   :  { %v448_v1 = vsel %vm3605_vm0, %v446_v19, 0.0  ;;  %v4634_v33 = vstv %s4631_s0  ;;  %v4636_v4 = vstv %s2965_s23  ;;  %v1448_v44 = vadd.f32 %v1446_v58, %v1442_v34 }
 0x16d   :  { %v751_v60 = vmul.f32 %v4634_v33, %v447_v62  ;;  %v4635_v59 = vmov %v4634_v33  ;;  %v1102_v49 = vmul.f32 %v4636_v4, %v447_v62  ;;  %v4637_v31 = vmov %v4636_v4 }
 0x16e   :  { %v752_v26 = vmul.f32 %v4635_v59, %v448_v1  ;;  %v1103_v51 = vmul.f32 %v4637_v31, %v448_v1  ;;  %v1449_v42 = vadd.f32 %v1447_v7, %v1443_v54  ;;  %v1457_v30 = vstv %s3633_s20 }
 0x16f   :  { %v453_v16 = vsel %vm428_vm14, %v450_v17, %v452_v14  ;;  %v753_v8 = vadd.f32 %v751_v60, %v747_v5  ;;  %v4638_v41 = vstv %s2967_s24  ;;  %v1104_v24 = vadd.f32 %v1102_v49, %v1098_v10 }
 0x170   :  { %v754_v57 = vadd.f32 %v752_v26, %v748_v47  ;;  %v1452_v12 = vmul.f32 %v4638_v41, %v447_v62  ;;  %v4639_v61 = vmov %v4638_v41  ;;  %v1105_v38 = vadd.f32 %v1103_v51, %v1099_v32 }
 0x171   :  { %v1453_v2 = vmul.f32 %v4639_v61, %v448_v1  ;;  %v454_v50 = vsel %vm428_vm14, %v452_v14, %v450_v17  ;;  %v455_v22 = vsel %vm3094_vm7, %v453_v16, 0.0  ;;  %vm761_vm13 = vcmask 1041408  }
 0x172   :  { %v456_v46 = vsel %vm3605_vm0, %v454_v50, 0.0  ;;  %v757_v27 = vmul.f32 %v756_v21, %v455_v22  ;;  %v1108_v43 = vmul.f32 %v1107_v53, %v455_v22  ;;  %v1458_v36 = vmul.f32 %v1457_v30, %v455_v22 }
 0x173   :  { %v758_v39 = vmul.f32 %v756_v21, %v456_v46  ;;  %v1109_v9 = vmul.f32 %v1107_v53, %v456_v46  ;;  %v1459_v63 = vmul.f32 %v1457_v30, %v456_v46  ;;  %v1454_v0 = vadd.f32 %v1452_v12, %v1448_v44 }
 0x174   :  { %v3692_v25 = vadd.f32 %v757_v27, %v753_v8  ;;  %v3694_v15 = vadd.f32 %v1108_v43, %v1104_v24  ;;  %v1455_v56 = vadd.f32 %v1453_v2, %v1449_v42 }
 0x175   :  { %v3696_v55 = vadd.f32 %v758_v39, %v754_v57  ;;  %v3698_v40 = vadd.f32 %v1109_v9, %v1105_v38  ;;  %v3708_v58 = vadd.f32 %v1458_v36, %v1454_v0 }
 0x176   :  { %v762_v6 = vsel %vm761_vm13, %v3692_v25, 0.0  ;;  %v774_v21 = vmul.f32 %v3692_v25, %v3692_v25  ;;  %v3710_v23 = vadd.f32 %v1459_v63, %v1455_v56  ;;  %v1112_v19 = vsel %vm761_vm13, %v3694_v15, 0.0 }
 0x177   :  { %v763_v53 = vsel %vm761_vm13, %v3696_v55, 0.0  ;;  %v775_v35 = vmul.f32 %v3696_v55, %v3696_v55  ;;  %v1113_v54 = vsel %vm761_vm13, %v3698_v40, 0.0  ;;  %v1124_v5 = vmul.f32 %v3694_v15, %v3694_v15 }
 0x178   :  { %v764_v7 = vadd.f32 %v763_v53, %v762_v6  ;;  %v776_v29 = vsel %vm761_vm13, %v774_v21, 0.0  ;;  %v1125_v47 = vmul.f32 %v3698_v40, %v3698_v40  ;;  %v1462_v17 = vsel %vm761_vm13, %v3708_v58, 0.0 }
 0x179   :  { %v777_v34 = vsel %vm761_vm13, %v775_v35, 0.0  ;;  %v1463_v10 = vsel %vm761_vm13, %v3710_v23, 0.0  ;;  %v1114_v32 = vadd.f32 %v1113_v54, %v1112_v19  ;;  %v1126_v62 = vsel %vm761_vm13, %v1124_v5, 0.0 }
 0x17a   :  { %765 = vadd.xlane.f32.xlu0 %v764_v7  ;;  %v778_v14 = vadd.f32 %v777_v34, %v776_v29  ;;  %v1127_v1 = vsel %vm761_vm13, %v1125_v47, 0.0  ;;  %v1474_v33 = vmul.f32 %v3708_v58, %v3708_v58  ;;  %v1475_v60 = vmul.f32 %v3710_v23, %v3710_v23 }
 0x17b   :  { %v1464_v59 = vadd.f32 %v1463_v10, %v1462_v17  ;;  %v1128_v26 = vadd.f32 %v1127_v1, %v1126_v62 }
 0x17c   :  { %779 = vadd.xlane.f32.xlu1 %v778_v14  ;;  %v1476_v4 = vsel %vm761_vm13, %v1474_v33, 0.0  ;;  %v1477_v49 = vsel %vm761_vm13, %v1475_v60, 0.0  ;;  %vm4648_vm13 = vcmp.lt.s32.totalorder %v2490_v37, 113 }
 0x17d   :  { %v1478_v31 = vadd.f32 %v1477_v49, %v1476_v4 }
 0x17e   :  { %1115 = vadd.xlane.f32.xlu0 %v1114_v32  ;;  %v805_v32 = vstv %s804_s22 }
 0x180   :  { %1465 = vadd.xlane.f32.xlu1 %v1464_v59 }
 0x182   :  { %1129 = vadd.xlane.f32.xlu0 %v1128_v26 }
 0x186   :  { %1479 = vadd.xlane.f32.xlu0 %v1478_v31 }
 0x207   :  { %v766_v51 = vpop.xlane.xlu0 %765 }
 0x208   :  { %v767_v44 = vrot.slane %v766_v51, 4 }
 0x209   :  { %v780_v42 = vpop.xlane.xlu1 %779 }
 0x20a   :  { %v768_v30 = vadd.f32 %v767_v44, %v766_v51  ;;  %v781_v16 = vrot.slane %v780_v42, 4 }
 0x20b   :  { %v1116_v22 = vpop.xlane.xlu0 %1115 }
 0x20c   :  { %v769_v8 = vrot.slane %v768_v30, 2  ;;  %v782_v57 = vadd.f32 %v781_v16, %v780_v42  ;;  %v1117_v27 = vrot.slane %v1116_v22, 4 }
 0x20d   :  { %v1466_v19 = vpop.xlane.xlu1 %1465 }
 0x20e   :  { %v783_v41 = vrot.slane %v782_v57, 2  ;;  %v770_v12 = vadd.f32 %v769_v8, %v768_v30  ;;  %v1118_v36 = vadd.f32 %v1117_v27, %v1116_v22  ;;  %v1467_v5 = vrot.slane %v1466_v19, 4 }
 0x20f   :  { %v1130_v46 = vpop.xlane.xlu0 %1129 }
 0x210   :  { %v771_v61 = vrot.slane %v770_v12, 1  ;;  %v784_v2 = vadd.f32 %v783_v41, %v782_v57  ;;  %v1131_v43 = vrot.slane %v1130_v46, 4  ;;  %v1119_v9 = vrot.slane %v1118_v36, 2 }
 0x211   :  { %v1468_v33 = vadd.f32 %v1467_v5, %v1466_v19 }
 0x212   :  { %v772_v24 = vadd.f32 %v771_v61, %v770_v12  ;;  %v785_v38 = vrot.slane %v784_v2, 1  ;;  %v1132_v39 = vadd.f32 %v1131_v43, %v1130_v46  ;;  %v1120_v56 = vadd.f32 %v1119_v9, %v1118_v36 }
 0x213   :  { %v1480_v34 = vpop.xlane.xlu0 %1479  ;;  %v1155_v61 = vstv %s1980_s15  ;;  %s4007_s15 = sld [smem:[#allocation11 + $0x11]] }
 0x214   :  { %2048 = vpush %v772_v24  ;;  %v786_v50 = vadd.f32 %v785_v38, %v784_v2  ;;  %v1133_v63 = vrot.slane %v1132_v39, 2  ;;  %v1121_v21 = vrot.slane %v1120_v56, 1  ;;  %v1481_v47 = vrot.slane %v1480_v34, 4 }
 0x216   :  { %2050 = vpush %v786_v50  ;;  %v1134_v6 = vadd.f32 %v1133_v63, %v1132_v39  ;;  %v1122_v7 = vadd.f32 %v1121_v21, %v1120_v56  ;;  %v1482_v60 = vadd.f32 %v1481_v47, %v1480_v34 }
 0x218   :  { %v1135_v53 = vrot.slane %v1134_v6, 1 }
 0x21a   :  { %v1136_v29 = vadd.f32 %v1135_v53, %v1134_v6 }
 0x245   :  { %s2049_s9 = spop %2048 }
 0x246   :  { %s3734_s12 = smul.f32 0.001953125, %s2049_s9 }
 0x247   :  { %s2051_s23 = spop %2050 }
 0x248   :  { %s790_s1 = smul.f32 %s3734_s12, %s3734_s12  ;;  %v798_v54 = vstv %s3734_s12 }
 0x249   :  { %s789_s24 = smul.f32 0.001953125, %s2051_s23  ;;  %v799_v14 = vsub.f32 %v3692_v25, %v798_v54  ;;  %v800_v17 = vsub.f32 %v3696_v55, %v798_v54  ;;  %v1469_v25 = vrot.slane %v1468_v33, 2  ;;  %v1483_v55 = vrot.slane %v1482_v60, 2 }
 0x24b   :  { %s791_s4 = ssub.f32 %s789_s24, %s790_s1  ;;  %v1470_v49 = vadd.f32 %v1469_v25, %v1468_v33  ;;  %v1484_v31 = vadd.f32 %v1483_v55, %v1482_v60 }
 0x24d   :  { %s792_s6 = sadd.f32 1e-05, %s791_s4  ;;  %v1471_v51 = vrot.slane %v1470_v49, 1  ;;  %v1485_v44 = vrot.slane %v1484_v31, 1 }
 0x24f   :  { %v793_v0 = vstv %s792_s6  ;;  %v1472_v30 = vadd.f32 %v1471_v51, %v1470_v49  ;;  %v1486_v16 = vadd.f32 %v1485_v44, %v1484_v31  ;;  %s2017_s6 = sld [smem:[#allocation8 + $0x2]] }
 0x250   :  { %2082 = vrsqrt.f32 %v793_v0 }
 0x25a   :  { %v2083_v35 = vpop.eup %2082 }
 0x25b   :  { %2052 = vpush %v2083_v35 }
 0x25c   :  { %2054 = vpush %v1122_v7 }
 0x25d   :  { %2056 = vpush %v1136_v29 }
 0x28c   :  { %s2053_s21 = spop %2052 }
 0x28d   :  { %s797_s19 = smul.f32 %s2053_s21, %s796_s25  ;;  %s2055_s5 = spop %2054 }
 0x28e   :  { %s3741_s26 = smul.f32 0.001953125, %s2055_s5  ;;  %s2057_s3 = spop %2056 }
 0x28f   :  { %v801_v10 = vstv %s797_s19  ;;  %s1139_s13 = smul.f32 0.001953125, %s2057_s3  ;;  %s2018_s25 = sld [smem:[#allocation10 + $0x2]] }
 0x290   :  { %v802_v62 = vmul.f32 %v801_v10, %v799_v14  ;;  %v803_v1 = vmul.f32 %v801_v10, %v800_v17  ;;  %s1140_s10 = smul.f32 %s3741_s26, %s3741_s26  ;;  %v1148_v8 = vstv %s3741_s26  ;;  %s3847_s19 = sld [smem:[#allocation11 + $0x1]] }
 0x291   :  { %v1149_v57 = vsub.f32 %v3694_v15, %v1148_v8  ;;  %v1150_v41 = vsub.f32 %v3698_v40, %v1148_v8  ;;  %s3849_s5 = sld [smem:[#allocation11]]  ;;  %s3855_s26 = sld [smem:[#allocation11 + $0x2]] }
 0x292   :  { %v3745_v59 = vadd.f32 %v805_v32, %v802_v62  ;;  %v3747_v26 = vadd.f32 %v805_v32, %v803_v1  ;;  %s1141_s17 = ssub.f32 %s1139_s13, %s1140_s10  ;;  %s3857_s3 = sld [smem:[#allocation11 + $0x3]] }
 0x293   :  { %s3892_s13 = sld [smem:[#allocation11 + $0x4]]  ;;  %s3901_s10 = sld [smem:[#allocation11 + $0x5]] }
 0x294   :  { %s1142_s8 = sadd.f32 1e-05, %s1141_s17  ;;  %1510 = vrot.lane.b32.xlu0 %v3747_v26, %s4640_s16  ;;  %1508 = vrot.lane.b32.xlu1 %v3745_v59, %s4640_s16  ;;  %s3909_s17 = sld [smem:[#allocation11 + $0x6]] }
 0x295   :  { %v1505_v9 = vstv %s2018_s25 }
 0x296   :  { %v1143_v4 = vstv %s1142_s8  ;;  %v1531_v14 = vstv %s3847_s19  ;;  %s3913_s8 = sld [smem:[#allocation11 + $0x7]] }
 0x297   :  { %2084 = vrsqrt.f32 %v1143_v4  ;;  %v1517_v32 = vstv %s3849_s5  ;;  %v1545_v25 = vstv %s3855_s26 }
 0x298   :  { %1536 = vrot.lane.b32.xlu0 %v3745_v59, %s4641_s29  ;;  %1522 = vrot.lane.b32.xlu1 %v3745_v59, %s4642_s11 }
 0x29c   :  { %1550 = vrot.lane.b32.xlu0 %v3745_v59, %s4643_s30  ;;  %1524 = vrot.lane.b32.xlu1 %v3747_v26, %s4642_s11 }
 0x2a0   :  { %1570 = vrot.lane.b32.xlu0 %v3745_v59, %s4644_s27  ;;  %1538 = vrot.lane.b32.xlu1 %v3747_v26, %s4641_s29 }
 0x2a1   :  { %v2085_v42 = vpop.eup %2084 }
 0x2a2   :  { %2058 = vpush %v2085_v42 }
 0x2a3   :  { %2060 = vpush %v1472_v30  ;;  %v1559_v30 = vstv %s3857_s3 }
 0x2a4   :  { %2062 = vpush %v1486_v16  ;;  %1584 = vrot.lane.b32.xlu0 %v3745_v59, %s4645_s28  ;;  %1552 = vrot.lane.b32.xlu1 %v3747_v26, %s4643_s30 }
 0x2a8   :  { %1598 = vrot.lane.b32.xlu0 %v3745_v59, %s4646_s7  ;;  %1572 = vrot.lane.b32.xlu1 %v3747_v26, %s4644_s27 }
 0x2ac   :  { %1612 = vrot.lane.b32.xlu0 %v3745_v59, %s4647_s2  ;;  %1586 = vrot.lane.b32.xlu1 %v3747_v26, %s4645_s28 }
 0x2b0   :  { %1600 = vrot.lane.b32.xlu1 %v3747_v26, %s4646_s7 }
 0x2b4   :  { %1614 = vrot.lane.b32.xlu1 %v3747_v26, %s4647_s2 }
 0x2d3   :  { %s2059_s18 = spop %2058 }
 0x2d4   :  { %s1147_s20 = smul.f32 %s2059_s18, %s1979_s14  ;;  %s2061_s0 = spop %2060 }
 0x2d5   :  { %s3784_s9 = smul.f32 0.001953125, %s2061_s0  ;;  %s2063_s12 = spop %2062 }
 0x2d6   :  { %v1151_v12 = vstv %s1147_s20  ;;  %s1489_s1 = smul.f32 0.001953125, %s2063_s12  ;;  %s4001_s14 = sld [smem:[#allocation11 + $0x10]] }
 0x2d7   :  { %v1152_v2 = vmul.f32 %v1151_v12, %v1149_v57  ;;  %v1153_v24 = vmul.f32 %v1151_v12, %v1150_v41  ;;  %s1490_s23 = smul.f32 %s3784_s9, %s3784_s9  ;;  %v1498_v46 = vstv %s3784_s9  ;;  %s4013_s18 = sld [smem:[#allocation11 + $0x12]] }
 0x2d8   :  { %v1499_v27 = vsub.f32 %v3708_v58, %v1498_v46  ;;  %v1500_v43 = vsub.f32 %v3710_v23, %v1498_v46  ;;  %s4028_s20 = sld [smem:[#allocation11 + $0x13]]  ;;  %s4038_s0 = sld [smem:[#allocation11 + $0x14]] }
 0x2d9   :  { %v3788_v38 = vadd.f32 %v1155_v61, %v1152_v2  ;;  %v3790_v50 = vadd.f32 %v1155_v61, %v1153_v24  ;;  %s1491_s24 = ssub.f32 %s1489_s1, %s1490_s23  ;;  %s4050_s9 = sld [smem:[#allocation11 + $0x15]] }
 0x2da   :  { %s4052_s12 = sld [smem:[#allocation11 + $0x16]]  ;;  %s4070_s1 = sld [smem:[#allocation11 + $0x17]] }
 0x2db   :  { %s1492_s4 = sadd.f32 1e-05, %s1491_s24  ;;  %1628 = vrot.lane.b32.xlu1 %v3790_v50, %s4640_s16  ;;  %1626 = vrot.lane.b32.xlu0 %v3788_v38, %s4640_s16  ;;  %s4074_s23 = sld [smem:[#allocation11 + $0x18]] }
 0x2dc   :  { %s4086_s24 = sld [smem:[#allocation11 + $0x19]] }
 0x2dd   :  { %v1493_v15 = vstv %s1492_s4  ;;  %s4098_s4 = sld [smem:[#allocation11 + $0x1a]] }
 0x2de   :  { %2086 = vrsqrt.f32 %v1493_v15 }
 0x2df   :  { %1642 = vrot.lane.b32.xlu1 %v3790_v50, %s4642_s11  ;;  %1640 = vrot.lane.b32.xlu0 %v3788_v38, %s4642_s11 }
 0x2e3   :  { %1656 = vrot.lane.b32.xlu1 %v3790_v50, %s4641_s29  ;;  %1654 = vrot.lane.b32.xlu0 %v3788_v38, %s4641_s29 }
 0x2e7   :  { %1670 = vrot.lane.b32.xlu1 %v3790_v50, %s4643_s30  ;;  %1668 = vrot.lane.b32.xlu0 %v3788_v38, %s4643_s30 }
 0x2e8   :  { %v2087_v40 = vpop.eup %2086 }
 0x2e9   :  { %2064 = vpush %v2087_v40 }
 0x2eb   :  { %1690 = vrot.lane.b32.xlu1 %v3790_v50, %s4644_s27  ;;  %1688 = vrot.lane.b32.xlu0 %v3788_v38, %s4644_s27 }
 0x2ef   :  { %1704 = vrot.lane.b32.xlu1 %v3790_v50, %s4645_s28  ;;  %1702 = vrot.lane.b32.xlu0 %v3788_v38, %s4645_s28 }
 0x2f3   :  { %1718 = vrot.lane.b32.xlu1 %v3790_v50, %s4646_s7  ;;  %1716 = vrot.lane.b32.xlu0 %v3788_v38, %s4646_s7 }
 0x2f7   :  { %1732 = vrot.lane.b32.xlu1 %v3790_v50, %s4647_s2  ;;  %1730 = vrot.lane.b32.xlu0 %v3788_v38, %s4647_s2 }
 0x306   :  { %v1509_v22 = vpop.permute.xlu1 %1508  ;;  %v1511_v53 = vpop.permute.xlu0 %1510 }
 0x307   :  { %v1513_v54 = vsel %vm137_vm3, %v1511_v53, %v1509_v22  ;;  %v1512_v47 = vsel %vm137_vm3, %v1509_v22, %v1511_v53  ;;  %v1579_v53 = vstv %s3901_s10 }
 0x308   :  { %v1514_v60 = vsel %vm2973_vm5, %v1513_v54, 0.0  ;;  %v1515_v49 = vsel %vm2905_vm4, %v1512_v47, 0.0 }
 0x309   :  { %v1518_v8 = vmul.f32 %v1517_v32, %v1514_v60  ;;  %v1519_v12 = vmul.f32 %v1517_v32, %v1515_v49 }
 0x30a   :  { %v1523_v36 = vpop.permute.xlu1 %1522  ;;  %v1537_v23 = vpop.permute.xlu0 %1536 }
 0x30e   :  { %v1525_v21 = vpop.permute.xlu1 %1524  ;;  %v1551_v7 = vpop.permute.xlu0 %1550 }
 0x30f   :  { %v1527_v19 = vsel %vm230_vm6, %v1525_v21, %v1523_v36  ;;  %v1526_v62 = vsel %vm230_vm6, %v1523_v36, %v1525_v21 }
 0x310   :  { %v1528_v17 = vsel %vm94_vm1, %v1527_v19, 0.0  ;;  %v1533_v42 = vmul.f32 %v1531_v14, %v1526_v62 }
 0x311   :  { %v1532_v31 = vmul.f32 %v1531_v14, %v1528_v17 }
 0x312   :  { %v1539_v58 = vpop.permute.xlu1 %1538  ;;  %v1571_v34 = vpop.permute.xlu0 %1570  ;;  %v1535_v40 = vadd.f32 %v1533_v42, %v1519_v12 }
 0x313   :  { %v1541_v5 = vsel %vm263_vm8, %v1539_v58, %v1537_v23  ;;  %v1540_v10 = vsel %vm263_vm8, %v1537_v23, %v1539_v58  ;;  %v1534_v2 = vadd.f32 %v1532_v31, %v1518_v8 }
 0x314   :  { %v1542_v55 = vsel %vm3161_vm10, %v1541_v5, 0.0  ;;  %v1543_v51 = vsel %vm3113_vm9, %v1540_v10, 0.0 }
 0x315   :  { %v1546_v57 = vmul.f32 %v1545_v25, %v1542_v55  ;;  %v1547_v61 = vmul.f32 %v1545_v25, %v1543_v51 }
 0x316   :  { %v1553_v35 = vpop.permute.xlu1 %1552  ;;  %v1585_v44 = vpop.permute.xlu0 %1584 }
 0x317   :  { %v1555_v1 = vsel %vm4302_vm11, %v1553_v35, %v1551_v7  ;;  %v1554_v4 = vsel %vm4302_vm11, %v1551_v7, %v1553_v35  ;;  %v1548_v46 = vadd.f32 %v1546_v57, %v1534_v2  ;;  %v1549_v36 = vadd.f32 %v1547_v61, %v1535_v40  ;;  %vm4649_vm11 = vmmov %vm4648_vm13 }
 0x318   :  { %v1556_v16 = vsel %vm2858_vm2, %v1555_v1, 0.0  ;;  %v1557_v41 = vsel %vm2905_vm4, %v1554_v4, 0.0  ;;  %v1607_v1 = vstv %s3913_s8 }
 0x319   :  { %v1560_v24 = vmul.f32 %v1559_v30, %v1556_v16  ;;  %v1561_v22 = vmul.f32 %v1559_v30, %v1557_v41 }
 0x31a   :  { %s2065_s22 = spop %2064  ;;  %v1573_v29 = vpop.permute.xlu1 %1572 }
 0x31b   :  { %s1497_s21 = smul.f32 %s2065_s22, %s2017_s6  ;;  %v1563_v21 = vadd.f32 %v1561_v22, %v1549_v36  ;;  %s4665_s22 = sld [smem:[#allocation91_spill]] }
 0x31d   :  { %v1501_v39 = vstv %s1497_s21  ;;  %s2213_s21 = smov [#allocation13]  }
 0x31e   :  { %v1502_v63 = vmul.f32 %v1501_v39, %v1499_v27  ;;  %v1503_v0 = vmul.f32 %v1501_v39, %v1500_v43  ;;  %v1587_v33 = vpop.permute.xlu1 %1586  ;;  %v1574_v27 = vsel %vm329_vm12, %v1571_v34, %v1573_v29  ;;  %v1599_v43 = vpop.permute.xlu0 %1598  ;;  %v1565_v39 = vstv %s3892_s13  ;;  %s1896_s19 = sshll.u32 %s2213_s21, 4  ;;  %s1897_s19 = int_to_ptr.vmem [resolvable:$true] %s1896_s19 }
 0x31f   :  { %v1576_v58 = vsel %vm3094_vm7, %v1574_v27, 0.0  ;;  %v1589_v23 = vsel %vm4649_vm11, %v1587_v33, %v1585_v44  ;;  %v1566_v35 = vmul.f32 %v1565_v39, %v3745_v59  ;;  %v1567_v19 = vmul.f32 %v1565_v39, %v3747_v26  ;;  %s2166_s5 = scalar_lea.vmem %s1897_s19, 64  ;;  %p2171_p1 = scmp.lt.s32.totalorder %s1897_s19, %s1897_s19 }
 0x320   :  { %v3827_v56 = vadd.f32 %v1505_v9, %v1502_v63  ;;  %v3829_v6 = vadd.f32 %v1505_v9, %v1503_v0  ;;  %v1575_v9 = vsel %vm329_vm12, %v1573_v29, %v1571_v34  ;;  %v1562_v63 = vadd.f32 %v1560_v24, %v1548_v46  ;;  %p2167_p0 = scmp.ne.s32.totalorder %s1897_s19, %s2166_s5  ;;  %p2172_p2 = scmp.lt.s32.totalorder %s2166_s5, %s2166_s5 }
 0x321   :  { %v1588_v0 = vsel %vm4648_vm13, %v1585_v44, %v1587_v33  ;;  %v1577_v7 = vsel %vm3113_vm9, %v1575_v9, 0.0  ;;  %v1593_v34 = vstv %s3909_s17  ;;  %vm4650_vm13 = vcmp.lt.s32.totalorder %v2490_v37, 112 }
 0x322   :  { %1746 = vrot.lane.b32.xlu1 %v3829_v6, %s4640_s16  ;;  %1744 = vrot.lane.b32.xlu0 %v3827_v56, %s4640_s16  ;;  %v1601_v15 = vpop.permute.xlu1 %1600  ;;  %s3920_s16 = sld [smem:[#allocation11 + $0x8]]  ;;  %v1590_v54 = vsel %vm2858_vm2, %v1588_v0, 0.0  ;;  %v1568_v47 = vadd.f32 %v1566_v35, %v1562_v63  ;;  %v1580_v14 = vmul.f32 %v1579_v53, %v1576_v58  ;;  %v1591_v17 = vsel %vm3443_vm15, %v1589_v23, 0.0  ;;  %v1613_v59 = vpop.permute.xlu0 %1612  ;;  %p2173_p3 = por %p2172_p2, %p2171_p1 }
 0x323   :  { %v1603_v5 = vsel %vm4650_vm13, %v1601_v15, %v1599_v43  ;;  %v1569_v10 = vadd.f32 %v1567_v19, %v1563_v21  ;;  %v1581_v32 = vmul.f32 %v1579_v53, %v1577_v7  ;;  %v1594_v62 = vmul.f32 %v1593_v34, %v1590_v54 }
 0x324   :  { %vm4651_vm11 = vcmp.lt.s32.totalorder %v2531_v52, 240  ;;  %v1595_v60 = vmul.f32 %v1593_v34, %v1591_v17  ;;  %v1582_v55 = vadd.f32 %v1580_v14, %v1568_v47  ;;  %v1602_v4 = vsel %vm4650_vm13, %v1599_v43, %v1601_v15  ;;  %p2174_p4 = pnand %p2173_p3, %p2167_p0 }
 0x325   :  { %v1605_v33 = vsel %vm4651_vm11, %v1603_v5, 0.0  ;;  %v1583_v51 = vadd.f32 %v1581_v32, %v1569_v10  ;;  %v1608_v2 = vmul.f32 %v1607_v1, %v1602_v4  ;;  %vm4652_vm11 = vcmp.lt.s32.totalorder %v2490_v37, 1 }
 0x326   :  { %1760 = vrot.lane.b32.xlu1 %v3829_v6, %s4642_s11  ;;  %1758 = vrot.lane.b32.xlu0 %v3827_v56, %s4642_s11  ;;  %v1615_v29 = vpop.permute.xlu1 %1614  ;;  %s3945_s11 = sld [smem:[#allocation11 + $0xa]]  ;;  %v1609_v44 = vmul.f32 %v1607_v1, %v1605_v33  ;;  %v1596_v8 = vadd.f32 %v1594_v62, %v1582_v55  ;;  %vm4653_vm13 = vmmov %vm4652_vm11 }
 0x327   :  { %v1617_v26 = vsel %vm428_vm14, %v1615_v29, %v1613_v59  ;;  %v1616_v25 = vsel %vm428_vm14, %v1613_v59, %v1615_v29  ;;  %v1597_v61 = vadd.f32 %v1595_v60, %v1583_v51 }
 0x328   :  { %v1621_v49 = vstv %s3920_s16  ;;  %v1619_v31 = vsel %vm3605_vm0, %v1617_v26, 0.0  ;;  %v1618_v57 = vsel %vm3094_vm7, %v1616_v25, 0.0  ;;  %v1610_v63 = vadd.f32 %v1608_v2, %v1596_v8 }
 0x329   :  { %v1623_v24 = vmul.f32 %v1621_v49, %v1619_v31  ;;  %v1611_v40 = vadd.f32 %v1609_v44, %v1597_v61  ;;  %v1622_v22 = vmul.f32 %v1621_v49, %v1618_v57 }
 0x32a   :  { %1774 = vrot.lane.b32.xlu1 %v3829_v6, %s4641_s29  ;;  %1772 = vrot.lane.b32.xlu0 %v3827_v56, %s4641_s29  ;;  %s3927_s29 = sld [smem:[#allocation11 + $0x9]] }
 0x32b   :  { %v1625_v0 = vadd.f32 %v1623_v24, %v1611_v40  ;;  %v1624_v23 = vadd.f32 %v1622_v22, %v1610_v63 }
 0x32c   :  { %v1649_v39 = vstv %s3945_s11 }
 0x32e   :  { %1788 = vrot.lane.b32.xlu1 %v3829_v6, %s4643_s30  ;;  %1786 = vrot.lane.b32.xlu0 %v3827_v56, %s4643_s30  ;;  %s3955_s30 = sld [smem:[#allocation11 + $0xb]] }
 0x330   :  { %v1635_v30 = vstv %s3927_s29 }
 0x332   :  { %1808 = vrot.lane.b32.xlu1 %v3829_v6, %s4644_s27  ;;  %1806 = vrot.lane.b32.xlu0 %v3827_v56, %s4644_s27  ;;  %s3967_s27 = sld [smem:[#allocation11 + $0xc]] }
 0x334   :  { %v1663_v29 = vstv %s3955_s30 }
 0x336   :  { %1822 = vrot.lane.b32.xlu1 %v3829_v6, %s4645_s28  ;;  %1820 = vrot.lane.b32.xlu0 %v3827_v56, %s4645_s28  ;;  %s3976_s28 = sld [smem:[#allocation11 + $0xd]] }
 0x338   :  { %v1677_v62 = vstv %s3967_s27 }
 0x33a   :  { %1836 = vrot.lane.b32.xlu1 %v3829_v6, %s4646_s7  ;;  %1834 = vrot.lane.b32.xlu0 %v3827_v56, %s4646_s7  ;;  %s2032_s7 = sld [smem:[#allocation11 + $0xe]] }
 0x33c   :  { %v1683_v31 = vstv %s3976_s28 }
 0x33d   :  { %v1684_v57 = vmul.f32 %v1683_v31, %v3788_v38 }
 0x33e   :  { %1850 = vrot.lane.b32.xlu1 %v3829_v6, %s4647_s2  ;;  %1848 = vrot.lane.b32.xlu0 %v3827_v56, %s4647_s2  ;;  %s2033_s2 = sld [smem:[#allocation11 + $0xf]] }
 0x34d   :  { %v1629_v42 = vpop.permute.xlu1 %1628  ;;  %v1627_v16 = vpop.permute.xlu0 %1626 }
 0x34e   :  { %v1630_v41 = vsel %vm137_vm3, %v1627_v16, %v1629_v42  ;;  %v1631_v12 = vsel %vm137_vm3, %v1629_v42, %v1627_v16 }
 0x34f   :  { %v1633_v15 = vsel %vm2905_vm4, %v1630_v41, 0.0  ;;  %v1632_v46 = vsel %vm2973_vm5, %v1631_v12, 0.0  ;;  %v1685_v41 = vmul.f32 %v1683_v31, %v3790_v50 }
 0x350   :  { %v1637_v27 = vmul.f32 %v1635_v30, %v1633_v15  ;;  %v1636_v58 = vmul.f32 %v1635_v30, %v1632_v46 }
 0x351   :  { %v1643_v43 = vpop.permute.xlu1 %1642  ;;  %v1641_v36 = vpop.permute.xlu0 %1640 }
 0x352   :  { %v1645_v9 = vsel %vm230_vm6, %v1643_v43, %v1641_v36  ;;  %v1644_v21 = vsel %vm230_vm6, %v1641_v36, %v1643_v43  ;;  %v1639_v35 = vadd.f32 %v1637_v27, %v1625_v0  ;;  %v1638_v59 = vadd.f32 %v1636_v58, %v1624_v23 }
 0x353   :  { %v1646_v53 = vsel %vm94_vm1, %v1645_v9, 0.0  ;;  %v1651_v54 = vmul.f32 %v1649_v39, %v1644_v21  ;;  %v1697_v43 = vstv %s2032_s7  ;;  %v1711_v21 = vstv %s2033_s2 }
 0x354   :  { %v1650_v34 = vmul.f32 %v1649_v39, %v1646_v53 }
 0x355   :  { %v1657_v7 = vpop.permute.xlu1 %1656  ;;  %v1655_v19 = vpop.permute.xlu0 %1654  ;;  %v1653_v60 = vadd.f32 %v1651_v54, %v1639_v35 }
 0x356   :  { %v1658_v5 = vsel %vm263_vm8, %v1655_v19, %v1657_v7  ;;  %v1659_v47 = vsel %vm263_vm8, %v1657_v7, %v1655_v19  ;;  %v1652_v33 = vadd.f32 %v1650_v34, %v1638_v59  ;;  %v1725_v34 = vstv %s4001_s14 }
 0x357   :  { %v1660_v14 = vsel %vm3161_vm10, %v1659_v47, 0.0  ;;  %v1661_v17 = vsel %vm3113_vm9, %v1658_v5, 0.0  ;;  %v1739_v59 = vstv %s4007_s15 }
 0x358   :  { %v1664_v10 = vmul.f32 %v1663_v29, %v1660_v14  ;;  %v1665_v32 = vmul.f32 %v1663_v29, %v1661_v17 }
 0x359   :  { %v1671_v26 = vpop.permute.xlu1 %1670  ;;  %v1669_v1 = vpop.permute.xlu0 %1668 }
 0x35a   :  { %v1672_v25 = vsel %vm4652_vm11, %v1669_v1, %v1671_v26  ;;  %v1673_v55 = vsel %vm4653_vm13, %v1671_v26, %v1669_v1  ;;  %v1666_v51 = vadd.f32 %v1664_v10, %v1652_v33  ;;  %v1667_v44 = vadd.f32 %v1665_v32, %v1653_v60 }
 0x35b   :  { %v1674_v4 = vsel %vm2858_vm2, %v1673_v55, 0.0  ;;  %v1675_v49 = vsel %vm2905_vm4, %v1672_v25, 0.0  ;;  %vm4654_vm11 = vcmp.lt.s32.totalorder %v2490_v37, 113  ;;  %v1753_v1 = vstv %s4013_s18 }
 0x35c   :  { %v1678_v42 = vmul.f32 %v1677_v62, %v1674_v4  ;;  %v1679_v30 = vmul.f32 %v1677_v62, %v1675_v49  ;;  %vm4655_vm13 = vmmov %vm4654_vm11 }
 0x35d   :  { %v1691_v2 = vpop.permute.xlu1 %1690  ;;  %v1689_v24 = vpop.permute.xlu0 %1688 }
 0x35e   :  { %v1680_v16 = vadd.f32 %v1678_v42, %v1666_v51  ;;  %v1681_v8 = vadd.f32 %v1679_v30, %v1667_v44  ;;  %v1692_v27 = vsel %vm329_vm12, %v1689_v24, %v1691_v2  ;;  %v1693_v38 = vsel %vm329_vm12, %v1691_v2, %v1689_v24 }
 0x35f   :  { %v1694_v36 = vsel %vm3094_vm7, %v1692_v27, 0.0  ;;  %v1695_v9 = vsel %vm3113_vm9, %v1693_v38, 0.0  ;;  %v1781_v38 = vstv %s4038_s0 }
 0x360   :  { %v1686_v12 = vadd.f32 %v1684_v57, %v1680_v16  ;;  %v1687_v61 = vadd.f32 %v1685_v41, %v1681_v8  ;;  %v1698_v23 = vmul.f32 %v1697_v43, %v1694_v36  ;;  %v1699_v7 = vmul.f32 %v1697_v43, %v1695_v9 }
 0x361   :  { %v1705_v15 = vpop.permute.xlu1 %1704  ;;  %v1703_v40 = vpop.permute.xlu0 %1702 }
 0x362   :  { %v1706_v50 = vsel %vm4654_vm11, %v1703_v40, %v1705_v15  ;;  %v1707_v39 = vsel %vm4655_vm13, %v1705_v15, %v1703_v40  ;;  %vm4656_vm11 = vcmp.lt.s32.totalorder %v2490_v37, 112  ;;  %vm4657_vm13 = vcmp.lt.s32.totalorder %v2531_v52, 240 }
 0x363   :  { %v1708_v53 = vsel %vm2858_vm2, %v1706_v50, 0.0  ;;  %v1709_v35 = vsel %vm3443_vm15, %v1707_v39, 0.0  ;;  %v1700_v14 = vadd.f32 %v1698_v23, %v1686_v12  ;;  %v1701_v32 = vadd.f32 %v1699_v7, %v1687_v61 }
 0x364   :  { %v1712_v19 = vmul.f32 %v1711_v21, %v1708_v53  ;;  %v1713_v5 = vmul.f32 %v1711_v21, %v1709_v35  ;;  %v1767_v12 = vstv %s4028_s20  ;;  %v1795_v35 = vstv %s4050_s9 }
 0x365   :  { %v1719_v22 = vpop.permute.xlu1 %1718  ;;  %v1717_v46 = vpop.permute.xlu0 %1716 }
 0x366   :  { %v1721_v58 = vsel %vm4656_vm11, %v1719_v22, %v1717_v46  ;;  %v1720_v17 = vsel %vm4656_vm11, %v1717_v46, %v1719_v22  ;;  %v1714_v60 = vadd.f32 %v1712_v19, %v1700_v14  ;;  %v1715_v49 = vadd.f32 %v1713_v5, %v1701_v32 }
 0x367   :  { %v1723_v54 = vsel %vm4657_vm13, %v1721_v58, 0.0  ;;  %v1726_v31 = vmul.f32 %v1725_v34, %v1720_v17 }
 0x368   :  { %v1727_v26 = vmul.f32 %v1725_v34, %v1723_v54 }
 0x369   :  { %v1733_v63 = vpop.permute.xlu1 %1732  ;;  %v1731_v0 = vpop.permute.xlu0 %1730  ;;  %v1728_v2 = vadd.f32 %v1726_v31, %v1714_v60 }
 0x36a   :  { %v1735_v29 = vsel %vm428_vm14, %v1733_v63, %v1731_v0  ;;  %v1734_v47 = vsel %vm428_vm14, %v1731_v0, %v1733_v63  ;;  %v1729_v42 = vadd.f32 %v1727_v26, %v1715_v49 }
 0x36b   :  { %v1737_v10 = vsel %vm3605_vm0, %v1735_v29, 0.0  ;;  %v1736_v25 = vsel %vm3094_vm7, %v1734_v47, 0.0  ;;  %v1801_v29 = vstv %s4052_s12 }
 0x36c   :  { %v1741_v51 = vmul.f32 %v1739_v59, %v1737_v10  ;;  %v1740_v30 = vmul.f32 %v1739_v59, %v1736_v25  ;;  %v1802_v26 = vmul.f32 %v1801_v29, %v3827_v56 }
 0x36e   :  { %v1743_v24 = vadd.f32 %v1741_v51, %v1729_v42  ;;  %v1742_v22 = vadd.f32 %v1740_v30, %v1728_v2  ;;  %v1829_v51 = vstv %s4074_s23 }
 0x394   :  { %v1747_v62 = vpop.permute.xlu1 %1746  ;;  %v1745_v33 = vpop.permute.xlu0 %1744 }
 0x395   :  { %v1748_v55 = vsel %vm137_vm3, %v1745_v33, %v1747_v62  ;;  %v1749_v4 = vsel %vm137_vm3, %v1747_v62, %v1745_v33  ;;  %v1803_v62 = vmul.f32 %v1801_v29, %v3829_v6 }
 0x396   :  { %v1751_v44 = vsel %vm2905_vm4, %v1748_v55, 0.0  ;;  %v1750_v16 = vsel %vm2973_vm5, %v1749_v4, 0.0  ;;  %v1815_v55 = vstv %s4070_s1 }
 0x397   :  { %v1755_v8 = vmul.f32 %v1753_v1, %v1751_v44  ;;  %v1754_v40 = vmul.f32 %v1753_v1, %v1750_v16 }
 0x398   :  { %v1761_v57 = vpop.permute.xlu1 %1760  ;;  %v1759_v41 = vpop.permute.xlu0 %1758 }
 0x399   :  { %v1763_v61 = vsel %vm230_vm6, %v1761_v57, %v1759_v41  ;;  %v1762_v15 = vsel %vm230_vm6, %v1759_v41, %v1761_v57  ;;  %v1757_v46 = vadd.f32 %v1755_v8, %v1743_v24  ;;  %v1756_v21 = vadd.f32 %v1754_v40, %v1742_v22  ;;  %vm4662_vm6 = vmmov %vm4656_vm11 }
 0x39a   :  { %v1764_v18 = vsel %vm94_vm1, %v1763_v61, 0.0  ;;  %v1769_v36 = vmul.f32 %v1767_v12, %v1762_v15  ;;  %vm4658_vm1 = vcmp.lt.s32.totalorder %v2490_v37, 1  ;;  %v1843_v61 = vstv %s4086_s24 }
 0x39b   :  { %v1768_v43 = vmul.f32 %v1767_v12, %v1764_v18  ;;  %vm4659_vm3 = vmmov %vm4658_vm1 }
 0x39c   :  { %v1775_v27 = vpop.permute.xlu1 %1774  ;;  %v1773_v50 = vpop.permute.xlu0 %1772  ;;  %v1771_v34 = vadd.f32 %v1769_v36, %v1757_v46 }
 0x39d   :  { %v1776_v39 = vsel %vm263_vm8, %v1773_v50, %v1775_v27  ;;  %v1777_v9 = vsel %vm263_vm8, %v1775_v27, %v1773_v50  ;;  %v1770_v19 = vadd.f32 %v1768_v43, %v1756_v21  ;;  %vm4663_vm8 = vmmov %vm4662_vm6  ;;  %v1857_v50 = vstv %s4098_s4 }
 0x39e   :  { %v1778_v63 = vsel %vm3161_vm10, %v1777_v9, 0.0  ;;  %v1779_v0 = vsel %vm3113_vm9, %v1776_v39, 0.0 }
 0x39f   :  { %v1782_v53 = vmul.f32 %v1781_v38, %v1778_v63  ;;  %v1783_v58 = vmul.f32 %v1781_v38, %v1779_v0 }
 0x3a0   :  { %v1789_v23 = vpop.permute.xlu1 %1788  ;;  %v1787_v7 = vpop.permute.xlu0 %1786 }
 0x3a1   :  { %v1790_v48 = vsel %vm4658_vm1, %v1787_v7, %v1789_v23  ;;  %v1791_v54 = vsel %vm4659_vm3, %v1789_v23, %v1787_v7  ;;  %v1784_v14 = vadd.f32 %v1782_v53, %v1770_v19  ;;  %v1785_v17 = vadd.f32 %v1783_v58, %v1771_v34 }
 0x3a2   :  { %v1792_v5 = vsel %vm2858_vm2, %v1791_v54, 0.0  ;;  %v1793_v47 = vsel %vm2905_vm4, %v1790_v48, 0.0  ;;  %vm4660_vm4 = vcmp.lt.s32.totalorder %v2490_v37, 113  ;;  %v1863_v23 = vstv %s4665_s22 }
 0x3a3   :  { %v1796_v59 = vmul.f32 %v1795_v35, %v1792_v5  ;;  %v1797_v10 = vmul.f32 %v1795_v35, %v1793_v47  ;;  %vm4661_vm5 = vmmov %vm4660_vm4 }
 0x3a4   :  { %v1809_v32 = vpop.permute.xlu1 %1808  ;;  %v1807_v1 = vpop.permute.xlu0 %1806 }
 0x3a5   :  { %v1798_v33 = vadd.f32 %v1796_v59, %v1784_v14  ;;  %v1799_v60 = vadd.f32 %v1797_v10, %v1785_v17  ;;  %v1810_v25 = vsel %vm329_vm12, %v1807_v1, %v1809_v32  ;;  %v1811_v20 = vsel %vm329_vm12, %v1809_v32, %v1807_v1 }
 0x3a6   :  { %v1812_v4 = vsel %vm3094_vm7, %v1810_v25, 0.0  ;;  %v1813_v6 = vsel %vm3113_vm9, %v1811_v20, 0.0  ;;  %vm4664_vm9 = vmmov %vm4657_vm13 }
 0x3a7   :  { %v1804_v49 = vadd.f32 %v1802_v26, %v1798_v33  ;;  %v1805_v56 = vadd.f32 %v1803_v62, %v1799_v60  ;;  %v1816_v42 = vmul.f32 %v1815_v55, %v1812_v4  ;;  %v1817_v45 = vmul.f32 %v1815_v55, %v1813_v6 }
 0x3a8   :  { %v1823_v31 = vpop.permute.xlu1 %1822  ;;  %v1821_v44 = vpop.permute.xlu0 %1820 }
 0x3a9   :  { %v1824_v30 = vsel %vm4660_vm4, %v1821_v44, %v1823_v31  ;;  %v1825_v16 = vsel %vm4661_vm5, %v1823_v31, %v1821_v44  ;;  %v1818_v24 = vadd.f32 %v1816_v42, %v1804_v49  ;;  %v1819_v22 = vadd.f32 %v1817_v45, %v1805_v56 }
 0x3aa   :  { %v1826_v8 = vsel %vm2858_vm2, %v1824_v30, 0.0  ;;  %v1827_v57 = vsel %vm3443_vm15, %v1825_v16, 0.0 }
 0x3ab   :  { %v1830_v41 = vmul.f32 %v1829_v51, %v1826_v8  ;;  %v1831_v15 = vmul.f32 %v1829_v51, %v1827_v57 }
 0x3ac   :  { %v1837_v12 = vpop.permute.xlu1 %1836  ;;  %v1835_v2 = vpop.permute.xlu0 %1834 }
 0x3ad   :  { %v1838_v18 = vsel %vm4662_vm6, %v1835_v2, %v1837_v12  ;;  %v1839_v40 = vsel %vm4663_vm8, %v1837_v12, %v1835_v2  ;;  %v1832_v11 = vadd.f32 %v1830_v41, %v1818_v24  ;;  %v1833_v36 = vadd.f32 %v1831_v15, %v1819_v22 }
 0x3ae   :  { %v1841_v3 = vsel %vm4664_vm9, %v1839_v40, 0.0  ;;  %v1844_v46 = vmul.f32 %v1843_v61, %v1838_v18 }
 0x3af   :  { %v1845_v27 = vmul.f32 %v1843_v61, %v1841_v3 }
 0x3b0   :  { %v1851_v38 = vpop.permute.xlu1 %1850  ;;  %v1849_v43 = vpop.permute.xlu0 %1848  ;;  %v1846_v0 = vadd.f32 %v1844_v46, %v1832_v11 }
 0x3b1   :  { %v1852_v39 = vsel %vm428_vm14, %v1849_v43, %v1851_v38  ;;  %v1853_v9 = vsel %vm428_vm14, %v1851_v38, %v1849_v43  ;;  %v1847_v21 = vadd.f32 %v1845_v27, %v1833_v36 }
 0x3b2   :  { %v1854_v63 = vsel %vm3094_vm7, %v1852_v39, 0.0  ;;  %v1855_v52 = vsel %vm3605_vm0, %v1853_v9, 0.0 }
 0x3b3   :  { %v1858_v53 = vmul.f32 %v1857_v50, %v1854_v63  ;;  %v1859_v58 = vmul.f32 %v1857_v50, %v1855_v52 }
 0x3b5   :  { %v1860_v35 = vadd.f32 %v1858_v53, %v1846_v0  ;;  %v1861_v7 = vadd.f32 %v1859_v58, %v1847_v21 }
 0x3b7   :  { %v1864_v29 = vadd.f32 %v1863_v23, %v1860_v35  ;;  %v1865_v19 = vadd.f32 %v1863_v23, %v1861_v7 }
 0x3b9   :  { %v2045_v37 = vmul.f32 -1.442695, %v1864_v29  ;;  %v2046_v34 = vmul.f32 -1.442695, %v1865_v19 }
 0x3bb   :  { %2088 = vpow2.f32 %v2045_v37 }
 0x3bc   :  { %2090 = vpow2.f32 %v2046_v34 }
 0x3c5   :  { %v2089_v28 = vpop.eup %2088 }
 0x3c6   :  { %v2091_v48 = vpop.eup %2090  ;;  %v1872_v13 = vadd.f32 1.0, %v2089_v28 }
 0x3c7   :  { %v1873_v54 = vadd.f32 1.0, %v2091_v48 }
 0x3c8   :  { %2092 = vrcp.f32 %v1872_v13 }
 0x3c9   :  { %2094 = vrcp.f32 %v1873_v54 }
 0x3d2   :  { %v2093_v5 = vpop.eup %2092 }
 0x3d3   :  { %v2095_v47 = vpop.eup %2094 }
 0x3d4   :  { %v1880_v14 = vcombine.low %v2093_v5, %v2095_v47 }
 0x3d6   :  { %2047 = vst.sshfl [vmem:[#allocation13] sm:$0x33 pattern:$0x76325410] %v1880_v14 }
 0x3d7   :  { %2177 = shalt.err (!%p2174_p4)
}
 0x3d8   :  { %s4666_s13 = sld [smem:[#allocation92_spill]] }
 0x3de   :  { %s2178_s10 = scalar_lea.hbm %s4666_s13, 64 }
 0x3df   :  { %p2179_p5 = scmp.ne.s32.totalorder %s4666_s13, %s2178_s10  ;;  %p2182_p6 = scmp.lt.u32.totalorder %s2178_s10, %s4666_s13 }
 0x3e1   :  { %p2184_p7 = pnand %p2182_p6, %p2179_p5 }
 0x3e3   :  { %2187 = shalt.err (!%p2184_p7)
}
 0x3e4   :  { %1899 = dma.vmem_to_hbm [thread:$0]  %s1897_s19, 64, %s4666_s13, [#allocation5]  }
 0x3e5   :  { %2196 = dma.done.wait [#allocation5], 64  }
 0x3e6   :  { %2197 = vsyncadd [#allocation5], 4294967232 }
 0x3e7   :  { %1903 = vsyncpa [#allocation4], 1 }
 0x3e8   :  { %1904 = vsyncpa [#allocation5], 1 }
 0x3e9   :  { %1905 = vsyncpa [#allocation6], 1 }
 0x3ea   :  { %1906 = vsyncpa [#allocation9], 1 }
 0x3eb   :  { %1907 = vsyncpa [#allocation12], 1 }

</bundles_post_ra>
